<compile_context>
chip_gen: v6e
topology: v6e:2x2x1
jax: 0.10.0
libtpu: 0.0.40
codegen_flags: <defaults>
</compile_context>

<pallas_src>
import functools

import jax
import jax.numpy as jnp
from jax import lax
from jax.experimental import pallas as pl
from jax.experimental.pallas import tpu as pltpu
import numpy as np


# ----------------------------------------------------------------------------
# Helpers
# ----------------------------------------------------------------------------
def _round_up(x, m):
    return (x + m - 1) // m * m


def _padded_block_bytes(shape, dtype=jnp.float32):
    """Bytes of a block once padded to the (8, 128) VMEM tiling."""
    shape = list(shape)
    if len(shape) >= 1:
        shape[-1] = _round_up(int(shape[-1]), 128)
    if len(shape) >= 2:
        shape[-2] = _round_up(int(shape[-2]), 8)
    n = 1
    for d in shape:
        n *= int(d)
    return n * np.dtype(dtype).itemsize


# ----------------------------------------------------------------------------
# Fused kernel.  One grid step == one (batch, head) pair == one (R, M) row strip.
#   permuted head-row index  c*R + a   <->   PyTorch-view row index  a*H + c
# Row permutation is harmless for softmax / context; the context maps back onto
# the output strip purely by column-block placement, so the MAIN output needs no
# fixup.  Only the (optional) attention tensor is emitted in permuted order.
# ----------------------------------------------------------------------------
def _fused_mha_kernel(xk_ref, xv_ref, xq_ref, wqkv_ref, bqkv_ref, wf_ref, bf_ref,
                      gamma_ref, beta_ref, *rest,
                      num_heads, scale, eps, with_attention, mxu_dtype,
                      approx_reciprocal):
    if with_attention:
        out_ref, att_ref, qh_s, kh_s, vh_s, ctx_s = rest
    else:
        out_ref, qh_s, kh_s, vh_s, ctx_s = rest
        att_ref = None

    xk = xk_ref[0]                       # (R, M) key strip
    xv = xv_ref[0]                       # (R, M) value strip
    xq = xq_ref[0]                       # (R, M) query strip (== residual strip)
    R, M = xq.shape
    H = num_heads
    D = M // H

    # --- QKV projections for this strip: three (R,M)x(M,M) MXU matmuls --------
    def _project(x, idx):
        w = wqkv_ref[idx]                          # (M, M)
        b = bqkv_ref[idx:idx + 1, :]               # (1, M)
        y = jnp.dot(x.astype(mxu_dtype), w.astype(mxu_dtype),
                    preferred_element_type=jnp.float32)
        return y + b

    kp = _project(xk, 0)                           # (R, M)
    vp = _project(xv, 1)
    qp = _project(xq, 2)
    if scale:                                      # mirror `if scale:` in reference
        qp = qp * scale                            # fold scale into q (R*M work)

    # --- Head split: (R, M) strip -> (S, D) head matrix in permuted row order.
    # H aligned rectangular block copies per tensor through VMEM scratch (no
    # in-kernel lane-dim reshapes).
    for c in range(H):
        rows = slice(c * R, (c + 1) * R)
        cols = slice(c * D, (c + 1) * D)
        qh_s[rows, :] = qp[:, cols]
        kh_s[rows, :] = kp[:, cols]
        vh_s[rows, :] = vp[:, cols]

    qh = qh_s[...]                                 # (S, D)
    kh = kh_s[...]
    vh = vh_s[...]

    # --- One head of attention: single scores matmul + single context matmul --
    # q @ k^T by contracting the last dims (no transpose / XLU work).
    s = lax.dot_general(qh.astype(mxu_dtype), kh.astype(mxu_dtype),
                        (((1,), (1,)), ((), ())),
                        preferred_element_type=jnp.float32)            # (S, S)
    m = jnp.max(s, axis=-1, keepdims=True)
    e = jnp.exp(s - m)                                                 # f32 VPU/EUP
    l = jnp.sum(e, axis=-1, keepdims=True)
    p = e * pl.reciprocal(l, approx=approx_reciprocal)                 # EUP slot

    if att_ref is not None:
        att_ref[0, 0] = p.astype(att_ref.dtype)    # permuted row/col block order

    ctx = jnp.dot(p.astype(mxu_dtype), vh.astype(mxu_dtype),
                  preferred_element_type=jnp.float32)                  # (S, D)

    # --- Back to the (R, M) strip layout: column block c <- row block c --------
    for c in range(H):
        ctx_s[:, c * D:(c + 1) * D] = ctx[c * R:(c + 1) * R, :]

    # --- Final linear (ONE full-depth (R,M)x(M,M) matmul), residual, LayerNorm -
    y = jnp.dot(ctx_s[...].astype(mxu_dtype), wf_ref[...].astype(mxu_dtype),
                preferred_element_type=jnp.float32) + bf_ref[...]
    z = xq + y                                     # residual = original query strip
    mu = jnp.mean(z, axis=-1, keepdims=True)
    var = jnp.mean((z - mu) * (z - mu), axis=-1, keepdims=True)
    zn = (z - mu) * lax.rsqrt(var + eps)
    out_ref[0] = (zn * gamma_ref[...] + beta_ref[...]).astype(out_ref.dtype)


# ----------------------------------------------------------------------------
# Wrapper
# ----------------------------------------------------------------------------
def multi_head_attention(key, value, query, params, num_heads, *,
                         return_attention=False,          # perf path by default
                         mxu_dtype=jnp.bfloat16,          # bf16 operands, f32 accum
                         approx_reciprocal=True,          # EUP approx softmax denom
                         att_dtype=jnp.float32,
                         weight_buffer_count=1):
    B, S, M = query.shape
    H = num_heads
    assert M % H == 0 and S % H == 0, "model_dim and seq_len must divide num_heads"
    D = M // H
    R = S // H

    # Quirky scale from the reference: (dim_per_head // num_heads) ** -0.5.
    scale = float((D // H) ** (-0.5))

    w_qkv = jnp.stack([params["wk"], params["wv"], params["wq"]], axis=0)  # (3,M,M)
    b_qkv = jnp.stack([params["bk"], params["bv"], params["bq"]], axis=0)  # (3,M)

    kernel = functools.partial(
        _fused_mha_kernel, num_heads=H, scale=scale, eps=1e-5,
        with_attention=return_attention, mxu_dtype=mxu_dtype,
        approx_reciprocal=approx_reciprocal)

    data_spec = pl.BlockSpec((1, R, M), lambda b, j: (b, j, 0))

    out_shape = [jax.ShapeDtypeStruct((B, S, M), jnp.float32)]
    out_specs = [pl.BlockSpec((1, R, M), lambda b, j: (b, j, 0))]
    if return_attention:
        out_shape.append(jax.ShapeDtypeStruct((B, H, S, S), att_dtype))
        out_specs.append(pl.BlockSpec((1, 1, S, S), lambda b, j: (b, j, 0, 0)))

    scratch_shapes = [pltpu.VMEM((S, D), jnp.float32) for _ in range(3)]
    scratch_shapes.append(pltpu.VMEM((R, M), jnp.float32))

    # VMEM budget derived from the actual (padded) block sizes, not hardcoded.
    wbufs = 1 if weight_buffer_count else 2
    est = 3 * 2 * _padded_block_bytes((1, R, M))                       # k/v/q strips
    est += wbufs * (_padded_block_bytes((3, M, M)) + _padded_block_bytes((3, M))
                    + _padded_block_bytes((M, M)) + 3 * _padded_block_bytes((1, M)))
    est += 2 * _padded_block_bytes((1, R, M))                          # output
    if return_attention:
        est += 2 * _padded_block_bytes((1, 1, S, S), att_dtype)
    est += 3 * _padded_block_bytes((S, D)) + _padded_block_bytes((R, M))  # scratch
    vmem_limit = int(min(128 * 1024 * 1024,
                         max(32 * 1024 * 1024, 2 * est + (4 << 20))))

    def _call(wbc):
        if wbc is None:
            def const_spec(shape):
                return pl.BlockSpec(shape, lambda *_: (0,) * len(shape))
        else:
            def const_spec(shape, _pm=pl.Buffered(wbc)):
                # Constant index_map -> never re-fetched; single-buffer it.
                return pl.BlockSpec(shape, lambda *_: (0,) * len(shape),
                                    pipeline_mode=_pm)

        return pl.pallas_call(
            kernel,
            out_shape=tuple(out_shape),
            grid=(B, H),
            in_specs=[
                data_spec,                    # key strip
                data_spec,                    # value strip
                data_spec,                    # query strip (+ residual)
                const_spec((3, M, M)),        # stacked Wk/Wv/Wq
                const_spec((3, M)),           # stacked bk/bv/bq
                const_spec((M, M)),           # Wf
                const_spec((1, M)),           # bf
                const_spec((1, M)),           # LayerNorm gamma
                const_spec((1, M)),           # LayerNorm beta
            ],
            out_specs=tuple(out_specs),
            scratch_shapes=scratch_shapes,
            compiler_params=pltpu.CompilerParams(
                dimension_semantics=("parallel", "parallel"),
                vmem_limit_bytes=vmem_limit,
            ),
        )(key, value, query, w_qkv, b_qkv, params["wf"],
          params["bf"].reshape(1, M), params["ln_gamma"].reshape(1, M),
          params["ln_beta"].reshape(1, M))

    try:
        outs = _call(weight_buffer_count)
    except Exception:
        # This JAX build rejected pipeline_mode=pl.Buffered(...) on pallas_call
        # BlockSpecs; fall back to default double buffering of the weights.
        outs = _call(None)

    out = outs[0]
    if not return_attention:
        return out, None

    att_perm = outs[1]
    # Un-permute the attention written in row-grouped block order:
    # permuted index c*R + a  <->  original view index a*H + c on rows and cols.
    # This is off the perf path (return_attention=False skips it entirely).
    att = (att_perm
           .reshape(B, H, H, R, H, R)
           .transpose(0, 1, 3, 2, 5, 4)
           .reshape(B * H, S, S))
    return out, att


# ----------------------------------------------------------------------------
# Pure-JAX reference (exact PyTorch forward semantics, for correctness check)
# ----------------------------------------------------------------------------
def reference_forward(key, value, query, params, num_heads):
    B, S, M = query.shape
    dph = M // num_heads
    residual = query
    k = key @ params["wk"] + params["bk"]
    v = value @ params["wv"] + params["bv"]
    q = query @ params["wq"] + params["bq"]
    k = k.reshape(B * num_heads, -1, dph)
    v = v.reshape(B * num_heads, -1, dph)
    q = q.reshape(B * num_heads, -1, dph)
    scale = (k.shape[-1] // num_heads) ** (-0.5)
    att = jnp.einsum("bqd,bkd->bqk", q, k) * scale
    att = jax.nn.softmax(att, axis=2)
    ctx = jnp.einsum("bqk,bkd->bqd", att, v)
    ctx = ctx.reshape(B, -1, dph * num_heads)
    out = ctx @ params["wf"] + params["bf"]
    z = residual + out
    mean = jnp.mean(z, axis=-1, keepdims=True)
    var = jnp.mean((z - mean) ** 2, axis=-1, keepdims=True)
    zn = (z - mean) / jnp.sqrt(var + 1e-5)
    out = zn * params["ln_gamma"] + params["ln_beta"]
    return out, att


# ----------------------------------------------------------------------------
# Main
# ----------------------------------------------------------------------------
if __name__ == "__main__":
    # batch, seq, model_dim, num_heads.  dim_per_head = 128 and R = S/H = 8, so
    # every in-kernel block copy / store is (8,128)-tile aligned (unmasked vst).
    B, S, M, H = 2, 16, 256, 2

    root = jax.random.PRNGKey(0)
    keys = jax.random.split(root, 12)
    init = lambda k, shape, s: (s * jax.random.normal(k, shape)).astype(jnp.float32)

    # nn.Linear weights stored transposed (in_dim, out_dim) so forward is x @ W + b.
    params = {
        "wk": init(keys[0], (M, M), 1.0 / np.sqrt(M)),
        "bk": init(keys[1], (M,), 0.02),
        "wv": init(keys[2], (M, M), 1.0 / np.sqrt(M)),
        "bv": init(keys[3], (M,), 0.02),
        "wq": init(keys[4], (M, M), 1.0 / np.sqrt(M)),
        "bq": init(keys[5], (M,), 0.02),
        "wf": init(keys[6], (M, M), 1.0 / np.sqrt(M)),
        "bf": init(keys[7], (M,), 0.02),
        "ln_gamma": jnp.ones((M,), jnp.float32),
        "ln_beta": jnp.zeros((M,), jnp.float32),
    }

    key_in = init(keys[8], (B, S, M), 1.0)
    value_in = init(keys[9], (B, S, M), 1.0)
    query_in = init(keys[10], (B, S, M), 1.0)

    ref_out, ref_att = reference_forward(key_in, value_in, query_in, params, H)

    # 1) Exact-math configuration: f32 MXU operands, exact softmax reciprocal,
    #    attention returned -- verifies the full module semantics tightly.
    out, att = multi_head_attention(key_in, value_in, query_in, params, H,
                                    return_attention=True,
                                    mxu_dtype=jnp.float32,
                                    approx_reciprocal=False)
    out = jax.block_until_ready(out)
    att = jax.block_until_ready(att)
    np.testing.assert_allclose(np.asarray(out), np.asarray(ref_out),
                               rtol=2e-4, atol=2e-4)
    np.testing.assert_allclose(np.asarray(att), np.asarray(ref_att),
                               rtol=2e-4, atol=2e-4)

    # 2) Performance configuration (defaults): bf16 MXU operands with f32
    #    accumulation, EUP approx reciprocal, no attention output.
    out_fast, att_none = multi_head_attention(key_in, value_in, query_in, params, H)
    out_fast = jax.block_until_ready(out_fast)
    assert att_none is None
    np.testing.assert_allclose(np.asarray(out_fast), np.asarray(ref_out),
                               rtol=6e-2, atol=6e-2)

    print("KERNEL_OK")
</pallas_src>

<mosaic_0001>
module attributes {stable_mosaic.version = 11 : i64} {
  func.func @_fused_mha_kernel(%arg0: i32, %arg1: i32, %arg2: memref<1x8x256xf32, #tpu.memory_space<vmem>>, %arg3: memref<1x8x256xf32, #tpu.memory_space<vmem>>, %arg4: memref<1x8x256xf32, #tpu.memory_space<vmem>>, %arg5: memref<3x256x256xf32, #tpu.memory_space<vmem>>, %arg6: memref<3x256xf32, #tpu.memory_space<vmem>>, %arg7: memref<256x256xf32, #tpu.memory_space<vmem>>, %arg8: memref<1x256xf32, #tpu.memory_space<vmem>>, %arg9: memref<1x256xf32, #tpu.memory_space<vmem>>, %arg10: memref<1x256xf32, #tpu.memory_space<vmem>>, %arg11: memref<1x8x256xf32, #tpu.memory_space<vmem>>, %arg12: memref<1x1x16x16xf32, #tpu.memory_space<vmem>>, %arg13: memref<16x128xf32, #tpu.memory_space<vmem>>, %arg14: memref<16x128xf32, #tpu.memory_space<vmem>>, %arg15: memref<16x128xf32, #tpu.memory_space<vmem>>, %arg16: memref<8x256xf32, #tpu.memory_space<vmem>>) attributes {dimension_semantics = [#tpu.dimension_semantics<parallel>, #tpu.dimension_semantics<parallel>], iteration_bounds = array<i64: 2, 2>, scalar_prefetch = 0 : i64, scratch_operands = 4 : i64, tpu.core_type = #tpu.core_type<tc>, window_params = [{transform_indices = @transform_0, window_bounds = array<i64: 1, 8, 256>}, {transform_indices = @transform_1, window_bounds = array<i64: 1, 8, 256>}, {transform_indices = @transform_2, window_bounds = array<i64: 1, 8, 256>}, {pipeline_mode = #tpu.pipeline_mode<synchronous>, transform_indices = @transform_3, window_bounds = array<i64: 3, 256, 256>}, {pipeline_mode = #tpu.pipeline_mode<synchronous>, transform_indices = @transform_4, window_bounds = array<i64: 3, 256>}, {pipeline_mode = #tpu.pipeline_mode<synchronous>, transform_indices = @transform_5, window_bounds = array<i64: 256, 256>}, {pipeline_mode = #tpu.pipeline_mode<synchronous>, transform_indices = @transform_6, window_bounds = array<i64: 1, 256>}, {pipeline_mode = #tpu.pipeline_mode<synchronous>, transform_indices = @transform_7, window_bounds = array<i64: 1, 256>}, {pipeline_mode = #tpu.pipeline_mode<synchronous>, transform_indices = @transform_8, window_bounds = array<i64: 1, 256>}, {transform_indices = @transform_9, window_bounds = array<i64: 1, 8, 256>}, {transform_indices = @transform_10, window_bounds = array<i64: 1, 1, 16, 16>}]} {
    %c0 = arith.constant 0 : index
    %c0_0 = arith.constant 0 : index
    %c0_1 = arith.constant 0 : index
    %0 = vector.load %arg2[%c0, %c0_0, %c0_1] : memref<1x8x256xf32, #tpu.memory_space<vmem>>, vector<1x8x256xf32>
    %1 = vector.shape_cast %0 : vector<1x8x256xf32> to vector<8x256xf32>
    %c0_2 = arith.constant 0 : index
    %c0_3 = arith.constant 0 : index
    %c0_4 = arith.constant 0 : index
    %2 = vector.load %arg3[%c0_2, %c0_3, %c0_4] : memref<1x8x256xf32, #tpu.memory_space<vmem>>, vector<1x8x256xf32>
    %3 = vector.shape_cast %2 : vector<1x8x256xf32> to vector<8x256xf32>
    %c0_5 = arith.constant 0 : index
    %c0_6 = arith.constant 0 : index
    %c0_7 = arith.constant 0 : index
    %4 = vector.load %arg4[%c0_5, %c0_6, %c0_7] : memref<1x8x256xf32, #tpu.memory_space<vmem>>, vector<1x8x256xf32>
    %5 = vector.shape_cast %4 : vector<1x8x256xf32> to vector<8x256xf32>
    %c0_8 = arith.constant 0 : index
    %c0_9 = arith.constant 0 : index
    %c0_10 = arith.constant 0 : index
    %6 = vector.load %arg5[%c0_8, %c0_9, %c0_10] : memref<3x256x256xf32, #tpu.memory_space<vmem>>, vector<1x256x256xf32>
    %7 = vector.shape_cast %6 : vector<1x256x256xf32> to vector<256x256xf32>
    %c0_11 = arith.constant 0 : index
    %c0_12 = arith.constant 0 : index
    %8 = vector.load %arg6[%c0_11, %c0_12] : memref<3x256xf32, #tpu.memory_space<vmem>>, vector<1x256xf32>
    %cst = arith.constant dense<0.000000e+00> : vector<8x256xf32>
    %9 = tpu.matmul %1, %7, %cst {dimension_numbers = #tpu.dot_dimension_numbers<[1], [0], [0], [1], [0, 0, 1, 1], [], []>} : vector<8x256xf32>, vector<256x256xf32>, vector<8x256xf32> -> vector<8x256xf32>
    %10 = vector.broadcast %8 : vector<1x256xf32> to vector<8x256xf32>
    %11 = arith.addf %9, %10 : vector<8x256xf32>
    %c1 = arith.constant 1 : index
    %c0_13 = arith.constant 0 : index
    %c0_14 = arith.constant 0 : index
    %12 = vector.load %arg5[%c1, %c0_13, %c0_14] : memref<3x256x256xf32, #tpu.memory_space<vmem>>, vector<1x256x256xf32>
    %13 = vector.shape_cast %12 : vector<1x256x256xf32> to vector<256x256xf32>
    %c1_15 = arith.constant 1 : index
    %c0_16 = arith.constant 0 : index
    %14 = vector.load %arg6[%c1_15, %c0_16] : memref<3x256xf32, #tpu.memory_space<vmem>>, vector<1x256xf32>
    %cst_17 = arith.constant dense<0.000000e+00> : vector<8x256xf32>
    %15 = tpu.matmul %3, %13, %cst_17 {dimension_numbers = #tpu.dot_dimension_numbers<[1], [0], [0], [1], [0, 0, 1, 1], [], []>} : vector<8x256xf32>, vector<256x256xf32>, vector<8x256xf32> -> vector<8x256xf32>
    %16 = vector.broadcast %14 : vector<1x256xf32> to vector<8x256xf32>
    %17 = arith.addf %15, %16 : vector<8x256xf32>
    %c2 = arith.constant 2 : index
    %c0_18 = arith.constant 0 : index
    %c0_19 = arith.constant 0 : index
    %18 = vector.load %arg5[%c2, %c0_18, %c0_19] : memref<3x256x256xf32, #tpu.memory_space<vmem>>, vector<1x256x256xf32>
    %19 = vector.shape_cast %18 : vector<1x256x256xf32> to vector<256x256xf32>
    %c2_20 = arith.constant 2 : index
    %c0_21 = arith.constant 0 : index
    %20 = vector.load %arg6[%c2_20, %c0_21] : memref<3x256xf32, #tpu.memory_space<vmem>>, vector<1x256xf32>
    %cst_22 = arith.constant dense<0.000000e+00> : vector<8x256xf32>
    %21 = tpu.matmul %5, %19, %cst_22 {dimension_numbers = #tpu.dot_dimension_numbers<[1], [0], [0], [1], [0, 0, 1, 1], [], []>} : vector<8x256xf32>, vector<256x256xf32>, vector<8x256xf32> -> vector<8x256xf32>
    %22 = vector.broadcast %20 : vector<1x256xf32> to vector<8x256xf32>
    %23 = arith.addf %21, %22 : vector<8x256xf32>
    %cst_23 = arith.constant 1.250000e-01 : f32
    %24 = vector.broadcast %cst_23 : f32 to vector<8x256xf32>
    %25 = arith.mulf %23, %24 : vector<8x256xf32>
    %26 = vector.extract_strided_slice %25 {offsets = [0, 0], sizes = [8, 128], strides = [1, 1]} : vector<8x256xf32> to vector<8x128xf32>
    %c0_24 = arith.constant 0 : index
    %c0_25 = arith.constant 0 : index
    %27 = vector.load %arg13[%c0_24, %c0_25] : memref<16x128xf32, #tpu.memory_space<vmem>>, vector<8x128xf32>
    tpu.vector_store %arg13[%c0_24, %c0_25], %26 {strides = array<i32>} : memref<16x128xf32, #tpu.memory_space<vmem>>, vector<8x128xf32>,
    %28 = vector.extract_strided_slice %11 {offsets = [0, 0], sizes = [8, 128], strides = [1, 1]} : vector<8x256xf32> to vector<8x128xf32>
    %c0_26 = arith.constant 0 : index
    %c0_27 = arith.constant 0 : index
    %29 = vector.load %arg14[%c0_26, %c0_27] : memref<16x128xf32, #tpu.memory_space<vmem>>, vector<8x128xf32>
    tpu.vector_store %arg14[%c0_26, %c0_27], %28 {strides = array<i32>} : memref<16x128xf32, #tpu.memory_space<vmem>>, vector<8x128xf32>,
    %30 = vector.extract_strided_slice %17 {offsets = [0, 0], sizes = [8, 128], strides = [1, 1]} : vector<8x256xf32> to vector<8x128xf32>
    %c0_28 = arith.constant 0 : index
    %c0_29 = arith.constant 0 : index
    %31 = vector.load %arg15[%c0_28, %c0_29] : memref<16x128xf32, #tpu.memory_space<vmem>>, vector<8x128xf32>
    tpu.vector_store %arg15[%c0_28, %c0_29], %30 {strides = array<i32>} : memref<16x128xf32, #tpu.memory_space<vmem>>, vector<8x128xf32>,
    %32 = vector.extract_strided_slice %25 {offsets = [0, 128], sizes = [8, 128], strides = [1, 1]} : vector<8x256xf32> to vector<8x128xf32>
    %c8 = arith.constant 8 : index
    %c0_30 = arith.constant 0 : index
    %33 = vector.load %arg13[%c8, %c0_30] : memref<16x128xf32, #tpu.memory_space<vmem>>, vector<8x128xf32>
    tpu.vector_store %arg13[%c8, %c0_30], %32 {strides = array<i32>} : memref<16x128xf32, #tpu.memory_space<vmem>>, vector<8x128xf32>,
    %34 = vector.extract_strided_slice %11 {offsets = [0, 128], sizes = [8, 128], strides = [1, 1]} : vector<8x256xf32> to vector<8x128xf32>
    %c8_31 = arith.constant 8 : index
    %c0_32 = arith.constant 0 : index
    %35 = vector.load %arg14[%c8_31, %c0_32] : memref<16x128xf32, #tpu.memory_space<vmem>>, vector<8x128xf32>
    tpu.vector_store %arg14[%c8_31, %c0_32], %34 {strides = array<i32>} : memref<16x128xf32, #tpu.memory_space<vmem>>, vector<8x128xf32>,
    %36 = vector.extract_strided_slice %17 {offsets = [0, 128], sizes = [8, 128], strides = [1, 1]} : vector<8x256xf32> to vector<8x128xf32>
    %c8_33 = arith.constant 8 : index
    %c0_34 = arith.constant 0 : index
    %37 = vector.load %arg15[%c8_33, %c0_34] : memref<16x128xf32, #tpu.memory_space<vmem>>, vector<8x128xf32>
    tpu.vector_store %arg15[%c8_33, %c0_34], %36 {strides = array<i32>} : memref<16x128xf32, #tpu.memory_space<vmem>>, vector<8x128xf32>,
    %c0_35 = arith.constant 0 : index
    %c0_36 = arith.constant 0 : index
    %38 = vector.load %arg13[%c0_35, %c0_36] : memref<16x128xf32, #tpu.memory_space<vmem>>, vector<16x128xf32>
    %c0_37 = arith.constant 0 : index
    %c0_38 = arith.constant 0 : index
    %39 = vector.load %arg14[%c0_37, %c0_38] : memref<16x128xf32, #tpu.memory_space<vmem>>, vector<16x128xf32>
    %c0_39 = arith.constant 0 : index
    %c0_40 = arith.constant 0 : index
    %40 = vector.load %arg15[%c0_39, %c0_40] : memref<16x128xf32, #tpu.memory_space<vmem>>, vector<16x128xf32>
    %cst_41 = arith.constant dense<0.000000e+00> : vector<16x16xf32>
    %41 = tpu.matmul %38, %39, %cst_41 {dimension_numbers = #tpu.dot_dimension_numbers<[1], [1], [0], [0], [0, 0, 1, 0], [], []>} : vector<16x128xf32>, vector<16x128xf32>, vector<16x16xf32> -> vector<16x16xf32>
    %cst_42 = arith.constant dense<0xFF800000> : vector<16xf32>
    %42 = vector.multi_reduction <maximumf>, %41, %cst_42 [1] : vector<16x16xf32> to vector<16xf32>
    %43 = vector.shape_cast %42 : vector<16xf32> to vector<16x1xf32>
    %44 = vector.broadcast %43 : vector<16x1xf32> to vector<16x16xf32>
    %45 = arith.subf %41, %44 : vector<16x16xf32>
    %46 = math.exp %45 : vector<16x16xf32>
    %cst_43 = arith.constant dense<0.000000e+00> : vector<16xf32>
    %47 = vector.multi_reduction <add>, %46, %cst_43 [1] : vector<16x16xf32> to vector<16xf32>
    %48 = vector.shape_cast %47 : vector<16xf32> to vector<16x1xf32>
    %49 = tpu.reciprocal %48 : vector<16x1xf32> -> vector<16x1xf32>
    %50 = vector.broadcast %49 : vector<16x1xf32> to vector<16x16xf32>
    %51 = arith.mulf %46, %50 : vector<16x16xf32>
    %c0_44 = arith.constant 0 : index
    %c0_45 = arith.constant 0 : index
    %c0_46 = arith.constant 0 : index
    %c0_47 = arith.constant 0 : index
    %52 = vector.load %arg12[%c0_44, %c0_45, %c0_46, %c0_47] : memref<1x1x16x16xf32, #tpu.memory_space<vmem>>, vector<1x1x16x16xf32>
    %53 = vector.shape_cast %52 : vector<1x1x16x16xf32> to vector<16x16xf32>
    %54 = vector.shape_cast %51 : vector<16x16xf32> to vector<1x1x16x16xf32>
    tpu.vector_store %arg12[%c0_44, %c0_45, %c0_46, %c0_47], %54 {strides = array<i32>} : memref<1x1x16x16xf32, #tpu.memory_space<vmem>>, vector<1x1x16x16xf32>,
    %cst_48 = arith.constant dense<0.000000e+00> : vector<16x128xf32>
    %55 = tpu.matmul %51, %40, %cst_48 {dimension_numbers = #tpu.dot_dimension_numbers<[1], [0], [0], [1], [0, 0, 1, 1], [], []>} : vector<16x16xf32>, vector<16x128xf32>, vector<16x128xf32> -> vector<16x128xf32>
    %56 = vector.extract_strided_slice %55 {offsets = [0, 0], sizes = [8, 128], strides = [1, 1]} : vector<16x128xf32> to vector<8x128xf32>
    %c0_49 = arith.constant 0 : index
    %c0_50 = arith.constant 0 : index
    %57 = vector.load %arg16[%c0_49, %c0_50] : memref<8x256xf32, #tpu.memory_space<vmem>>, vector<8x128xf32>
    tpu.vector_store %arg16[%c0_49, %c0_50], %56 {strides = array<i32>} : memref<8x256xf32, #tpu.memory_space<vmem>>, vector<8x128xf32>,
    %58 = vector.extract_strided_slice %55 {offsets = [8, 0], sizes = [8, 128], strides = [1, 1]} : vector<16x128xf32> to vector<8x128xf32>
    %c0_51 = arith.constant 0 : index
    %c128 = arith.constant 128 : index
    %59 = vector.load %arg16[%c0_51, %c128] : memref<8x256xf32, #tpu.memory_space<vmem>>, vector<8x128xf32>
    tpu.vector_store %arg16[%c0_51, %c128], %58 {strides = array<i32>} : memref<8x256xf32, #tpu.memory_space<vmem>>, vector<8x128xf32>,
    %c0_52 = arith.constant 0 : index
    %c0_53 = arith.constant 0 : index
    %60 = vector.load %arg16[%c0_52, %c0_53] : memref<8x256xf32, #tpu.memory_space<vmem>>, vector<8x256xf32>
    %c0_54 = arith.constant 0 : index
    %c0_55 = arith.constant 0 : index
    %61 = vector.load %arg7[%c0_54, %c0_55] : memref<256x256xf32, #tpu.memory_space<vmem>>, vector<256x256xf32>
    %cst_56 = arith.constant dense<0.000000e+00> : vector<8x256xf32>
    %62 = tpu.matmul %60, %61, %cst_56 {dimension_numbers = #tpu.dot_dimension_numbers<[1], [0], [0], [1], [0, 0, 1, 1], [], []>} : vector<8x256xf32>, vector<256x256xf32>, vector<8x256xf32> -> vector<8x256xf32>
    %c0_57 = arith.constant 0 : index
    %c0_58 = arith.constant 0 : index
    %63 = vector.load %arg8[%c0_57, %c0_58] : memref<1x256xf32, #tpu.memory_space<vmem>>, vector<1x256xf32>
    %64 = vector.broadcast %63 : vector<1x256xf32> to vector<8x256xf32>
    %65 = arith.addf %62, %64 : vector<8x256xf32>
    %66 = arith.addf %5, %65 : vector<8x256xf32>
    %cst_59 = arith.constant dense<0.000000e+00> : vector<8xf32>
    %67 = vector.multi_reduction <add>, %66, %cst_59 [1] : vector<8x256xf32> to vector<8xf32>
    %68 = vector.shape_cast %67 : vector<8xf32> to vector<8x1xf32>
    %cst_60 = arith.constant 2.560000e+02 : f32
    %69 = vector.broadcast %cst_60 : f32 to vector<8x1xf32>
    %70 = arith.divf %68, %69 : vector<8x1xf32>
    %71 = vector.broadcast %70 : vector<8x1xf32> to vector<8x256xf32>
    %72 = arith.subf %66, %71 : vector<8x256xf32>
    %73 = vector.broadcast %70 : vector<8x1xf32> to vector<8x256xf32>
    %74 = arith.subf %66, %73 : vector<8x256xf32>
    %75 = arith.mulf %72, %74 : vector<8x256xf32>
    %cst_61 = arith.constant dense<0.000000e+00> : vector<8xf32>
    %76 = vector.multi_reduction <add>, %75, %cst_61 [1] : vector<8x256xf32> to vector<8xf32>
    %77 = vector.shape_cast %76 : vector<8xf32> to vector<8x1xf32>
    %cst_62 = arith.constant 2.560000e+02 : f32
    %78 = vector.broadcast %cst_62 : f32 to vector<8x1xf32>
    %79 = arith.divf %77, %78 : vector<8x1xf32>
    %80 = vector.broadcast %70 : vector<8x1xf32> to vector<8x256xf32>
    %81 = arith.subf %66, %80 : vector<8x256xf32>
    %cst_63 = arith.constant 9.99999974E-6 : f32
    %82 = vector.broadcast %cst_63 : f32 to vector<8x1xf32>
    %83 = arith.addf %79, %82 : vector<8x1xf32>
    %84 = math.rsqrt %83 : vector<8x1xf32>
    %85 = vector.broadcast %84 : vector<8x1xf32> to vector<8x256xf32>
    %86 = arith.mulf %81, %85 : vector<8x256xf32>
    %c0_64 = arith.constant 0 : index
    %c0_65 = arith.constant 0 : index
    %87 = vector.load %arg9[%c0_64, %c0_65] : memref<1x256xf32, #tpu.memory_space<vmem>>, vector<1x256xf32>
    %88 = vector.broadcast %87 : vector<1x256xf32> to vector<8x256xf32>
    %89 = arith.mulf %86, %88 : vector<8x256xf32>
    %c0_66 = arith.constant 0 : index
    %c0_67 = arith.constant 0 : index
    %90 = vector.load %arg10[%c0_66, %c0_67] : memref<1x256xf32, #tpu.memory_space<vmem>>, vector<1x256xf32>
    %91 = vector.broadcast %90 : vector<1x256xf32> to vector<8x256xf32>
    %92 = arith.addf %89, %91 : vector<8x256xf32>
    %c0_68 = arith.constant 0 : index
    %c0_69 = arith.constant 0 : index
    %c0_70 = arith.constant 0 : index
    %93 = vector.load %arg11[%c0_68, %c0_69, %c0_70] : memref<1x8x256xf32, #tpu.memory_space<vmem>>, vector<1x8x256xf32>
    %94 = vector.shape_cast %93 : vector<1x8x256xf32> to vector<8x256xf32>
    %95 = vector.shape_cast %92 : vector<8x256xf32> to vector<1x8x256xf32>
    tpu.vector_store %arg11[%c0_68, %c0_69, %c0_70], %95 {strides = array<i32>} : memref<1x8x256xf32, #tpu.memory_space<vmem>>, vector<1x8x256xf32>,
    return
  }
  func.func @transform_0(%arg0: i32, %arg1: i32) -> (i32, i32, i32) {
    %c0_i32 = arith.constant 0 : i32
    %c0_i32_0 = arith.constant 0 : i32
    return %arg0, %arg1, %c0_i32 : i32, i32, i32
  }
  func.func @transform_1(%arg0: i32, %arg1: i32) -> (i32, i32, i32) {
    %c0_i32 = arith.constant 0 : i32
    %c0_i32_0 = arith.constant 0 : i32
    return %arg0, %arg1, %c0_i32 : i32, i32, i32
  }
  func.func @transform_2(%arg0: i32, %arg1: i32) -> (i32, i32, i32) {
    %c0_i32 = arith.constant 0 : i32
    %c0_i32_0 = arith.constant 0 : i32
    return %arg0, %arg1, %c0_i32 : i32, i32, i32
  }
  func.func @transform_3(%arg0: i32, %arg1: i32) -> (i32, i32, i32) {
    %c0_i32 = arith.constant 0 : i32
    %c0_i32_0 = arith.constant 0 : i32
    %c0_i32_1 = arith.constant 0 : i32
    %c0_i32_2 = arith.constant 0 : i32
    return %c0_i32, %c0_i32_0, %c0_i32_1 : i32, i32, i32
  }
  func.func @transform_4(%arg0: i32, %arg1: i32) -> (i32, i32) {
    %c0_i32 = arith.constant 0 : i32
    %c0_i32_0 = arith.constant 0 : i32
    %c0_i32_1 = arith.constant 0 : i32
    return %c0_i32, %c0_i32_0 : i32, i32
  }
  func.func @transform_5(%arg0: i32, %arg1: i32) -> (i32, i32) {
    %c0_i32 = arith.constant 0 : i32
    %c0_i32_0 = arith.constant 0 : i32
    %c0_i32_1 = arith.constant 0 : i32
    return %c0_i32, %c0_i32_0 : i32, i32
  }
  func.func @transform_6(%arg0: i32, %arg1: i32) -> (i32, i32) {
    %c0_i32 = arith.constant 0 : i32
    %c0_i32_0 = arith.constant 0 : i32
    %c0_i32_1 = arith.constant 0 : i32
    return %c0_i32, %c0_i32_0 : i32, i32
  }
  func.func @transform_7(%arg0: i32, %arg1: i32) -> (i32, i32) {
    %c0_i32 = arith.constant 0 : i32
    %c0_i32_0 = arith.constant 0 : i32
    %c0_i32_1 = arith.constant 0 : i32
    return %c0_i32, %c0_i32_0 : i32, i32
  }
  func.func @transform_8(%arg0: i32, %arg1: i32) -> (i32, i32) {
    %c0_i32 = arith.constant 0 : i32
    %c0_i32_0 = arith.constant 0 : i32
    %c0_i32_1 = arith.constant 0 : i32
    return %c0_i32, %c0_i32_0 : i32, i32
  }
  func.func @transform_9(%arg0: i32, %arg1: i32) -> (i32, i32, i32) {
    %c0_i32 = arith.constant 0 : i32
    %c0_i32_0 = arith.constant 0 : i32
    return %arg0, %arg1, %c0_i32 : i32, i32, i32
  }
  func.func @transform_10(%arg0: i32, %arg1: i32) -> (i32, i32, i32, i32) {
    %c0_i32 = arith.constant 0 : i32
    %c0_i32_0 = arith.constant 0 : i32
    %c0_i32_1 = arith.constant 0 : i32
    return %arg0, %arg1, %c0_i32, %c0_i32_0 : i32, i32, i32, i32
  }
}

module attributes {stable_mosaic.version = 11 : i64} {
  func.func @_fused_mha_kernel(%arg0: i32, %arg1: i32, %arg2: memref<1x8x256xf32, #tpu.memory_space<vmem>>, %arg3: memref<1x8x256xf32, #tpu.memory_space<vmem>>, %arg4: memref<1x8x256xf32, #tpu.memory_space<vmem>>, %arg5: memref<3x256x256xf32, #tpu.memory_space<vmem>>, %arg6: memref<3x256xf32, #tpu.memory_space<vmem>>, %arg7: memref<256x256xf32, #tpu.memory_space<vmem>>, %arg8: memref<1x256xf32, #tpu.memory_space<vmem>>, %arg9: memref<1x256xf32, #tpu.memory_space<vmem>>, %arg10: memref<1x256xf32, #tpu.memory_space<vmem>>, %arg11: memref<1x8x256xf32, #tpu.memory_space<vmem>>, %arg12: memref<1x1x16x16xf32, #tpu.memory_space<vmem>>, %arg13: memref<16x128xf32, #tpu.memory_space<vmem>>, %arg14: memref<16x128xf32, #tpu.memory_space<vmem>>, %arg15: memref<16x128xf32, #tpu.memory_space<vmem>>, %arg16: memref<8x256xf32, #tpu.memory_space<vmem>>) attributes {dimension_semantics = [#tpu.dimension_semantics<parallel>, #tpu.dimension_semantics<parallel>], iteration_bounds = array<i64: 2, 2>, scalar_prefetch = 0 : i64, scratch_operands = 4 : i64, tpu.core_type = #tpu.core_type<tc>, window_params = [{transform_indices = @transform_0, window_bounds = array<i64: 1, 8, 256>}, {transform_indices = @transform_1, window_bounds = array<i64: 1, 8, 256>}, {transform_indices = @transform_2, window_bounds = array<i64: 1, 8, 256>}, {pipeline_mode = #tpu.pipeline_mode<synchronous>, transform_indices = @transform_3, window_bounds = array<i64: 3, 256, 256>}, {pipeline_mode = #tpu.pipeline_mode<synchronous>, transform_indices = @transform_4, window_bounds = array<i64: 3, 256>}, {pipeline_mode = #tpu.pipeline_mode<synchronous>, transform_indices = @transform_5, window_bounds = array<i64: 256, 256>}, {pipeline_mode = #tpu.pipeline_mode<synchronous>, transform_indices = @transform_6, window_bounds = array<i64: 1, 256>}, {pipeline_mode = #tpu.pipeline_mode<synchronous>, transform_indices = @transform_7, window_bounds = array<i64: 1, 256>}, {pipeline_mode = #tpu.pipeline_mode<synchronous>, transform_indices = @transform_8, window_bounds = array<i64: 1, 256>}, {transform_indices = @transform_9, window_bounds = array<i64: 1, 8, 256>}, {transform_indices = @transform_10, window_bounds = array<i64: 1, 1, 16, 16>}]} {
    %c0 = arith.constant 0 : index
    %c0_0 = arith.constant 0 : index
    %c0_1 = arith.constant 0 : index
    %0 = vector.load %arg2[%c0, %c0_0, %c0_1] : memref<1x8x256xf32, #tpu.memory_space<vmem>>, vector<1x8x256xf32>
    %1 = vector.shape_cast %0 : vector<1x8x256xf32> to vector<8x256xf32>
    %c0_2 = arith.constant 0 : index
    %c0_3 = arith.constant 0 : index
    %c0_4 = arith.constant 0 : index
    %2 = vector.load %arg3[%c0_2, %c0_3, %c0_4] : memref<1x8x256xf32, #tpu.memory_space<vmem>>, vector<1x8x256xf32>
    %3 = vector.shape_cast %2 : vector<1x8x256xf32> to vector<8x256xf32>
    %c0_5 = arith.constant 0 : index
    %c0_6 = arith.constant 0 : index
    %c0_7 = arith.constant 0 : index
    %4 = vector.load %arg4[%c0_5, %c0_6, %c0_7] : memref<1x8x256xf32, #tpu.memory_space<vmem>>, vector<1x8x256xf32>
    %5 = vector.shape_cast %4 : vector<1x8x256xf32> to vector<8x256xf32>
    %c0_8 = arith.constant 0 : index
    %c0_9 = arith.constant 0 : index
    %c0_10 = arith.constant 0 : index
    %6 = vector.load %arg5[%c0_8, %c0_9, %c0_10] : memref<3x256x256xf32, #tpu.memory_space<vmem>>, vector<1x256x256xf32>
    %7 = vector.shape_cast %6 : vector<1x256x256xf32> to vector<256x256xf32>
    %c0_11 = arith.constant 0 : index
    %c0_12 = arith.constant 0 : index
    %8 = vector.load %arg6[%c0_11, %c0_12] : memref<3x256xf32, #tpu.memory_space<vmem>>, vector<1x256xf32>
    %cst = arith.constant dense<0.000000e+00> : vector<8x256xf32>
    %9 = tpu.matmul %1, %7, %cst {dimension_numbers = #tpu.dot_dimension_numbers<[1], [0], [0], [1], [0, 0, 1, 1], [], []>} : vector<8x256xf32>, vector<256x256xf32>, vector<8x256xf32> -> vector<8x256xf32>
    %10 = vector.broadcast %8 : vector<1x256xf32> to vector<8x256xf32>
    %11 = arith.addf %9, %10 : vector<8x256xf32>
    %c1 = arith.constant 1 : index
    %c0_13 = arith.constant 0 : index
    %c0_14 = arith.constant 0 : index
    %12 = vector.load %arg5[%c1, %c0_13, %c0_14] : memref<3x256x256xf32, #tpu.memory_space<vmem>>, vector<1x256x256xf32>
    %13 = vector.shape_cast %12 : vector<1x256x256xf32> to vector<256x256xf32>
    %c1_15 = arith.constant 1 : index
    %c0_16 = arith.constant 0 : index
    %14 = vector.load %arg6[%c1_15, %c0_16] : memref<3x256xf32, #tpu.memory_space<vmem>>, vector<1x256xf32>
    %cst_17 = arith.constant dense<0.000000e+00> : vector<8x256xf32>
    %15 = tpu.matmul %3, %13, %cst_17 {dimension_numbers = #tpu.dot_dimension_numbers<[1], [0], [0], [1], [0, 0, 1, 1], [], []>} : vector<8x256xf32>, vector<256x256xf32>, vector<8x256xf32> -> vector<8x256xf32>
    %16 = vector.broadcast %14 : vector<1x256xf32> to vector<8x256xf32>
    %17 = arith.addf %15, %16 : vector<8x256xf32>
    %c2 = arith.constant 2 : index
    %c0_18 = arith.constant 0 : index
    %c0_19 = arith.constant 0 : index
    %18 = vector.load %arg5[%c2, %c0_18, %c0_19] : memref<3x256x256xf32, #tpu.memory_space<vmem>>, vector<1x256x256xf32>
    %19 = vector.shape_cast %18 : vector<1x256x256xf32> to vector<256x256xf32>
    %c2_20 = arith.constant 2 : index
    %c0_21 = arith.constant 0 : index
    %20 = vector.load %arg6[%c2_20, %c0_21] : memref<3x256xf32, #tpu.memory_space<vmem>>, vector<1x256xf32>
    %cst_22 = arith.constant dense<0.000000e+00> : vector<8x256xf32>
    %21 = tpu.matmul %5, %19, %cst_22 {dimension_numbers = #tpu.dot_dimension_numbers<[1], [0], [0], [1], [0, 0, 1, 1], [], []>} : vector<8x256xf32>, vector<256x256xf32>, vector<8x256xf32> -> vector<8x256xf32>
    %22 = vector.broadcast %20 : vector<1x256xf32> to vector<8x256xf32>
    %23 = arith.addf %21, %22 : vector<8x256xf32>
    %cst_23 = arith.constant 1.250000e-01 : f32
    %24 = vector.broadcast %cst_23 : f32 to vector<8x256xf32>
    %25 = arith.mulf %23, %24 : vector<8x256xf32>
    %26 = vector.extract_strided_slice %25 {offsets = [0, 0], sizes = [8, 128], strides = [1, 1]} : vector<8x256xf32> to vector<8x128xf32>
    %c0_24 = arith.constant 0 : index
    %c0_25 = arith.constant 0 : index
    %27 = vector.load %arg13[%c0_24, %c0_25] : memref<16x128xf32, #tpu.memory_space<vmem>>, vector<8x128xf32>
    tpu.vector_store %arg13[%c0_24, %c0_25], %26 {strides = array<i32>} : memref<16x128xf32, #tpu.memory_space<vmem>>, vector<8x128xf32>,
    %28 = vector.extract_strided_slice %11 {offsets = [0, 0], sizes = [8, 128], strides = [1, 1]} : vector<8x256xf32> to vector<8x128xf32>
    %c0_26 = arith.constant 0 : index
    %c0_27 = arith.constant 0 : index
    %29 = vector.load %arg14[%c0_26, %c0_27] : memref<16x128xf32, #tpu.memory_space<vmem>>, vector<8x128xf32>
    tpu.vector_store %arg14[%c0_26, %c0_27], %28 {strides = array<i32>} : memref<16x128xf32, #tpu.memory_space<vmem>>, vector<8x128xf32>,
    %30 = vector.extract_strided_slice %17 {offsets = [0, 0], sizes = [8, 128], strides = [1, 1]} : vector<8x256xf32> to vector<8x128xf32>
    %c0_28 = arith.constant 0 : index
    %c0_29 = arith.constant 0 : index
    %31 = vector.load %arg15[%c0_28, %c0_29] : memref<16x128xf32, #tpu.memory_space<vmem>>, vector<8x128xf32>
    tpu.vector_store %arg15[%c0_28, %c0_29], %30 {strides = array<i32>} : memref<16x128xf32, #tpu.memory_space<vmem>>, vector<8x128xf32>,
    %32 = vector.extract_strided_slice %25 {offsets = [0, 128], sizes = [8, 128], strides = [1, 1]} : vector<8x256xf32> to vector<8x128xf32>
    %c8 = arith.constant 8 : index
    %c0_30 = arith.constant 0 : index
    %33 = vector.load %arg13[%c8, %c0_30] : memref<16x128xf32, #tpu.memory_space<vmem>>, vector<8x128xf32>
    tpu.vector_store %arg13[%c8, %c0_30], %32 {strides = array<i32>} : memref<16x128xf32, #tpu.memory_space<vmem>>, vector<8x128xf32>,
    %34 = vector.extract_strided_slice %11 {offsets = [0, 128], sizes = [8, 128], strides = [1, 1]} : vector<8x256xf32> to vector<8x128xf32>
    %c8_31 = arith.constant 8 : index
    %c0_32 = arith.constant 0 : index
    %35 = vector.load %arg14[%c8_31, %c0_32] : memref<16x128xf32, #tpu.memory_space<vmem>>, vector<8x128xf32>
    tpu.vector_store %arg14[%c8_31, %c0_32], %34 {strides = array<i32>} : memref<16x128xf32, #tpu.memory_space<vmem>>, vector<8x128xf32>,
    %36 = vector.extract_strided_slice %17 {offsets = [0, 128], sizes = [8, 128], strides = [1, 1]} : vector<8x256xf32> to vector<8x128xf32>
    %c8_33 = arith.constant 8 : index
    %c0_34 = arith.constant 0 : index
    %37 = vector.load %arg15[%c8_33, %c0_34] : memref<16x128xf32, #tpu.memory_space<vmem>>, vector<8x128xf32>
    tpu.vector_store %arg15[%c8_33, %c0_34], %36 {strides = array<i32>} : memref<16x128xf32, #tpu.memory_space<vmem>>, vector<8x128xf32>,
    %c0_35 = arith.constant 0 : index
    %c0_36 = arith.constant 0 : index
    %38 = vector.load %arg13[%c0_35, %c0_36] : memref<16x128xf32, #tpu.memory_space<vmem>>, vector<16x128xf32>
    %c0_37 = arith.constant 0 : index
    %c0_38 = arith.constant 0 : index
    %39 = vector.load %arg14[%c0_37, %c0_38] : memref<16x128xf32, #tpu.memory_space<vmem>>, vector<16x128xf32>
    %c0_39 = arith.constant 0 : index
    %c0_40 = arith.constant 0 : index
    %40 = vector.load %arg15[%c0_39, %c0_40] : memref<16x128xf32, #tpu.memory_space<vmem>>, vector<16x128xf32>
    %cst_41 = arith.constant dense<0.000000e+00> : vector<16x16xf32>
    %41 = tpu.matmul %38, %39, %cst_41 {dimension_numbers = #tpu.dot_dimension_numbers<[1], [1], [0], [0], [0, 0, 1, 0], [], []>} : vector<16x128xf32>, vector<16x128xf32>, vector<16x16xf32> -> vector<16x16xf32>
    %cst_42 = arith.constant dense<0xFF800000> : vector<16xf32>
    %42 = vector.multi_reduction <maximumf>, %41, %cst_42 [1] : vector<16x16xf32> to vector<16xf32>
    %43 = vector.shape_cast %42 : vector<16xf32> to vector<16x1xf32>
    %44 = vector.broadcast %43 : vector<16x1xf32> to vector<16x16xf32>
    %45 = arith.subf %41, %44 : vector<16x16xf32>
    %46 = math.exp %45 : vector<16x16xf32>
    %cst_43 = arith.constant dense<0.000000e+00> : vector<16xf32>
    %47 = vector.multi_reduction <add>, %46, %cst_43 [1] : vector<16x16xf32> to vector<16xf32>
    %48 = vector.shape_cast %47 : vector<16xf32> to vector<16x1xf32>
    %49 = tpu.reciprocal %48 : vector<16x1xf32> -> vector<16x1xf32>
    %50 = vector.broadcast %49 : vector<16x1xf32> to vector<16x16xf32>
    %51 = arith.mulf %46, %50 : vector<16x16xf32>
    %c0_44 = arith.constant 0 : index
    %c0_45 = arith.constant 0 : index
    %c0_46 = arith.constant 0 : index
    %c0_47 = arith.constant 0 : index
    %52 = vector.load %arg12[%c0_44, %c0_45, %c0_46, %c0_47] : memref<1x1x16x16xf32, #tpu.memory_space<vmem>>, vector<1x1x16x16xf32>
    %53 = vector.shape_cast %52 : vector<1x1x16x16xf32> to vector<16x16xf32>
    %54 = vector.shape_cast %51 : vector<16x16xf32> to vector<1x1x16x16xf32>
    tpu.vector_store %arg12[%c0_44, %c0_45, %c0_46, %c0_47], %54 {strides = array<i32>} : memref<1x1x16x16xf32, #tpu.memory_space<vmem>>, vector<1x1x16x16xf32>,
    %cst_48 = arith.constant dense<0.000000e+00> : vector<16x128xf32>
    %55 = tpu.matmul %51, %40, %cst_48 {dimension_numbers = #tpu.dot_dimension_numbers<[1], [0], [0], [1], [0, 0, 1, 1], [], []>} : vector<16x16xf32>, vector<16x128xf32>, vector<16x128xf32> -> vector<16x128xf32>
    %56 = vector.extract_strided_slice %55 {offsets = [0, 0], sizes = [8, 128], strides = [1, 1]} : vector<16x128xf32> to vector<8x128xf32>
    %c0_49 = arith.constant 0 : index
    %c0_50 = arith.constant 0 : index
    %57 = vector.load %arg16[%c0_49, %c0_50] : memref<8x256xf32, #tpu.memory_space<vmem>>, vector<8x128xf32>
    tpu.vector_store %arg16[%c0_49, %c0_50], %56 {strides = array<i32>} : memref<8x256xf32, #tpu.memory_space<vmem>>, vector<8x128xf32>,
    %58 = vector.extract_strided_slice %55 {offsets = [8, 0], sizes = [8, 128], strides = [1, 1]} : vector<16x128xf32> to vector<8x128xf32>
    %c0_51 = arith.constant 0 : index
    %c128 = arith.constant 128 : index
    %59 = vector.load %arg16[%c0_51, %c128] : memref<8x256xf32, #tpu.memory_space<vmem>>, vector<8x128xf32>
    tpu.vector_store %arg16[%c0_51, %c128], %58 {strides = array<i32>} : memref<8x256xf32, #tpu.memory_space<vmem>>, vector<8x128xf32>,
    %c0_52 = arith.constant 0 : index
    %c0_53 = arith.constant 0 : index
    %60 = vector.load %arg16[%c0_52, %c0_53] : memref<8x256xf32, #tpu.memory_space<vmem>>, vector<8x256xf32>
    %c0_54 = arith.constant 0 : index
    %c0_55 = arith.constant 0 : index
    %61 = vector.load %arg7[%c0_54, %c0_55] : memref<256x256xf32, #tpu.memory_space<vmem>>, vector<256x256xf32>
    %cst_56 = arith.constant dense<0.000000e+00> : vector<8x256xf32>
    %62 = tpu.matmul %60, %61, %cst_56 {dimension_numbers = #tpu.dot_dimension_numbers<[1], [0], [0], [1], [0, 0, 1, 1], [], []>} : vector<8x256xf32>, vector<256x256xf32>, vector<8x256xf32> -> vector<8x256xf32>
    %c0_57 = arith.constant 0 : index
    %c0_58 = arith.constant 0 : index
    %63 = vector.load %arg8[%c0_57, %c0_58] : memref<1x256xf32, #tpu.memory_space<vmem>>, vector<1x256xf32>
    %64 = vector.broadcast %63 : vector<1x256xf32> to vector<8x256xf32>
    %65 = arith.addf %62, %64 : vector<8x256xf32>
    %66 = arith.addf %5, %65 : vector<8x256xf32>
    %cst_59 = arith.constant dense<0.000000e+00> : vector<8xf32>
    %67 = vector.multi_reduction <add>, %66, %cst_59 [1] : vector<8x256xf32> to vector<8xf32>
    %68 = vector.shape_cast %67 : vector<8xf32> to vector<8x1xf32>
    %cst_60 = arith.constant 2.560000e+02 : f32
    %69 = vector.broadcast %cst_60 : f32 to vector<8x1xf32>
    %70 = arith.divf %68, %69 : vector<8x1xf32>
    %71 = vector.broadcast %70 : vector<8x1xf32> to vector<8x256xf32>
    %72 = arith.subf %66, %71 : vector<8x256xf32>
    %73 = vector.broadcast %70 : vector<8x1xf32> to vector<8x256xf32>
    %74 = arith.subf %66, %73 : vector<8x256xf32>
    %75 = arith.mulf %72, %74 : vector<8x256xf32>
    %cst_61 = arith.constant dense<0.000000e+00> : vector<8xf32>
    %76 = vector.multi_reduction <add>, %75, %cst_61 [1] : vector<8x256xf32> to vector<8xf32>
    %77 = vector.shape_cast %76 : vector<8xf32> to vector<8x1xf32>
    %cst_62 = arith.constant 2.560000e+02 : f32
    %78 = vector.broadcast %cst_62 : f32 to vector<8x1xf32>
    %79 = arith.divf %77, %78 : vector<8x1xf32>
    %80 = vector.broadcast %70 : vector<8x1xf32> to vector<8x256xf32>
    %81 = arith.subf %66, %80 : vector<8x256xf32>
    %cst_63 = arith.constant 9.99999974E-6 : f32
    %82 = vector.broadcast %cst_63 : f32 to vector<8x1xf32>
    %83 = arith.addf %79, %82 : vector<8x1xf32>
    %84 = math.rsqrt %83 : vector<8x1xf32>
    %85 = vector.broadcast %84 : vector<8x1xf32> to vector<8x256xf32>
    %86 = arith.mulf %81, %85 : vector<8x256xf32>
    %c0_64 = arith.constant 0 : index
    %c0_65 = arith.constant 0 : index
    %87 = vector.load %arg9[%c0_64, %c0_65] : memref<1x256xf32, #tpu.memory_space<vmem>>, vector<1x256xf32>
    %88 = vector.broadcast %87 : vector<1x256xf32> to vector<8x256xf32>
    %89 = arith.mulf %86, %88 : vector<8x256xf32>
    %c0_66 = arith.constant 0 : index
    %c0_67 = arith.constant 0 : index
    %90 = vector.load %arg10[%c0_66, %c0_67] : memref<1x256xf32, #tpu.memory_space<vmem>>, vector<1x256xf32>
    %91 = vector.broadcast %90 : vector<1x256xf32> to vector<8x256xf32>
    %92 = arith.addf %89, %91 : vector<8x256xf32>
    %c0_68 = arith.constant 0 : index
    %c0_69 = arith.constant 0 : index
    %c0_70 = arith.constant 0 : index
    %93 = vector.load %arg11[%c0_68, %c0_69, %c0_70] : memref<1x8x256xf32, #tpu.memory_space<vmem>>, vector<1x8x256xf32>
    %94 = vector.shape_cast %93 : vector<1x8x256xf32> to vector<8x256xf32>
    %95 = vector.shape_cast %92 : vector<8x256xf32> to vector<1x8x256xf32>
    tpu.vector_store %arg11[%c0_68, %c0_69, %c0_70], %95 {strides = array<i32>} : memref<1x8x256xf32, #tpu.memory_space<vmem>>, vector<1x8x256xf32>,
    return
  }
  func.func @transform_0(%arg0: i32, %arg1: i32) -> (i32, i32, i32) {
    %c0_i32 = arith.constant 0 : i32
    %c0_i32_0 = arith.constant 0 : i32
    return %arg0, %arg1, %c0_i32 : i32, i32, i32
  }
  func.func @transform_1(%arg0: i32, %arg1: i32) -> (i32, i32, i32) {
    %c0_i32 = arith.constant 0 : i32
    %c0_i32_0 = arith.constant 0 : i32
    return %arg0, %arg1, %c0_i32 : i32, i32, i32
  }
  func.func @transform_2(%arg0: i32, %arg1: i32) -> (i32, i32, i32) {
    %c0_i32 = arith.constant 0 : i32
    %c0_i32_0 = arith.constant 0 : i32
    return %arg0, %arg1, %c0_i32 : i32, i32, i32
  }
  func.func @transform_3(%arg0: i32, %arg1: i32) -> (i32, i32, i32) {
    %c0_i32 = arith.constant 0 : i32
    %c0_i32_0 = arith.constant 0 : i32
    %c0_i32_1 = arith.constant 0 : i32
    %c0_i32_2 = arith.constant 0 : i32
    return %c0_i32, %c0_i32_0, %c0_i32_1 : i32, i32, i32
  }
  func.func @transform_4(%arg0: i32, %arg1: i32) -> (i32, i32) {
    %c0_i32 = arith.constant 0 : i32
    %c0_i32_0 = arith.constant 0 : i32
    %c0_i32_1 = arith.constant 0 : i32
    return %c0_i32, %c0_i32_0 : i32, i32
  }
  func.func @transform_5(%arg0: i32, %arg1: i32) -> (i32, i32) {
    %c0_i32 = arith.constant 0 : i32
    %c0_i32_0 = arith.constant 0 : i32
    %c0_i32_1 = arith.constant 0 : i32
    return %c0_i32, %c0_i32_0 : i32, i32
  }
  func.func @transform_6(%arg0: i32, %arg1: i32) -> (i32, i32) {
    %c0_i32 = arith.constant 0 : i32
    %c0_i32_0 = arith.constant 0 : i32
    %c0_i32_1 = arith.constant 0 : i32
    return %c0_i32, %c0_i32_0 : i32, i32
  }
  func.func @transform_7(%arg0: i32, %arg1: i32) -> (i32, i32) {
    %c0_i32 = arith.constant 0 : i32
    %c0_i32_0 = arith.constant 0 : i32
    %c0_i32_1 = arith.constant 0 : i32
    return %c0_i32, %c0_i32_0 : i32, i32
  }
  func.func @transform_8(%arg0: i32, %arg1: i32) -> (i32, i32) {
    %c0_i32 = arith.constant 0 : i32
    %c0_i32_0 = arith.constant 0 : i32
    %c0_i32_1 = arith.constant 0 : i32
    return %c0_i32, %c0_i32_0 : i32, i32
  }
  func.func @transform_9(%arg0: i32, %arg1: i32) -> (i32, i32, i32) {
    %c0_i32 = arith.constant 0 : i32
    %c0_i32_0 = arith.constant 0 : i32
    return %arg0, %arg1, %c0_i32 : i32, i32, i32
  }
  func.func @transform_10(%arg0: i32, %arg1: i32) -> (i32, i32, i32, i32) {
    %c0_i32 = arith.constant 0 : i32
    %c0_i32_0 = arith.constant 0 : i32
    %c0_i32_1 = arith.constant 0 : i32
    return %arg0, %arg1, %c0_i32, %c0_i32_0 : i32, i32, i32, i32
  }
}

</mosaic_0001>

<bundles_post_ra>
// kernel: tpu_custom_call.1
= control target key start
LH: loop header
LB: loop body
LE: loop exit
PB: predicated region body
PF: predicated region fallthrough
CT: control target
= control target key end

     0   :  { %s2549_s0 = inlined_call_operand.hbm [shape: f32[2,16,256], index: 0, kind: input, shape index: {}]   ;;  %s2550_s1 = inlined_call_operand.hbm [shape: f32[2,16,256], index: 1, kind: input, shape index: {}]   ;;  %s2551_s2 = inlined_call_operand.hbm [shape: f32[2,16,256], index: 2, kind: input, shape index: {}]   ;;  %s2552_s3 = inlined_call_operand.hbm [shape: f32[3,256,256], index: 3, kind: input, shape index: {}]   ;;  %s2553_s4 = inlined_call_operand.hbm [shape: f32[3,256], index: 4, kind: input, shape index: {}]   ;;  %s2554_s5 = inlined_call_operand.hbm [shape: f32[256,256], index: 5, kind: input, shape index: {}]   ;;  %s2555_s6 = inlined_call_operand.vmem [shape: f32[1,256], index: 6, kind: input, shape index: {}]   ;;  %s2556_s7 = inlined_call_operand.vmem [shape: f32[1,256], index: 7, kind: input, shape index: {}]   ;;  %s2557_s8 = inlined_call_operand.vmem [shape: f32[1,256], index: 8, kind: input, shape index: {}]   ;;  %s2558_s9 = inlined_call_operand.hbm [shape: f32[2,16,256], index: 9, kind: output, shape index: {0}]   ;;  %s2559_s10 = inlined_call_operand.hbm [shape: f32[2,2,16,16], index: 10, kind: output, shape index: {1}]  }
   0x1   :  { %2579 = sst [smem:[#allocation34_spill]] %s2550_s1 }
   0x2   :  { %2580 = sst [smem:[#allocation35_spill]] %s2552_s3 }
   0x3   :  { %2581 = sst [smem:[#allocation36_spill]] %s2553_s4 }
   0x4   :  { %2582 = sst [smem:[#allocation37_spill]] %s2556_s7 }
   0x5   :  { %2583 = sst [smem:[#allocation38_spill]] %s2557_s8 }
   0x6   :  { %2584 = sst [smem:[#allocation39_spill]] %s2558_s9 }
   0x7   :  { %2585 = sst [smem:[#allocation40_spill]] %s2559_s10 }
   0x8   :  { %16 = vsyncpa [#allocation7], 0 }
   0x9   :  { %18 = vsyncpa [#allocation7 + $0x1], 0 }
   0xa   :  { %19 = vsyncpa [#allocation10], 0 }
   0xb   :  { %21 = vsyncpa [#allocation10 + $0x1], 0 }
   0xc   :  { %22 = vsyncpa [#allocation13], 0 }
   0xd   :  { %23 = vsyncpa [#allocation16], 0 }
   0xe   :  { %24 = vsyncpa [#allocation8], 0 }
   0xf   :  { %26 = vsyncpa [#allocation8 + $0x1], 0 }
  0x10   :  { %27 = vsyncpa [#allocation19], 0 }
  0x11   :  { %29 = vsyncpa [#allocation19 + $0x1], 0  ;;  %s2185_s13 = smov 0   ;;  %s2187_s14 = smov 0  }
  0x12   :  { %s2189_s15 = smov 0   ;;  %s2191_s16 = smov 0  }
  0x13   :  { %s2193_s17 = smov 0   ;;  %s2195_s18 = smov 0  }
  0x14   :  { %s2197_s19 = smov 0   ;;  %s2199_s20 = smov 0  }
  0x15 LB: > { %2586 = sst [smem:[#allocation26_spill]] %s2088_s13  ;;  %s2226_s21 = sadd.s32 4294967295, %s2116_s20   ;;  %s2116_s20 = sphi %s2199_s20, %s35_s20   ;;  %s2112_s19 = sphi %s2197_s19, %s2630_s19   ;;  %s2108_s18 = sphi %s2195_s18, %s2629_s18   ;;  %s2104_s17 = sphi %s2193_s17, %s2628_s17   ;;  %s2100_s16 = sphi %s2191_s16, %s2627_s16   ;;  %s2096_s15 = sphi %s2189_s15, %s2633_s15   ;;  %s2092_s14 = sphi %s2187_s14, %s2632_s14   ;;  %s2088_s13 = sphi %s2185_s13, %s2631_s13  }
  0x16   : > { %2587 = sst [smem:[#allocation27_spill]] %s2108_s18  ;;  %s1617_s22 = sadd.s32 4294967294, %s2116_s20  }
  0x17   : > { %2588 = sst [smem:[#allocation28_spill]] %s2112_s19  ;;  %p69_p0 = scmp.ne.s32.totalorder %s2092_s14, %s2088_s13 }
  0x18   : > { %p2572_p1 = scmp.eq.s32.totalorder %s2226_s21, 0  ;;  %p283_p3 = scmp.eq.s32.totalorder %s1617_s22, 3 }
  0x19   : > { %p1618_p5 = scmp.ge.s32.totalorder %s2116_s20, 1  ;;  %p318_p7 = scmp.lt.s32.totalorder %s2116_s20, 5 }
  0x1a   : > { %p2235_p4 = por %p2572_p1, %p69_p0  ;;  %p2240_p6 = por %p283_p3, %p69_p0 }
  0x1b   : > { %p2245_p8 = pnand %p1618_p5, %p318_p7  ;;  %s2118_s26 = smov [#allocation12]  }
  0x1c   : > { %s2589_s23 = scalar_select %p2235_p4, 1, 0 }
  0x1d   : > { %s2590_s24 = scalar_select %p2240_p6, 1, 0 }
  0x1e   : > { %s2592_s25 = scalar_select %p2245_p8, 1, 0 }
  0x1f   : > { %2591 = sst [smem:[#allocation29_spill]] %s2590_s24  ;;  %s330_s27 = sshll.u32 %s2118_s26, 4  ;;  %s331_s27 = int_to_ptr.vmem [resolvable:$true] %s330_s27 }
  0x20   : > { %p1700_p9 = pneg %p2245_p8  ;;  %s1827_s29 = scalar_lea.vmem %s331_s27, 24576 }
  0x21   : > { %p1828_p12 = scmp.ne.s32.totalorder %s331_s27, %s1827_s29  ;;  %p1835_p3 = scmp.lt.s32.totalorder %s331_s27, %s331_s27 }
  0x22   : > { %p2253_p10 = pnand %p1700_p9, %p2572_p1  ;;  %p1836_p5 = scmp.lt.s32.totalorder %s1827_s29, %s1827_s29 }
  0x24   : > { %p2573_p11 = pneg %p2253_p10  ;;  %p1837_p7 = por %p1836_p5, %p1835_p3 }
  0x26   : > { %p1830_p13 = pnand %p1828_p12, %p2573_p11 }
  0x28   : > { %p1831_p0 = pneg %p1830_p13 }
  0x2a   : > { %p1838_p2 = pnand %p1837_p7, %p1831_p0 }
  0x2c   : > { %1841 = shalt.err (!%p1838_p2)
}
  0x2d   : > { %s2562_s30 = smov 256   ;;  %s2563_s11 = smov 16  }
  0x2e   : > { %s2594_s3 = sld [smem:[#allocation35_spill]]  ;;  %s44_s26 = sadd.s32 1, %s2108_s18 }
  0x2f   : > { %p45_p2 = scmp.ge.s32.totalorder %s44_s26, 2  ;;  %s47_s29 = sadd.s32 1, %s2112_s19 }
  0x30   : > { %s56_s24 = sadd.s32 1, %s2096_s15  ;;  %p63_p9 = scmp.ne.s32.totalorder %s2096_s15, %s2092_s14 }
  0x31   : > { %s2635_s26 = smov (%p45_p2, %s44_s26), 0  ;;  %s2637_s29 = smov (!%p45_p2, %s47_s29), %s2112_s19 }
  0x32   : > { %2595 = sst [smem:[#allocation30_spill]] %s2635_s26  ;;  %s52_s13 = ssub.s32 %s2108_s18, %s2635_s26 }
  0x33   : > { %p64_p12 = scmp.eq.s32.totalorder %s2116_s20, 0  ;;  %p49_p13 = scmp.ge.s32.totalorder %s2637_s29, 2 }
  0x34   : > { %1703 = dma.hbm_to_vmem [thread:$0]  (!%p2253_p10), %s2594_s3, 24576, %s331_s27, [#allocation13], %s2562_s30, %s2562_s30, %s2563_s11  }
  0x35   : > { %p2596_p0 = scmp.eq.s32.totalorder %s2226_s21, 3  ;;  %p65_p5 = por %p64_p12, %p63_p9 }
  0x36   : > { %p1730_p7 = scmp.lt.s32.totalorder %s2116_s20, 4  ;;  %s2639_s29 = smov (%p49_p13, %s2637_s29), 0 }
  0x37   : > { %p2283_p3 = por %p2596_p0, %p63_p9  ;;  %2599 = sst [smem:[#allocation32_spill]] %s2639_s29 }
  0x38   : > { %s2569_s12 = sand.u32 1, %s2096_s15   ;;  %s1624_s22 = sshll.u32 %s2108_s18, 1 }
  0x39   : > { %s2597_s27 = scalar_select %p2283_p3, 1, 0 }
  0x3a   : > { %s51_s30 = ssub.s32 %s2112_s19, %s2639_s29  ;;  %s2296_s11 = sshll.u32 %s2569_s12, 4 }
  0x3b   : > { %2598 = sst [smem:[#allocation31_spill]] %s2597_s27  ;;  %s53_s3 = sor.u32 %s52_s13, %s51_s30 }
  0x3c   : > { %s1625_s26 = sshll.u32 %s2112_s19, 2  ;;  %p54_p2 = scmp.eq.s32.totalorder %s53_s3, 0 }
  0x3d   : > { %s387_s9 = sadd.s32 %s1625_s26, %s1624_s22  ;;  %p2301_p0 = pnand %p1730_p7, %p65_p5 }
  0x3e   : > { %s2299_s8 = sshll.u32 %s387_s9, 7  ;;  %s398_s29 = sand.u32 1, %s2116_s20  }
  0x3f   : > { %s2306_s10 = scalar_select %p54_p2, %s2096_s15, %s56_s24  }
  0x40   : > { %s2602_s1 = sld [smem:[#allocation34_spill]]  ;;  %s402_s13 = scalar_lea.vmem [#allocation9], %s2296_s11 }
  0x41   : > { %2601 = sst [smem:[#allocation33_spill]] %s2306_s10  ;;  %s412_s30 = sshll.u32 %s402_s13, 4  ;;  %s413_s30 = int_to_ptr.vmem [resolvable:$true] %s412_s30 }
  0x42   : > { %s2314_s3 = scalar_lea.sflag [#allocation10], %s398_s29  ;;  %p2574_p9 = pneg %p2301_p0 }
  0x43   : > { %s1855_s9 = scalar_lea.vmem %s413_s30, 256  ;;  %s2121_s24 = smov [#allocation9]  }
  0x44   : > { %p1856_p12 = scmp.ne.s32.totalorder %s413_s30, %s1855_s9  ;;  %s1860_s26 = sshll.u32 %s2121_s24, 4  ;;  %s1861_s26 = int_to_ptr.vmem [resolvable:$false] %s1860_s26 }
  0x45   : > { %s1862_s22 = scalar_lea.vmem %s1861_s26, 512  ;;  %p1863_p7 = scmp.lt.s32.totalorder %s413_s30, %s1861_s26 }
  0x46   : > { %s410_s27 = scalar_lea.hbm %s2602_s1, %s2299_s8  ;;  %p1858_p13 = pnand %p1856_p12, %p2574_p9 }
  0x47   : > { %p1864_p2 = scmp.lt.s32.totalorder %s1862_s22, %s1855_s9 }
  0x48   : > { %p1859_p5 = pneg %p1858_p13 }
  0x49   : > { %p1865_p1 = por %p1864_p2, %p1863_p7 }
  0x4b   : > { %p1866_p11 = pnand %p1865_p1, %p1859_p5 }
  0x4d   : > { %1869 = shalt.err (!%p1866_p11)
}
  0x4e   : > { %1716 = dma.hbm_to_vmem [thread:$0]  (!%p2301_p0), %s410_s27, 256, %s413_s30, %s2314_s3  }
  0x4f   : > { %s2122_s18 = smov [#allocation14]   ;;  %s2123_s12 = smov [#allocation15]  }
  0x50   : > { %s344_s29 = sshll.u32 %s2122_s18, 4  ;;  %s354_s13 = sshll.u32 %s2123_s12, 4  ;;  %s345_s29 = int_to_ptr.vmem [resolvable:$true] %s344_s29  ;;  %s355_s13 = int_to_ptr.vmem [resolvable:$true] %s354_s13 }
  0x51   : > { %s1881_s1 = scalar_lea.vmem %s345_s29, 128  ;;  %p2603_p13 = pneg %p2253_p10 }
  0x52   : > { %p1882_p12 = scmp.ne.s32.totalorder %s345_s29, %s1881_s1  ;;  %p1889_p3 = scmp.lt.s32.totalorder %s345_s29, %s345_s29 }
  0x53   : > { %p1890_p7 = scmp.lt.s32.totalorder %s1881_s1, %s1881_s1 }
  0x54   : > { %p1884_p9 = pnand %p1882_p12, %p2603_p13 }
  0x55   : > { %p1891_p1 = por %p1890_p7, %p1889_p3 }
  0x56   : > { %p1885_p6 = pneg %p1884_p9 }
  0x58   : > { %p1892_p11 = pnand %p1891_p1, %p1885_p6 }
  0x5a   : > { %1895 = shalt.err (!%p1892_p11)
}
  0x5b   : > { %s2604_s4 = sld [smem:[#allocation36_spill]]  ;;  %s1907_s30 = scalar_lea.vmem %s355_s13, 8192 }
  0x5c   : > { %p1908_p5 = scmp.ne.s32.totalorder %s355_s13, %s1907_s30  ;;  %p2605_p2 = pmov %p2603_p13 }
  0x5d   : > { %p1915_p9 = scmp.lt.s32.totalorder %s355_s13, %s355_s13  ;;  %p1916_p13 = scmp.lt.s32.totalorder %s1907_s30, %s1907_s30 }
  0x5e   : > { %p1910_p4 = pnand %p1908_p5, %p2605_p2 }
  0x5f   : > { %p1917_p8 = por %p1916_p13, %p1915_p9 }
  0x60   : > { %p1911_p12 = pneg %p1910_p4 }
  0x61   : > { %1706 = dma.hbm_to_vmem [thread:$0]  (!%p2253_p10), %s2604_s4, 128, %s345_s29, [#allocation13]  }
  0x62   : > { %p1918_p3 = pnand %p1917_p8, %p1911_p12 }
  0x64   : > { %1921 = shalt.err (!%p1918_p3)
}
  0x65   : > { %s2606_s1 = smov 16   ;;  %s2607_s24 = smov 256  }
  0x66   : > { %1709 = dma.hbm_to_vmem [thread:$0]  (!%p2253_p10), %s2554_s5, 8192, %s355_s13, [#allocation16], %s2607_s24, %s2607_s24, %s2606_s1  }
  0x67   : > { %s389_s12 = scalar_lea.hbm %s2549_s0, %s2299_s8  ;;  %s381_s9 = scalar_lea.vmem [#allocation6], %s2296_s11 }
  0x68   : > { %s391_s27 = sshll.u32 %s381_s9, 4  ;;  %s431_s4 = scalar_lea.hbm %s2551_s2, %s2299_s8  ;;  %s392_s27 = int_to_ptr.vmem [resolvable:$true] %s391_s27 }
  0x69   : > { %s2608_s19 = sand.u32 1, %s2096_s15   ;;  %s1935_s26 = scalar_lea.vmem %s392_s27, 256 }
  0x6a   : > { %s378_s10 = scalar_lea.sflag [#allocation7], %s2608_s19  ;;  %p1936_p4 = scmp.ne.s32.totalorder %s392_s27, %s1935_s26 }
  0x6b   : > { %p2609_p6 = pneg %p2301_p0  ;;  %s2124_s13 = smov [#allocation6]  }
  0x6c   : > { %s1940_s1 = sshll.u32 %s2124_s13, 4  ;;  %s1941_s1 = int_to_ptr.vmem [resolvable:$false] %s1940_s1 }
  0x6d   : > { %p1938_p8 = pnand %p1936_p4, %p2609_p6  ;;  %s1942_s24 = scalar_lea.vmem %s1941_s1, 512 }
  0x6e   : > { %p1943_p10 = scmp.lt.s32.totalorder %s392_s27, %s1941_s1  ;;  %p1944_p1 = scmp.lt.s32.totalorder %s1942_s24, %s1935_s26 }
  0x6f   : > { %p1939_p7 = pneg %p1938_p8 }
  0x70   : > { %p1945_p11 = por %p1944_p1, %p1943_p10 }
  0x72   : > { %p1946_p5 = pnand %p1945_p11, %p1939_p7 }
  0x74   : > { %1949 = shalt.err (!%p1946_p5)
}
  0x75   : > { %1713 = dma.hbm_to_vmem [thread:$0]  (!%p2301_p0), %s389_s12, 256, %s392_s27, %s378_s10  }
  0x76   : > { %s423_s19 = scalar_lea.vmem [#allocation11], %s2296_s11  ;;  %p2610_p12 = pmov %p2609_p6 }
  0x77   : > { %s433_s22 = sshll.u32 %s423_s19, 4  ;;  %s2125_s29 = smov [#allocation11]   ;;  %s434_s22 = int_to_ptr.vmem [resolvable:$true] %s433_s22 }
  0x78   : > { %s1963_s18 = scalar_lea.vmem %s434_s22, 256  ;;  %s1968_s9 = sshll.u32 %s2125_s29, 4  ;;  %s1969_s9 = int_to_ptr.vmem [resolvable:$false] %s1968_s9 }
  0x79   : > { %p1964_p2 = scmp.ne.s32.totalorder %s434_s22, %s1963_s18  ;;  %s1970_s28 = scalar_lea.vmem %s1969_s9, 512 }
  0x7a   : > { %p1971_p3 = scmp.lt.s32.totalorder %s434_s22, %s1969_s9  ;;  %p1972_p4 = scmp.lt.s32.totalorder %s1970_s28, %s1963_s18 }
  0x7b   : > { %p1966_p9 = pnand %p1964_p2, %p2610_p12 }
  0x7c   : > { %p1973_p6 = por %p1972_p4, %p1971_p3 }
  0x7d   : > { %p1967_p13 = pneg %p1966_p9 }
  0x7f   : > { %p1974_p8 = pnand %p1973_p6, %p1967_p13 }
  0x81   : > { %1977 = shalt.err (!%p1974_p8)
}
  0x82   : > { %1719 = dma.hbm_to_vmem [thread:$0]  (!%p2301_p0), %s431_s4, 256, %s434_s22, %s2314_s3  }
  0x83   : > { %p2611_p7 = scmp.ne.s32.totalorder %s2592_s25, 0 }
  0x84   : > { %s2374_s12 = sand.u32 (!%p2611_p7), 1, %s2092_s14   ;;  %p2612_p10 = scmp.ne.s32.totalorder (!%p2611_p7), %s2589_s23, 0 }
  0x85   : > { %442 = sbr.rel (%p2611_p7) target bundleno = 1704 (0x6a8), region = 56  ;;  %s2377_s27 = sshll.u32 (!%p2611_p7), %s2374_s12, 4 }
  0x86   : > { %s445_s7 = scalar_lea.sflag (!%p2611_p7), [#allocation7], %s2374_s12  ;;  %s448_s30 = scalar_lea.vmem (!%p2611_p7), [#allocation6], %s2377_s27 }
  0x8a   : > { %2063 = dma.done.wait (%p2612_p10), %s445_s7, 256  }
  0x8b   : > { %2065 = vsyncadd (%p2612_p10), %s445_s7, 4294967040  ;;  %s453_s4 = sand.u32 1, %s2226_s21   ;;  %s457_s25 = scalar_lea.vmem [#allocation9], %s2377_s27 }
  0x8c   : > { %s454_s8 = scalar_lea.sflag [#allocation10], %s453_s4 }
  0x8d   : > { %2067 = dma.done.wait (%p2612_p10), %s454_s8, 512  }
  0x8e   : > { %2069 = vsyncadd (%p2612_p10), %s454_s8, 4294966784  ;;  %s466_s3 = scalar_lea.vmem [#allocation11], %s2377_s27  ;;  %p2613_p0 = scmp.eq.s32.totalorder %s2226_s21, 0 }
  0x90   : > { %2071 = dma.done.wait (%p2613_p0), [#allocation13], 24704   ;;  %p2614_p1 = pmov %p2613_p0 }
  0x91   : > { %p2615_p11 = pmov %p2613_p0 }
  0x92   : > { %2073 = vsyncadd (%p2614_p1), [#allocation13], 4294942592 }
  0x93   : > { %2075 = dma.done.wait (%p2615_p11), [#allocation16], 8192   ;;  %p2616_p5 = pmov %p2613_p0 }
  0x94   : > { %v567_v0 = vld [vmem:[#allocation12 + $0xf8] sm:$0xff]  ;;  %v566_v1 = vld [vmem:[#allocation12 + $0xf0] sm:$0xff]  ;;  %v565_v2 = vld [vmem:[#allocation12 + $0xe8] sm:$0xff]  ;;  %vm1070_vm0 = vcmask 130048   ;;  %s2434_s21 = scalar_lea.vmem [#allocation18], %s2377_s27  ;;  %s2617_s13 = sld [smem:[#allocation31_spill]] }
  0x95   : > { %2077 = vsyncadd (%p2616_p5), [#allocation16], 4294959104  ;;  %612 = vmatprep.subr.mxu0 %v567_v0  ;;  %v564_v3 = vld [vmem:[#allocation12 + $0xe0] sm:$0xff]  ;;  %v563_v4 = vld [vmem:[#allocation12 + $0xd8] sm:$0xff]  ;;  %s1648_s1 = sshll.u32 %s2100_s16, 1  ;;  %s1649_s24 = sshll.u32 %s2104_s17, 2 }
  0x96   : > { %613 = vmatpush1.msra.mxu0 %v566_v1  ;;  %v562_v5 = vld [vmem:[#allocation12 + $0xd0] sm:$0xff]  ;;  %v561_v6 = vld [vmem:[#allocation12 + $0xc8] sm:$0xff]  ;;  %v560_v7 = vld [vmem:[#allocation12 + $0xc0] sm:$0xff]  ;;  %s2450_s19 = sadd.s32 %s1649_s24, %s1648_s1  ;;  %s2618_s9 = sld [smem:[#allocation40_spill]] }
  0x97   : > { %614 = vmatprep.subr.mxu0 %v565_v2  ;;  %v559_v8 = vld [vmem:[#allocation12 + $0xb8] sm:$0xff]  ;;  %v558_v9 = vld [vmem:[#allocation12 + $0xb0] sm:$0xff]  ;;  %v557_v10 = vld [vmem:[#allocation12 + $0xa8] sm:$0xff]  ;;  %s1650_s22 = sshll.u32 %s2450_s19, 7  ;;  %s1413_s10 = sshll.u32 %s2434_s21, 4  ;;  %s2461_s10 = int_to_ptr.vmem [resolvable:$true] %s1413_s10 }
  0x98   : > { %615 = vmatpush1.msra.mxu0 %v564_v3  ;;  %v556_v11 = vld [vmem:[#allocation12 + $0xa0] sm:$0xff]  ;;  %v555_v12 = vld [vmem:[#allocation12 + $0x98] sm:$0xff]  ;;  %v554_v13 = vld [vmem:[#allocation12 + $0x90] sm:$0xff]  ;;  %s1382_s11 = scalar_lea.sflag [#allocation19], %s2374_s12  ;;  %s1978_s16 = scalar_lea.vmem %s2461_s10, 256 }
  0x99   : > { %616 = vmatprep.subr.mxu0 %v563_v4  ;;  %v553_v14 = vld [vmem:[#allocation12 + $0x88] sm:$0xff]  ;;  %v552_v15 = vld [vmem:[#allocation12 + $0x80] sm:$0xff]  ;;  %v551_v16 = vld [vmem:[#allocation12 + $0x78] sm:$0xff]  ;;  %p1979_p2 = scmp.ne.s32.totalorder %s2461_s10, %s1978_s16  ;;  %s2126_s17 = smov [#allocation18]  }
  0x9a   : > { %617 = vmatpush1.msra.mxu0 %v562_v5  ;;  %v550_v17 = vld [vmem:[#allocation12 + $0x70] sm:$0xff]  ;;  %v549_v18 = vld [vmem:[#allocation12 + $0x68] sm:$0xff]  ;;  %v548_v19 = vld [vmem:[#allocation12 + $0x60] sm:$0xff]  ;;  %p2619_p12 = scmp.ne.s32.totalorder %s2617_s13, 0  ;;  %s1982_s7 = sshll.u32 %s2126_s17, 4  ;;  %s1983_s7 = int_to_ptr.vmem [resolvable:$false] %s1982_s7 }
  0x9b   : > { %618 = vmatprep.subr.mxu0 %v561_v6  ;;  %v547_v20 = vld [vmem:[#allocation12 + $0x58] sm:$0xff]  ;;  %v546_v21 = vld [vmem:[#allocation12 + $0x50] sm:$0xff]  ;;  %v545_v22 = vld [vmem:[#allocation12 + $0x48] sm:$0xff]  ;;  %p1985_p3 = scmp.lt.s32.totalorder %s2461_s10, %s1983_s7 }
  0x9c   : > { %619 = vmatpush1.msra.mxu0 %v560_v7  ;;  %v544_v23 = vld [vmem:[#allocation12 + $0x40] sm:$0xff]  ;;  %v531_v24 = vld [vmem:[%s448_s30 + $0x8] sm:$0xff]  ;;  %v542_v26 = vld [vmem:[#allocation12 + $0x30] sm:$0xff]  ;;  %s2458_s28 = scalar_lea.hbm %s2618_s9, %s1650_s22  ;;  %p1980_p9 = pnand %p1979_p2, %p2619_p12 }
  0x9d   : > { %620 = vmatprep.subr.mxu0 %v559_v8  ;;  %v543_v25 = vld [vmem:[#allocation12 + $0x38] sm:$0xff]  ;;  %676 = vmatprep.mubr.f32.mxu0 %v531_v24  ;;  %v541_v27 = vld [vmem:[#allocation12 + $0x28] sm:$0xff]  ;;  %v540_v28 = vld [vmem:[#allocation12 + $0x20] sm:$0xff] }
  0x9e   : > { %621 = vmatpush1.msra.mxu0 %v558_v9  ;;  %v539_v29 = vld [vmem:[#allocation12 + $0x18] sm:$0xff]  ;;  %v538_v30 = vld [vmem:[#allocation12 + $0x10] sm:$0xff]  ;;  %v537_v31 = vld [vmem:[#allocation12 + $0x8] sm:$0xff]  ;;  %p1981_p13 = pneg %p1980_p9 }
  0x9f   : > { %622 = vmatprep.subr.mxu0 %v557_v10  ;;  %v536_v32 = vld [vmem:[#allocation12] sm:$0xff]  ;;  %v599_v33 = vld [vmem:[#allocation12 + $0x1f8] sm:$0xff]  ;;  %v598_v34 = vld [vmem:[#allocation12 + $0x1f0] sm:$0xff] }
  0xa0   : > { %623 = vmatpush1.msra.mxu0 %v556_v11  ;;  %v597_v35 = vld [vmem:[#allocation12 + $0x1e8] sm:$0xff]  ;;  %v596_v36 = vld [vmem:[#allocation12 + $0x1e0] sm:$0xff]  ;;  %v595_v37 = vld [vmem:[#allocation12 + $0x1d8] sm:$0xff] }
  0xa1   : > { %624 = vmatprep.subr.mxu0 %v555_v12  ;;  %v594_v38 = vld [vmem:[#allocation12 + $0x1d0] sm:$0xff]  ;;  %v593_v39 = vld [vmem:[#allocation12 + $0x1c8] sm:$0xff]  ;;  %v592_v40 = vld [vmem:[#allocation12 + $0x1c0] sm:$0xff] }
  0xa2   : > { %625 = vmatpush1.msra.mxu0 %v554_v13  ;;  %v591_v41 = vld [vmem:[#allocation12 + $0x1b8] sm:$0xff]  ;;  %v590_v42 = vld [vmem:[#allocation12 + $0x1b0] sm:$0xff]  ;;  %v589_v43 = vld [vmem:[#allocation12 + $0x1a8] sm:$0xff] }
  0xa3   : > { %626 = vmatprep.subr.mxu0 %v553_v14  ;;  %v588_v44 = vld [vmem:[#allocation12 + $0x1a0] sm:$0xff]  ;;  %v587_v45 = vld [vmem:[#allocation12 + $0x198] sm:$0xff]  ;;  %v586_v46 = vld [vmem:[#allocation12 + $0x190] sm:$0xff] }
  0xa4   : > { %627 = vmatpush1.msra.mxu0 %v552_v15  ;;  %v585_v47 = vld [vmem:[#allocation12 + $0x188] sm:$0xff]  ;;  %v584_v48 = vld [vmem:[#allocation12 + $0x180] sm:$0xff]  ;;  %v583_v49 = vld [vmem:[#allocation12 + $0x178] sm:$0xff] }
  0xa5   : > { %628 = vmatprep.subr.mxu0 %v551_v16  ;;  %v582_v50 = vld [vmem:[#allocation12 + $0x170] sm:$0xff]  ;;  %v581_v51 = vld [vmem:[#allocation12 + $0x168] sm:$0xff]  ;;  %v580_v52 = vld [vmem:[#allocation12 + $0x160] sm:$0xff] }
  0xa6   : > { %629 = vmatpush1.msra.mxu0 %v550_v17  ;;  %v579_v53 = vld [vmem:[#allocation12 + $0x158] sm:$0xff]  ;;  %v578_v54 = vld [vmem:[#allocation12 + $0x150] sm:$0xff]  ;;  %v577_v55 = vld [vmem:[#allocation12 + $0x148] sm:$0xff] }
  0xa7   : > { %630 = vmatprep.subr.mxu0 %v549_v18  ;;  %v576_v56 = vld [vmem:[#allocation12 + $0x140] sm:$0xff]  ;;  %v575_v57 = vld [vmem:[#allocation12 + $0x138] sm:$0xff]  ;;  %v574_v58 = vld [vmem:[#allocation12 + $0x130] sm:$0xff] }
  0xa8   : > { %631 = vmatpush1.msra.mxu0 %v548_v19  ;;  %v573_v59 = vld [vmem:[#allocation12 + $0x128] sm:$0xff]  ;;  %v572_v60 = vld [vmem:[#allocation12 + $0x120] sm:$0xff]  ;;  %v571_v61 = vld [vmem:[#allocation12 + $0x118] sm:$0xff] }
  0xa9   : > { %632 = vmatprep.subr.mxu0 %v547_v20  ;;  %v570_v62 = vld [vmem:[#allocation12 + $0x110] sm:$0xff]  ;;  %v569_v63 = vld [vmem:[#allocation12 + $0x108] sm:$0xff]  ;;  %v568_v0 = vld [vmem:[#allocation12 + $0x100] sm:$0xff] }
  0xaa   : > { %633 = vmatpush1.msra.mxu0 %v546_v21  ;;  %v530_v1 = vld [vmem:[%s448_s30] sm:$0xff]  ;;  %v864_v2 = vld [vmem:[#allocation12 + $0x4f8] sm:$0xff]  ;;  %v862_v5 = vld [vmem:[#allocation12 + $0x4e8] sm:$0xff]  ;;  %s1984_s30 = scalar_lea.vmem %s1983_s7, 512 }
  0xab   : > { %634 = vmatprep.subr.mxu0 %v545_v22  ;;  %v863_v3 = vld [vmem:[#allocation12 + $0x4f0] sm:$0xff]  ;;  %v2406_v4 = vld [vmem:[%s466_s3 + $0x8] sm:$0xff]  ;;  %v861_v6 = vld [vmem:[#allocation12 + $0x4e0] sm:$0xff]  ;;  %p1986_p4 = scmp.lt.s32.totalorder %s1984_s30, %s1978_s16 }
  0xac   : > { %635 = vmatpush1.msra.mxu0 %v544_v23  ;;  %v860_v7 = vld [vmem:[#allocation12 + $0x4d8] sm:$0xff]  ;;  %v859_v8 = vld [vmem:[#allocation12 + $0x4d0] sm:$0xff]  ;;  %v858_v9 = vld [vmem:[#allocation12 + $0x4c8] sm:$0xff] }
  0xad   : > { %636 = vmatprep.subr.mxu0 %v543_v25  ;;  %v857_v10 = vld [vmem:[#allocation12 + $0x4c0] sm:$0xff]  ;;  %v856_v11 = vld [vmem:[#allocation12 + $0x4b8] sm:$0xff]  ;;  %v855_v12 = vld [vmem:[#allocation12 + $0x4b0] sm:$0xff]  ;;  %p1987_p6 = por %p1986_p4, %p1985_p3 }
  0xae   : > { %637 = vmatpush1.msra.mxu0 %v542_v26  ;;  %v854_v13 = vld [vmem:[#allocation12 + $0x4a8] sm:$0xff]  ;;  %v853_v14 = vld [vmem:[#allocation12 + $0x4a0] sm:$0xff]  ;;  %v852_v15 = vld [vmem:[#allocation12 + $0x498] sm:$0xff] }
  0xaf   : > { %638 = vmatprep.subr.mxu0 %v541_v27  ;;  %v851_v16 = vld [vmem:[#allocation12 + $0x490] sm:$0xff]  ;;  %v850_v17 = vld [vmem:[#allocation12 + $0x488] sm:$0xff]  ;;  %v849_v18 = vld [vmem:[#allocation12 + $0x480] sm:$0xff]  ;;  %p1988_p8 = pnand %p1987_p6, %p1981_p13 }
  0xb0   : > { %639 = vmatpush1.msra.mxu0 %v540_v28  ;;  %v848_v19 = vld [vmem:[#allocation12 + $0x478] sm:$0xff]  ;;  %v847_v20 = vld [vmem:[#allocation12 + $0x470] sm:$0xff]  ;;  %v846_v21 = vld [vmem:[#allocation12 + $0x468] sm:$0xff] }
  0xb1   : > { %640 = vmatprep.subr.mxu0 %v539_v29  ;;  %v845_v22 = vld [vmem:[#allocation12 + $0x460] sm:$0xff]  ;;  %v844_v23 = vld [vmem:[#allocation12 + $0x458] sm:$0xff]  ;;  %v843_v24 = vld [vmem:[#allocation12 + $0x450] sm:$0xff] }
  0xb2   : > { %641 = vmatpush1.msra.mxu0 %v538_v30  ;;  %v842_v25 = vld [vmem:[#allocation12 + $0x448] sm:$0xff]  ;;  %v841_v26 = vld [vmem:[#allocation12 + $0x440] sm:$0xff]  ;;  %v840_v27 = vld [vmem:[#allocation12 + $0x438] sm:$0xff] }
  0xb3   : > { %642 = vmatprep.subr.mxu0 %v537_v31  ;;  %v839_v28 = vld [vmem:[#allocation12 + $0x430] sm:$0xff]  ;;  %v838_v29 = vld [vmem:[#allocation12 + $0x428] sm:$0xff]  ;;  %v837_v30 = vld [vmem:[#allocation12 + $0x420] sm:$0xff] }
  0xb4   : > { %643 = vmatpush1.msra.mxu0 %v536_v32  ;;  %v836_v31 = vld [vmem:[#allocation12 + $0x418] sm:$0xff]  ;;  %v835_v32 = vld [vmem:[#allocation12 + $0x410] sm:$0xff] }
  0xb5   : > { %644 = vmatprep.subr.mxu0 %v599_v33  ;;  %v834_v33 = vld [vmem:[#allocation12 + $0x408] sm:$0xff] }
  0xb6   : > { %645 = vmatpush2.msra.mxu0 %v598_v34  ;;  %v833_v34 = vld [vmem:[#allocation12 + $0x400] sm:$0xff] }
  0xb7   : > { %646 = vmatprep.subr.mxu0 %v597_v35  ;;  %v896_v35 = vld [vmem:[#allocation12 + $0x5f8] sm:$0xff] }
  0xb8   : > { %647 = vmatpush2.msra.mxu0 %v596_v36  ;;  %v895_v36 = vld [vmem:[#allocation12 + $0x5f0] sm:$0xff] }
  0xb9   : > { %648 = vmatprep.subr.mxu0 %v595_v37  ;;  %v894_v37 = vld [vmem:[#allocation12 + $0x5e8] sm:$0xff] }
  0xba   : > { %649 = vmatpush2.msra.mxu0 %v594_v38  ;;  %v893_v38 = vld [vmem:[#allocation12 + $0x5e0] sm:$0xff] }
  0xbb   : > { %650 = vmatprep.subr.mxu0 %v593_v39  ;;  %v892_v39 = vld [vmem:[#allocation12 + $0x5d8] sm:$0xff] }
  0xbc   : > { %651 = vmatpush2.msra.mxu0 %v592_v40  ;;  %v891_v40 = vld [vmem:[#allocation12 + $0x5d0] sm:$0xff] }
  0xbd   : > { %652 = vmatprep.subr.mxu0 %v591_v41  ;;  %v890_v41 = vld [vmem:[#allocation12 + $0x5c8] sm:$0xff] }
  0xbe   : > { %653 = vmatpush2.msra.mxu0 %v590_v42  ;;  %v889_v42 = vld [vmem:[#allocation12 + $0x5c0] sm:$0xff] }
  0xbf   : > { %654 = vmatprep.subr.mxu0 %v589_v43  ;;  %v888_v43 = vld [vmem:[#allocation12 + $0x5b8] sm:$0xff] }
  0xc0   : > { %655 = vmatpush2.msra.mxu0 %v588_v44  ;;  %v887_v44 = vld [vmem:[#allocation12 + $0x5b0] sm:$0xff] }
  0xc1   : > { %656 = vmatprep.subr.mxu0 %v587_v45  ;;  %v886_v45 = vld [vmem:[#allocation12 + $0x5a8] sm:$0xff] }
  0xc2   : > { %657 = vmatpush2.msra.mxu0 %v586_v46  ;;  %v885_v46 = vld [vmem:[#allocation12 + $0x5a0] sm:$0xff] }
  0xc3   : > { %658 = vmatprep.subr.mxu0 %v585_v47  ;;  %v884_v47 = vld [vmem:[#allocation12 + $0x598] sm:$0xff] }
  0xc4   : > { %659 = vmatpush2.msra.mxu0 %v584_v48  ;;  %v883_v48 = vld [vmem:[#allocation12 + $0x590] sm:$0xff] }
  0xc5   : > { %660 = vmatprep.subr.mxu0 %v583_v49  ;;  %v882_v49 = vld [vmem:[#allocation12 + $0x588] sm:$0xff] }
  0xc6   : > { %661 = vmatpush2.msra.mxu0 %v582_v50  ;;  %v881_v50 = vld [vmem:[#allocation12 + $0x580] sm:$0xff] }
  0xc7   : > { %662 = vmatprep.subr.mxu0 %v581_v51  ;;  %v880_v51 = vld [vmem:[#allocation12 + $0x578] sm:$0xff] }
  0xc8   : > { %663 = vmatpush2.msra.mxu0 %v580_v52  ;;  %v879_v52 = vld [vmem:[#allocation12 + $0x570] sm:$0xff] }
  0xc9   : > { %664 = vmatprep.subr.mxu0 %v579_v53  ;;  %v878_v53 = vld [vmem:[#allocation12 + $0x568] sm:$0xff] }
  0xca   : > { %665 = vmatpush2.msra.mxu0 %v578_v54  ;;  %v877_v54 = vld [vmem:[#allocation12 + $0x560] sm:$0xff] }
  0xcb   : > { %666 = vmatprep.subr.mxu0 %v577_v55  ;;  %v876_v55 = vld [vmem:[#allocation12 + $0x558] sm:$0xff] }
  0xcc   : > { %667 = vmatpush2.msra.mxu0 %v576_v56  ;;  %v875_v56 = vld [vmem:[#allocation12 + $0x550] sm:$0xff] }
  0xcd   : > { %668 = vmatprep.subr.mxu0 %v575_v57  ;;  %v874_v57 = vld [vmem:[#allocation12 + $0x548] sm:$0xff] }
  0xce   : > { %669 = vmatpush2.msra.mxu0 %v574_v58  ;;  %v873_v58 = vld [vmem:[#allocation12 + $0x540] sm:$0xff] }
  0xcf   : > { %670 = vmatprep.subr.mxu0 %v573_v59  ;;  %v872_v59 = vld [vmem:[#allocation12 + $0x538] sm:$0xff] }
  0xd0   : > { %671 = vmatpush2.msra.mxu0 %v572_v60  ;;  %v871_v60 = vld [vmem:[#allocation12 + $0x530] sm:$0xff] }
  0xd1   : > { %672 = vmatprep.subr.mxu0 %v571_v61  ;;  %v870_v61 = vld [vmem:[#allocation12 + $0x528] sm:$0xff] }
  0xd2   : > { %673 = vmatpush2.msra.mxu0 %v570_v62  ;;  %v869_v62 = vld [vmem:[#allocation12 + $0x520] sm:$0xff] }
  0xd3   : > { %674 = vmatprep.subr.mxu0 %v569_v63  ;;  %v868_v63 = vld [vmem:[#allocation12 + $0x518] sm:$0xff] }
  0xd4   : > { %675 = vmatpush2.msra.mxu0 %v568_v0  ;;  %v867_v0 = vld [vmem:[#allocation12 + $0x510] sm:$0xff] }
  0xd5   : > { %677 = vmatmul.mubr.f32.vlgmr.msra.gmra.mxu0 %v530_v1  ;;  %910 = vmatprep.subr.mxu0 %v864_v2  ;;  %v866_v1 = vld [vmem:[#allocation12 + $0x508] sm:$0xff]  ;;  %v865_v2 = vld [vmem:[#allocation12 + $0x500] sm:$0xff] }
  0xd6   : > { %911 = vmatpush1.msra.mxu0 %v863_v3  ;;  %974 = vmatprep.mubr.f32.mxu0 %v2406_v4  ;;  %v2411_v3 = vld [vmem:[%s466_s3] sm:$0xff] }
  0xd7   : > { %912 = vmatprep.subr.mxu0 %v862_v5  ;;  %v602_v5 = vlaneseq }
  0xd8   : > { %913 = vmatpush1.msra.mxu0 %v861_v6 }
  0xd9   : > { %914 = vmatprep.subr.mxu0 %v860_v7  ;;  %v603_v6 = vshrl.u32 %v602_v5, 7  ;;  %v738_v5 = vld [vmem:[#allocation12 + $0x3b0] sm:$0xff] }
  0xda   : > { %915 = vmatpush1.msra.mxu0 %v859_v8  ;;  %v600_v8 = vld [vmem:[#allocation14] ss:$4 sm:$0x3] }
  0xdb   : > { %916 = vmatprep.subr.mxu0 %v858_v9  ;;  %v2414_v7 = vsub.s32 1, %v603_v6  ;;  %v2416_v9 = vsub.s32 0, %v603_v6  ;;  %v737_v6 = vld [vmem:[#allocation12 + $0x3a8] sm:$0xff] }
  0xdc   : > { %917 = vmatpush1.msra.mxu0 %v857_v10 }
  0xdd   : > { %918 = vmatprep.subr.mxu0 %v856_v11  ;;  %v609_v10 = vrot.slane %v600_v8, %v2414_v7 }
  0xde   : > { %919 = vmatpush1.msra.mxu0 %v855_v12  ;;  %v605_v12 = vrot.slane %v600_v8, %v2416_v9  ;;  %v736_v8 = vld [vmem:[#allocation12 + $0x3a0] sm:$0xff] }
  0xdf   : > { %920 = vmatprep.subr.mxu0 %v854_v13 }
  0xe0   : > { %921 = vmatpush1.msra.mxu0 %v853_v14 }
  0xe1   : > { %922 = vmatprep.subr.mxu0 %v852_v15 }
  0xe2   : > { %923 = vmatpush1.msra.mxu0 %v851_v16  ;;  %v898_v16 = vld [vmem:[#allocation14 + $0x2] ss:$4 sm:$0x3] }
  0xe3   : > { %924 = vmatprep.subr.mxu0 %v850_v17  ;;  %v903_v17 = vrot.slane %v898_v16, %v2416_v9 }
  0xe4   : > { %925 = vmatpush1.msra.mxu0 %v849_v18  ;;  %v907_v18 = vrot.slane %v898_v16, %v2414_v7  ;;  %v729_v16 = vld [vmem:[#allocation12 + $0x368] sm:$0xff] }
  0xe5   : > { %926 = vmatprep.subr.mxu0 %v848_v19 }
  0xe6   : > { %927 = vmatpush1.msra.mxu0 %v847_v20 }
  0xe7   : > { %928 = vmatprep.subr.mxu0 %v846_v21 }
  0xe8   : > { %929 = vmatpush1.msra.mxu0 %v845_v22 }
  0xe9   : > { %930 = vmatprep.subr.mxu0 %v844_v23 }
  0xea   : > { %931 = vmatpush1.msra.mxu0 %v843_v24 }
  0xeb   : > { %932 = vmatprep.subr.mxu0 %v842_v25  ;;  %v715_v25 = vld [vmem:[#allocation12 + $0x2f8] sm:$0xff] }
  0xec   : > { %933 = vmatpush1.msra.mxu0 %v841_v26  ;;  %v714_v26 = vld [vmem:[#allocation12 + $0x2f0] sm:$0xff]  ;;  %761 = vmatprep.subr.mxu1 %v715_v25  ;;  %v720_v25 = vld [vmem:[#allocation12 + $0x320] sm:$0xff] }
  0xed   : > { %934 = vmatprep.subr.mxu0 %v840_v27  ;;  %v713_v27 = vld [vmem:[#allocation12 + $0x2e8] sm:$0xff]  ;;  %762 = vmatpush1.msra.mxu1 %v714_v26  ;;  %v719_v26 = vld [vmem:[#allocation12 + $0x318] sm:$0xff] }
  0xee   : > { %935 = vmatpush1.msra.mxu0 %v839_v28  ;;  %v712_v28 = vld [vmem:[#allocation12 + $0x2e0] sm:$0xff]  ;;  %763 = vmatprep.subr.mxu1 %v713_v27  ;;  %v718_v27 = vld [vmem:[#allocation12 + $0x310] sm:$0xff] }
  0xef   : > { %936 = vmatprep.subr.mxu0 %v838_v29  ;;  %v711_v29 = vld [vmem:[#allocation12 + $0x2d8] sm:$0xff]  ;;  %764 = vmatpush1.msra.mxu1 %v712_v28  ;;  %v717_v28 = vld [vmem:[#allocation12 + $0x308] sm:$0xff] }
  0xf0   : > { %937 = vmatpush1.msra.mxu0 %v837_v30  ;;  %v710_v30 = vld [vmem:[#allocation12 + $0x2d0] sm:$0xff]  ;;  %765 = vmatprep.subr.mxu1 %v711_v29  ;;  %v716_v29 = vld [vmem:[#allocation12 + $0x300] sm:$0xff] }
  0xf1   : > { %938 = vmatprep.subr.mxu0 %v836_v31  ;;  %v709_v31 = vld [vmem:[#allocation12 + $0x2c8] sm:$0xff]  ;;  %766 = vmatpush1.msra.mxu1 %v710_v30  ;;  %v532_v30 = vld [vmem:[%s457_s25] sm:$0xff] }
  0xf2   : > { %939 = vmatpush1.msra.mxu0 %v835_v32  ;;  %v708_v32 = vld [vmem:[#allocation12 + $0x2c0] sm:$0xff]  ;;  %767 = vmatprep.subr.mxu1 %v709_v31 }
  0xf3   : > { %940 = vmatprep.subr.mxu0 %v834_v33  ;;  %v707_v33 = vld [vmem:[#allocation12 + $0x2b8] sm:$0xff]  ;;  %768 = vmatpush1.msra.mxu1 %v708_v32 }
  0xf4   : > { %941 = vmatpush1.msra.mxu0 %v833_v34  ;;  %v706_v34 = vld [vmem:[#allocation12 + $0x2b0] sm:$0xff]  ;;  %769 = vmatprep.subr.mxu1 %v707_v33 }
  0xf5   : > { %942 = vmatprep.subr.mxu0 %v896_v35  ;;  %v705_v35 = vld [vmem:[#allocation12 + $0x2a8] sm:$0xff]  ;;  %770 = vmatpush1.msra.mxu1 %v706_v34 }
  0xf6   : > { %943 = vmatpush2.msra.mxu0 %v895_v36  ;;  %v704_v36 = vld [vmem:[#allocation12 + $0x2a0] sm:$0xff]  ;;  %771 = vmatprep.subr.mxu1 %v705_v35 }
  0xf7   : > { %944 = vmatprep.subr.mxu0 %v894_v37  ;;  %v703_v37 = vld [vmem:[#allocation12 + $0x298] sm:$0xff]  ;;  %772 = vmatpush1.msra.mxu1 %v704_v36 }
  0xf8   : > { %945 = vmatpush2.msra.mxu0 %v893_v38  ;;  %v702_v38 = vld [vmem:[#allocation12 + $0x290] sm:$0xff]  ;;  %773 = vmatprep.subr.mxu1 %v703_v37 }
  0xf9   : > { %946 = vmatprep.subr.mxu0 %v892_v39  ;;  %v701_v39 = vld [vmem:[#allocation12 + $0x288] sm:$0xff]  ;;  %774 = vmatpush1.msra.mxu1 %v702_v38 }
  0xfa   : > { %947 = vmatpush2.msra.mxu0 %v891_v40  ;;  %v700_v40 = vld [vmem:[#allocation12 + $0x280] sm:$0xff]  ;;  %775 = vmatprep.subr.mxu1 %v701_v39 }
  0xfb   : > { %948 = vmatprep.subr.mxu0 %v890_v41  ;;  %v699_v41 = vld [vmem:[#allocation12 + $0x278] sm:$0xff]  ;;  %776 = vmatpush1.msra.mxu1 %v700_v40 }
  0xfc   : > { %949 = vmatpush2.msra.mxu0 %v889_v42  ;;  %v698_v42 = vld [vmem:[#allocation12 + $0x270] sm:$0xff]  ;;  %777 = vmatprep.subr.mxu1 %v699_v41 }
  0xfd   : > { %950 = vmatprep.subr.mxu0 %v888_v43  ;;  %v697_v43 = vld [vmem:[#allocation12 + $0x268] sm:$0xff]  ;;  %778 = vmatpush1.msra.mxu1 %v698_v42 }
  0xfe   : > { %951 = vmatpush2.msra.mxu0 %v887_v44  ;;  %v696_v44 = vld [vmem:[#allocation12 + $0x260] sm:$0xff]  ;;  %779 = vmatprep.subr.mxu1 %v697_v43 }
  0xff   : > { %952 = vmatprep.subr.mxu0 %v886_v45  ;;  %v695_v45 = vld [vmem:[#allocation12 + $0x258] sm:$0xff]  ;;  %780 = vmatpush1.msra.mxu1 %v696_v44 }
 0x100   : > { %953 = vmatpush2.msra.mxu0 %v885_v46  ;;  %v694_v46 = vld [vmem:[#allocation12 + $0x250] sm:$0xff]  ;;  %781 = vmatprep.subr.mxu1 %v695_v45  ;;  %v749_v45 = vld [vmem:[#allocation14 + $0x1] ss:$4 sm:$0x3] }
 0x101   : > { %954 = vmatprep.subr.mxu0 %v884_v47  ;;  %v693_v47 = vld [vmem:[#allocation12 + $0x248] sm:$0xff]  ;;  %782 = vmatpush1.msra.mxu1 %v694_v46 }
 0x102   : > { %955 = vmatpush2.msra.mxu0 %v883_v48  ;;  %v692_v48 = vld [vmem:[#allocation12 + $0x240] sm:$0xff]  ;;  %783 = vmatprep.subr.mxu1 %v693_v47  ;;  %v754_v47 = vrot.slane %v749_v45, %v2416_v9 }
 0x103   : > { %956 = vmatprep.subr.mxu0 %v882_v49  ;;  %v533_v49 = vld [vmem:[%s457_s25 + $0x8] sm:$0xff]  ;;  %784 = vmatpush1.msra.mxu1 %v692_v48  ;;  %v758_v48 = vrot.slane %v749_v45, %v2414_v7 }
 0x104   : > { %957 = vmatpush2.msra.mxu0 %v881_v50  ;;  %v691_v50 = vld [vmem:[#allocation12 + $0x238] sm:$0xff]  ;;  %825 = vmatprep.mubr.f32.mxu1 %v533_v49  ;;  %v1228_v45 = vld [vmem:[#allocation15 + $0x180] sm:$0xff] }
 0x105   : > { %958 = vmatprep.subr.mxu0 %v880_v51  ;;  %v690_v51 = vld [vmem:[#allocation12 + $0x230] sm:$0xff]  ;;  %785 = vmatprep.subr.mxu1 %v691_v50 }
 0x106   : > { %959 = vmatpush2.msra.mxu0 %v879_v52  ;;  %v689_v52 = vld [vmem:[#allocation12 + $0x228] sm:$0xff]  ;;  %786 = vmatpush1.msra.mxu1 %v690_v51 }
 0x107   : > { %960 = vmatprep.subr.mxu0 %v878_v53  ;;  %v688_v53 = vld [vmem:[#allocation12 + $0x220] sm:$0xff]  ;;  %787 = vmatprep.subr.mxu1 %v689_v52 }
 0x108   : > { %961 = vmatpush2.msra.mxu0 %v877_v54  ;;  %v687_v54 = vld [vmem:[#allocation12 + $0x218] sm:$0xff]  ;;  %788 = vmatpush1.msra.mxu1 %v688_v53  ;;  %v1211_v52 = vld [vmem:[#allocation15 + $0xf8] sm:$0xff] }
 0x109   : > { %962 = vmatprep.subr.mxu0 %v876_v55  ;;  %v686_v55 = vld [vmem:[#allocation12 + $0x210] sm:$0xff]  ;;  %789 = vmatprep.subr.mxu1 %v687_v54 }
 0x10a   : > { %963 = vmatpush2.msra.mxu0 %v875_v56  ;;  %v685_v56 = vld [vmem:[#allocation12 + $0x208] sm:$0xff]  ;;  %790 = vmatpush1.msra.mxu1 %v686_v55 }
 0x10b   : > { %964 = vmatprep.subr.mxu0 %v874_v57  ;;  %v684_v57 = vld [vmem:[#allocation12 + $0x200] sm:$0xff]  ;;  %791 = vmatprep.subr.mxu1 %v685_v56 }
 0x10c   : > { %965 = vmatpush2.msra.mxu0 %v873_v58  ;;  %v747_v58 = vld [vmem:[#allocation12 + $0x3f8] sm:$0xff]  ;;  %792 = vmatpush1.msra.mxu1 %v684_v57 }
 0x10d   : > { %966 = vmatprep.subr.mxu0 %v872_v59  ;;  %v746_v59 = vld [vmem:[#allocation12 + $0x3f0] sm:$0xff]  ;;  %793 = vmatprep.subr.mxu1 %v747_v58 }
 0x10e   : > { %967 = vmatpush2.msra.mxu0 %v871_v60  ;;  %v745_v60 = vld [vmem:[#allocation12 + $0x3e8] sm:$0xff]  ;;  %794 = vmatpush2.msra.mxu1 %v746_v59  ;;  %v1210_v59 = vld [vmem:[#allocation15 + $0xf0] sm:$0xff] }
 0x10f   : > { %968 = vmatprep.subr.mxu0 %v870_v61  ;;  %v744_v61 = vld [vmem:[#allocation12 + $0x3e0] sm:$0xff]  ;;  %795 = vmatprep.subr.mxu1 %v745_v60  ;;  %v1209_v60 = vld [vmem:[#allocation15 + $0xe8] sm:$0xff] }
 0x110   : > { %969 = vmatpush2.msra.mxu0 %v869_v62  ;;  %v743_v62 = vld [vmem:[#allocation12 + $0x3d8] sm:$0xff]  ;;  %796 = vmatpush2.msra.mxu1 %v744_v61  ;;  %v1208_v61 = vld [vmem:[#allocation15 + $0xe0] sm:$0xff] }
 0x111   : > { %970 = vmatprep.subr.mxu0 %v868_v63  ;;  %v742_v63 = vld [vmem:[#allocation12 + $0x3d0] sm:$0xff]  ;;  %797 = vmatprep.subr.mxu1 %v743_v62  ;;  %v1207_v62 = vld [vmem:[#allocation15 + $0xd8] sm:$0xff] }
 0x112   : > { %971 = vmatpush2.msra.mxu0 %v867_v0  ;;  %v741_v0 = vld [vmem:[#allocation12 + $0x3c8] sm:$0xff]  ;;  %798 = vmatpush2.msra.mxu1 %v742_v63  ;;  %v1206_v63 = vld [vmem:[#allocation15 + $0xd0] sm:$0xff] }
 0x113   : > { %972 = vmatprep.subr.mxu0 %v866_v1  ;;  %v740_v1 = vld [vmem:[#allocation12 + $0x3c0] sm:$0xff]  ;;  %799 = vmatprep.subr.mxu1 %v741_v0  ;;  %v1205_v0 = vld [vmem:[#allocation15 + $0xc8] sm:$0xff] }
 0x114   : > { %973 = vmatpush2.msra.mxu0 %v865_v2  ;;  %v739_v2 = vld [vmem:[#allocation12 + $0x3b8] sm:$0xff]  ;;  %800 = vmatpush2.msra.mxu1 %v740_v1  ;;  %v1204_v1 = vld [vmem:[#allocation15 + $0xc0] sm:$0xff] }
 0x115   : > { %975 = vmatmul.mubr.f32.vlgmr.msra.gmra.mxu0 %v2411_v3  ;;  %801 = vmatprep.subr.mxu1 %v739_v2  ;;  %v1203_v2 = vld [vmem:[#allocation15 + $0xb8] sm:$0xff] }
 0x116   : > { %802 = vmatpush2.msra.mxu1 %v738_v5  ;;  %v1202_v5 = vld [vmem:[#allocation15 + $0xb0] sm:$0xff] }
 0x117   : > { %803 = vmatprep.subr.mxu1 %v737_v6  ;;  %v1201_v6 = vld [vmem:[#allocation15 + $0xa8] sm:$0xff] }
 0x118   : > { %804 = vmatpush2.msra.mxu1 %v736_v8  ;;  %v1200_v8 = vld [vmem:[#allocation15 + $0xa0] sm:$0xff] }
 0x195   : > { %v678_v11 = vpop.f32.mrf.mxu0 }
 0x196   : > { %v679_v15 = vadd.f32 %v678_v11, %v605_v12  ;;  %v734_v11 = vld [vmem:[#allocation12 + $0x390] sm:$0xff]  ;;  %v733_v12 = vld [vmem:[#allocation12 + $0x388] sm:$0xff] }
 0x197   : > { %v680_v13 = vpop.f32.mrf.mxu0 }
 0x198   : > { %v681_v14 = vadd.f32 %v680_v13, %v609_v10  ;;  %v735_v10 = vld [vmem:[#allocation12 + $0x398] sm:$0xff]  ;;  %v732_v13 = vld [vmem:[#allocation12 + $0x380] sm:$0xff] }
 0x199   : > { %805 = vmatprep.subr.mxu1 %v735_v10  ;;  %v1199_v10 = vld [vmem:[#allocation15 + $0x98] sm:$0xff] }
 0x19a   : > { %1664 = vmatprep.subr.mxu0 %v681_v14  ;;  %806 = vmatpush2.msra.mxu1 %v734_v11  ;;  %v1198_v11 = vld [vmem:[#allocation15 + $0x90] sm:$0xff] }
 0x19b   : > { %1665 = vmatpush3.xpose.msra.mxu0 %v681_v14  ;;  %v731_v14 = vld [vmem:[#allocation12 + $0x378] sm:$0xff]  ;;  %807 = vmatprep.subr.mxu1 %v733_v12  ;;  %v1197_v12 = vld [vmem:[#allocation15 + $0x88] sm:$0xff] }
 0x19c   : > { %1666 = vmatprep.subr.mxu0 %v679_v15  ;;  %808 = vmatpush2.msra.mxu1 %v732_v13  ;;  %v1196_v13 = vld [vmem:[#allocation15 + $0x80] sm:$0xff] }
 0x19d   : > { %809 = vmatprep.subr.mxu1 %v731_v14  ;;  %v1195_v14 = vld [vmem:[#allocation15 + $0x78] sm:$0xff] }
 0x19f   : > { %1667 = vmatpush3.xpose.msra.mxu0 %v679_v15  ;;  %v730_v15 = vld [vmem:[#allocation12 + $0x370] sm:$0xff] }
 0x1a0   : > { %810 = vmatpush2.msra.mxu1 %v730_v15  ;;  %v1194_v15 = vld [vmem:[#allocation15 + $0x70] sm:$0xff] }
 0x1a1   : > { %811 = vmatprep.subr.mxu1 %v729_v16  ;;  %v1193_v16 = vld [vmem:[#allocation15 + $0x68] sm:$0xff] }
 0x1d5   : > { %v976_v19 = vpop.f32.mrf.mxu0 }
 0x1d6   : > { %v977_v20 = vadd.f32 %v976_v19, %v903_v17  ;;  %v728_v17 = vld [vmem:[#allocation12 + $0x360] sm:$0xff]  ;;  %v726_v19 = vld [vmem:[#allocation12 + $0x350] sm:$0xff] }
 0x1d7   : > { %v978_v21 = vpop.f32.mrf.mxu0  ;;  %812 = vmatpush2.msra.mxu1 %v728_v17  ;;  %v1192_v17 = vld [vmem:[#allocation15 + $0x60] sm:$0xff] }
 0x1d8   : > { %v981_v22 = vmul.f32 0.125, %v977_v20  ;;  %v979_v23 = vadd.f32 %v978_v21, %v907_v18  ;;  %v727_v18 = vld [vmem:[#allocation12 + $0x358] sm:$0xff]  ;;  %v725_v20 = vld [vmem:[#allocation12 + $0x348] sm:$0xff]  ;;  %v724_v21 = vld [vmem:[#allocation12 + $0x340] sm:$0xff] }
 0x1d9   : > { %813 = vmatprep.subr.mxu1 %v727_v18  ;;  %v1191_v18 = vld [vmem:[#allocation15 + $0x58] sm:$0xff] }
 0x1da   : > { %v982_v24 = vmul.f32 0.125, %v979_v23  ;;  %1668 = vmatprep.mubr.f32.mxu0 %v981_v22  ;;  %814 = vmatpush2.msra.mxu1 %v726_v19  ;;  %v723_v22 = vld [vmem:[#allocation12 + $0x338] sm:$0xff]  ;;  %v722_v23 = vld [vmem:[#allocation12 + $0x330] sm:$0xff] }
 0x1db   : > { %815 = vmatprep.subr.mxu1 %v725_v20  ;;  %v1190_v19 = vld [vmem:[#allocation15 + $0x50] sm:$0xff]  ;;  %v1189_v20 = vld [vmem:[#allocation15 + $0x48] sm:$0xff] }
 0x1dc   : > { %1669 = vmatmul.mubr.f32.vlgmr.msra.gmra.mxu0 %v982_v24  ;;  %816 = vmatpush2.msra.mxu1 %v724_v21  ;;  %v721_v24 = vld [vmem:[#allocation12 + $0x328] sm:$0xff] }
 0x1dd   : > { %817 = vmatprep.subr.mxu1 %v723_v22  ;;  %v1188_v21 = vld [vmem:[#allocation15 + $0x40] sm:$0xff]  ;;  %v1187_v22 = vld [vmem:[#allocation15 + $0x38] sm:$0xff] }
 0x1de   : > { %818 = vmatpush2.msra.mxu1 %v722_v23  ;;  %v1186_v23 = vld [vmem:[#allocation15 + $0x30] sm:$0xff] }
 0x1df   : > { %819 = vmatprep.subr.mxu1 %v721_v24  ;;  %v1185_v24 = vld [vmem:[#allocation15 + $0x28] sm:$0xff] }
 0x1e0   : > { %820 = vmatpush2.msra.mxu1 %v720_v25  ;;  %v1184_v25 = vld [vmem:[#allocation15 + $0x20] sm:$0xff] }
 0x1e1   : > { %821 = vmatprep.subr.mxu1 %v719_v26  ;;  %v1183_v26 = vld [vmem:[#allocation15 + $0x18] sm:$0xff] }
 0x1e2   : > { %822 = vmatpush2.msra.mxu1 %v718_v27  ;;  %v1182_v27 = vld [vmem:[#allocation15 + $0x10] sm:$0xff] }
 0x1e3   : > { %823 = vmatprep.subr.mxu1 %v717_v28  ;;  %v1181_v28 = vld [vmem:[#allocation15 + $0x8] sm:$0xff] }
 0x1e4   : > { %824 = vmatpush2.msra.mxu1 %v716_v29  ;;  %v1180_v29 = vld [vmem:[#allocation15] sm:$0xff] }
 0x1e5   : > { %826 = vmatmul.mubr.f32.vlgmr.msra.gmra.mxu1 %v532_v30  ;;  %v1243_v30 = vld [vmem:[#allocation15 + $0x1f8] sm:$0xff] }
 0x29c   : > { %v1670_v31 = vpop.f32.mrf.mxu0 }
 0x29d   : > { %v1074_v34 = vsel %vm1070_vm0, %v1670_v31, -inf }
 0x29e   : > { %v1061_v32 = vpop.f32.mrf.mxu0 }
 0x29f   : > { %v1071_v33 = vsel %vm1070_vm0, %v1061_v32, -inf }
 0x2a0   : > { %1072 = vmax.xlane.f32.xlu0 %v1071_v33  ;;  %v1240_v33 = vld [vmem:[#allocation15 + $0x1e0] sm:$0xff] }
 0x2a4   : > { %1075 = vmax.xlane.f32.xlu0 %v1074_v34  ;;  %v1239_v34 = vld [vmem:[#allocation15 + $0x1d8] sm:$0xff] }
 0x2a5   : > { %v827_v46 = vpop.f32.mrf.mxu1 }
 0x2a6   : > { %v828_v50 = vadd.f32 %v827_v46, %v754_v47  ;;  %v1227_v46 = vld [vmem:[#allocation15 + $0x178] sm:$0xff]  ;;  %v1226_v47 = vld [vmem:[#allocation15 + $0x170] sm:$0xff] }
 0x2a7   : > { %v829_v49 = vpop.f32.mrf.mxu1 }
 0x2a8   : > { %v830_v51 = vadd.f32 %v829_v49, %v758_v48  ;;  %v1225_v48 = vld [vmem:[#allocation15 + $0x168] sm:$0xff]  ;;  %v1224_v49 = vld [vmem:[#allocation15 + $0x160] sm:$0xff] }
 0x2aa   : > { %1671 = vmatprep.subr.mxu1 %v830_v51 }
 0x2ab   : > { %1672 = vmatpush3.msra.mxu1 %v830_v51  ;;  %v1222_v51 = vld [vmem:[#allocation15 + $0x150] sm:$0xff] }
 0x2ac   : > { %1673 = vmatprep.subr.mxu1 %v828_v50 }
 0x2ad   : > { %1674 = vmatpush3.msra.mxu1 %v828_v50  ;;  %v1223_v50 = vld [vmem:[#allocation15 + $0x158] sm:$0xff] }
 0x2ae   : > { %1256 = vmatprep.subr.mxu1 %v1211_v52  ;;  %v1221_v52 = vld [vmem:[#allocation15 + $0x148] sm:$0xff] }
 0x329   : > { %v1073_v35 = vpop.xlane.xlu0 %1072 }
 0x32a   : > { %v1077_v36 = vsub.f32 %v1061_v32, %v1073_v35  ;;  %v1241_v32 = vld [vmem:[#allocation15 + $0x1e8] sm:$0xff]  ;;  %v1238_v35 = vld [vmem:[#allocation15 + $0x1d0] sm:$0xff] }
 0x32c   : > { %v1079_v37 = vmul.f32 1.442695, %v1077_v36  ;;  %v1237_v36 = vld [vmem:[#allocation15 + $0x1c8] sm:$0xff] }
 0x32d   : > { %v1076_v38 = vpop.xlane.xlu0 %1075 }
 0x32e   : > { %1806 = vpow2.f32 %v1079_v37  ;;  %v1078_v39 = vsub.f32 %v1670_v31, %v1076_v38  ;;  %v1242_v31 = vld [vmem:[#allocation15 + $0x1f0] sm:$0xff]  ;;  %v1236_v37 = vld [vmem:[#allocation15 + $0x1c0] sm:$0xff]  ;;  %v1235_v38 = vld [vmem:[#allocation15 + $0x1b8] sm:$0xff] }
 0x330   : > { %v1081_v40 = vmul.f32 1.442695, %v1078_v39  ;;  %v1234_v39 = vld [vmem:[#allocation15 + $0x1b0] sm:$0xff] }
 0x332   : > { %1808 = vpow2.f32 %v1081_v40  ;;  %v1233_v40 = vld [vmem:[#allocation15 + $0x1a8] sm:$0xff] }
 0x33b   : > { %v1807_v41 = vpop.eup %1806 }
 0x33c   : > { %v1083_v42 = vsel %vm1070_vm0, %v1807_v41, 0.0 }
 0x33d   : > { %1084 = vadd.xlane.f32.xlu1 %v1083_v42  ;;  %v1231_v42 = vld [vmem:[#allocation15 + $0x198] sm:$0xff] }
 0x33f   : > { %v1809_v43 = vpop.eup %1808 }
 0x340   : > { %v1086_v44 = vsel %vm1070_vm0, %v1809_v43, 0.0 }
 0x341   : > { %1087 = vadd.xlane.f32.xlu1 %v1086_v44  ;;  %v1229_v44 = vld [vmem:[#allocation15 + $0x188] sm:$0xff] }
 0x3c6   : > { %v1085_v53 = vpop.xlane.xlu1 %1084 }
 0x3c7   : > { %1810 = vrcp.f32 %v1085_v53  ;;  %v1220_v53 = vld [vmem:[#allocation15 + $0x140] sm:$0xff] }
 0x3ca   : > { %v1088_v54 = vpop.xlane.xlu1 %1087 }
 0x3cb   : > { %1812 = vrcp.f32 %v1088_v54  ;;  %v1219_v54 = vld [vmem:[#allocation15 + $0x138] sm:$0xff] }
 0x3d4   : > { %v1811_v55 = vpop.eup %1810 }
 0x3d5   : > { %v1091_v56 = vmul.f32 %v1811_v55, %v1807_v41  ;;  %v1232_v41 = vld [vmem:[#allocation15 + $0x1a0] sm:$0xff]  ;;  %v1218_v55 = vld [vmem:[#allocation15 + $0x130] sm:$0xff] }
 0x3d7   : > { %1675 = vmatprep.mubr.msk.f32.mxu1 %vm1070_vm0, %v1091_v56  ;;  %1093 = vst.msk [vmem:[%s2434_s21] sm:$0xff] %vm1070_vm0, %v1091_v56  ;;  %v1217_v56 = vld [vmem:[#allocation15 + $0x128] sm:$0xff] }
 0x3d8   : > { %v1813_v57 = vpop.eup %1812 }
 0x3d9   : > { %v1092_v58 = vmul.f32 %v1813_v57, %v1809_v43  ;;  %v1230_v43 = vld [vmem:[#allocation15 + $0x190] sm:$0xff]  ;;  %v1216_v57 = vld [vmem:[#allocation15 + $0x120] sm:$0xff] }
 0x3db   : > { %1676 = vmatmul.mubr.msk.f32.vlgmr.msra.gmra.mxu1 %vm1070_vm0, %v1092_v58  ;;  %1094 = vst.msk [vmem:[%s2434_s21 + $0x8] sm:$0xff] %vm1070_vm0, %v1092_v58  ;;  %v1215_v58 = vld [vmem:[#allocation15 + $0x118] sm:$0xff] }
 0x3dc   : > { %1257 = vmatpush1.msra.mxu1 %v1210_v59  ;;  %v1214_v59 = vld [vmem:[#allocation15 + $0x110] sm:$0xff] }
 0x3dd   : > { %1258 = vmatprep.subr.mxu1 %v1209_v60  ;;  %v1213_v60 = vld [vmem:[#allocation15 + $0x108] sm:$0xff] }
 0x3de   : > { %1259 = vmatpush1.msra.mxu1 %v1208_v61  ;;  %v1212_v61 = vld [vmem:[#allocation15 + $0x100] sm:$0xff] }
 0x3df   : > { %1260 = vmatprep.subr.mxu1 %v1207_v62 }
 0x3e0   : > { %1261 = vmatpush1.msra.mxu1 %v1206_v63 }
 0x3e1   : > { %1262 = vmatprep.subr.mxu1 %v1205_v0  ;;  %v1244_v0 = vld [vmem:[%s2555_s6] sm:$0x3] }
 0x3e2   : > { %1263 = vmatpush1.msra.mxu1 %v1204_v1  ;;  %v1249_v1 = vrot.slane %v1244_v0, %v2416_v9 }
 0x3e3   : > { %1264 = vmatprep.subr.mxu1 %v1203_v2  ;;  %v1253_v2 = vrot.slane %v1244_v0, %v2414_v7 }
 0x3e4   : > { %1265 = vmatpush1.msra.mxu1 %v1202_v5 }
 0x3e5   : > { %1266 = vmatprep.subr.mxu1 %v1201_v6 }
 0x3e6   : > { %1267 = vmatpush1.msra.mxu1 %v1200_v8 }
 0x3e7   : > { %1268 = vmatprep.subr.mxu1 %v1199_v10 }
 0x3e8   : > { %1269 = vmatpush1.msra.mxu1 %v1198_v11 }
 0x3e9   : > { %1270 = vmatprep.subr.mxu1 %v1197_v12 }
 0x3ea   : > { %1271 = vmatpush1.msra.mxu1 %v1196_v13 }
 0x3eb   : > { %1272 = vmatprep.subr.mxu1 %v1195_v14 }
 0x3ec   : > { %1273 = vmatpush1.msra.mxu1 %v1194_v15 }
 0x3ed   : > { %1274 = vmatprep.subr.mxu1 %v1193_v16 }
 0x3ee   : > { %1275 = vmatpush1.msra.mxu1 %v1192_v17 }
 0x3ef   : > { %1276 = vmatprep.subr.mxu1 %v1191_v18 }
 0x3f0   : > { %1277 = vmatpush1.msra.mxu1 %v1190_v19 }
 0x3f1   : > { %1278 = vmatprep.subr.mxu1 %v1189_v20 }
 0x3f2   : > { %1279 = vmatpush1.msra.mxu1 %v1188_v21 }
 0x3f3   : > { %1280 = vmatprep.subr.mxu1 %v1187_v22 }
 0x3f4   : > { %1281 = vmatpush1.msra.mxu1 %v1186_v23 }
 0x3f5   : > { %1282 = vmatprep.subr.mxu1 %v1185_v24 }
 0x3f6   : > { %1283 = vmatpush1.msra.mxu1 %v1184_v25 }
 0x3f7   : > { %1284 = vmatprep.subr.mxu1 %v1183_v26 }
 0x3f8   : > { %1285 = vmatpush1.msra.mxu1 %v1182_v27 }
 0x3f9   : > { %1286 = vmatprep.subr.mxu1 %v1181_v28 }
 0x3fa   : > { %1287 = vmatpush1.msra.mxu1 %v1180_v29 }
 0x3fb   : > { %1288 = vmatprep.subr.mxu1 %v1243_v30 }
 0x3fc   : > { %1289 = vmatpush2.msra.mxu1 %v1242_v31 }
 0x3fd   : > { %1290 = vmatprep.subr.mxu1 %v1241_v32 }
 0x3fe   : > { %1291 = vmatpush2.msra.mxu1 %v1240_v33 }
 0x3ff   : > { %1292 = vmatprep.subr.mxu1 %v1239_v34 }
 0x400   : > { %1293 = vmatpush2.msra.mxu1 %v1238_v35 }
 0x401   : > { %1294 = vmatprep.subr.mxu1 %v1237_v36 }
 0x402   : > { %1295 = vmatpush2.msra.mxu1 %v1236_v37 }
 0x403   : > { %1296 = vmatprep.subr.mxu1 %v1235_v38 }
 0x404   : > { %1297 = vmatpush2.msra.mxu1 %v1234_v39 }
 0x405   : > { %1298 = vmatprep.subr.mxu1 %v1233_v40 }
 0x406   : > { %1299 = vmatpush2.msra.mxu1 %v1232_v41 }
 0x407   : > { %1300 = vmatprep.subr.mxu1 %v1231_v42 }
 0x408   : > { %1301 = vmatpush2.msra.mxu1 %v1230_v43 }
 0x409   : > { %1302 = vmatprep.subr.mxu1 %v1229_v44 }
 0x40a   : > { %1303 = vmatpush2.msra.mxu1 %v1228_v45 }
 0x40b   : > { %1304 = vmatprep.subr.mxu1 %v1227_v46 }
 0x40c   : > { %1305 = vmatpush2.msra.mxu1 %v1226_v47 }
 0x40d   : > { %1306 = vmatprep.subr.mxu1 %v1225_v48 }
 0x40e   : > { %1307 = vmatpush2.msra.mxu1 %v1224_v49 }
 0x40f   : > { %1308 = vmatprep.subr.mxu1 %v1223_v50 }
 0x410   : > { %1309 = vmatpush2.msra.mxu1 %v1222_v51 }
 0x411   : > { %1310 = vmatprep.subr.mxu1 %v1221_v52 }
 0x412   : > { %1311 = vmatpush2.msra.mxu1 %v1220_v53 }
 0x413   : > { %1312 = vmatprep.subr.mxu1 %v1219_v54 }
 0x414   : > { %1313 = vmatpush2.msra.mxu1 %v1218_v55 }
 0x415   : > { %1314 = vmatprep.subr.mxu1 %v1217_v56 }
 0x416   : > { %1315 = vmatpush2.msra.mxu1 %v1216_v57 }
 0x417   : > { %1316 = vmatprep.subr.mxu1 %v1215_v58 }
 0x418   : > { %1317 = vmatpush2.msra.mxu1 %v1214_v59 }
 0x419   : > { %1318 = vmatprep.subr.mxu1 %v1213_v60 }
 0x41a   : > { %1319 = vmatpush2.msra.mxu1 %v1212_v61 }
 0x49b   : > { %v1677_v62 = vpop.f32.mrf.mxu1 }
 0x49c   : > { %1320 = vmatprep.mubr.f32.mxu1 %v1677_v62 }
 0x49d   : > { %v1167_v63 = vpop.f32.mrf.mxu1 }
 0x49e   : > { %1321 = vmatmul.mubr.f32.vlgmr.msra.gmra.mxu1 %v1167_v63 }
 0x55e   : > { %v1322_v5 = vpop.f32.mrf.mxu1 }
 0x55f   : > { %v1323_v6 = vadd.f32 %v1322_v5, %v1249_v1 }
 0x560   : > { %v1324_v8 = vpop.f32.mrf.mxu1 }
 0x561   : > { %v1325_v10 = vadd.f32 %v1324_v8, %v1253_v2  ;;  %v1327_v11 = vadd.f32 %v1323_v6, %v2411_v3 }
 0x563   : > { %v1328_v12 = vadd.f32 %v1325_v10, %v2406_v4 }
 0x565   : > { %v1329_v13 = vadd.f32 %v1328_v12, %v1327_v11 }
 0x567   : > { %1330 = vadd.xlane.f32.xlu0 %v1329_v13 }
 0x5f0   : > { %v1331_v14 = vpop.xlane.xlu0 %1330 }
 0x5f1   : > { %v1333_v15 = vmul.f32 0.00390625, %v1331_v14 }
 0x5f3   : > { %v1334_v16 = vsub.f32 %v1327_v11, %v1333_v15  ;;  %v1335_v17 = vsub.f32 %v1328_v12, %v1333_v15 }
 0x5f5   : > { %v1336_v18 = vmul.f32 %v1334_v16, %v1334_v16  ;;  %v1337_v19 = vmul.f32 %v1335_v17, %v1335_v17 }
 0x5f7   : > { %v1338_v20 = vadd.f32 %v1337_v19, %v1336_v18 }
 0x5f9   : > { %1339 = vadd.xlane.f32.xlu1 %v1338_v20 }
 0x5fa   : > { %1991 = shalt.err (!%p1988_p8)
}
 0x5fb   : > { %s1992_s4 = scalar_lea.hbm %s2458_s28, 256  ;;  %s1996_s3 = scalar_lea.hbm %s2618_s9, 1024 }
 0x5fc   : > { %p1993_p7 = scmp.ne.s32.totalorder %s2458_s28, %s1992_s4  ;;  %p1997_p1 = scmp.lt.s32.totalorder %s2458_s28, %s2618_s9 }
 0x5fd   : > { %p1998_p11 = scmp.lt.s32.totalorder %s1996_s3, %s1992_s4 }
 0x5fe   : > { %p1994_p10 = pnand %p1993_p7, %p2619_p12 }
 0x5ff   : > { %p1999_p5 = por %p1998_p11, %p1997_p1 }
 0x600   : > { %p1995_p0 = pneg %p1994_p10 }
 0x602   : > { %p2000_p2 = pnand %p1999_p5, %p1995_p0 }
 0x604   : > { %2003 = shalt.err (!%p2000_p2)
}
 0x605   : > { %s2127_s26 = smov 128   ;;  %s2128_s1 = smov 8  }
 0x606   : > { %1697 = dma.vmem_to_hbm [thread:$0]  (%p2619_p12), %s2461_s10, 256, %s2458_s28, %s1382_s11, %s2127_s26, %s2127_s26, %s2128_s1  }
 0x607   : > { %s2620_s29 = sld [smem:[#allocation37_spill]]  ;;  %s522_s28 = scalar_lea.vmem [#allocation17], %s2377_s27 }
 0x608   : > { %s2621_s7 = sld [smem:[#allocation38_spill]]  ;;  %s1398_s10 = sshll.u32 %s522_s28, 4  ;;  %s1399_s10 = int_to_ptr.vmem [resolvable:$true] %s1398_s10 }
 0x609   : > { %s2622_s4 = sld [smem:[#allocation39_spill]]  ;;  %s1377_s25 = scalar_lea.sflag [#allocation8], %s2374_s12 }
 0x60a   : > { %s2004_s3 = scalar_lea.vmem %s1399_s10, 256  ;;  %s2129_s27 = smov [#allocation17]  }
 0x60b   : > { %p2005_p9 = scmp.ne.s32.totalorder %s1399_s10, %s2004_s3  ;;  %s2008_s21 = sshll.u32 %s2129_s27, 4  ;;  %s2009_s21 = int_to_ptr.vmem [resolvable:$false] %s2008_s21 }
 0x60c   : > { %s2010_s23 = scalar_lea.vmem %s2009_s21, 512  ;;  %p2011_p4 = scmp.lt.s32.totalorder %s1399_s10, %s2009_s21 }
 0x60d   : > { %v1346_v22 = vld [vmem:[%s2620_s29] sm:$0x3]  ;;  %p2006_p13 = pnand %p2005_p9, %p2619_p12  ;;  %p2012_p6 = scmp.lt.s32.totalorder %s2010_s23, %s2004_s3 }
 0x60e   : > { %v1360_v23 = vld [vmem:[%s2621_s7] sm:$0x3]  ;;  %v1351_v24 = vrot.slane %v1346_v22, %v2416_v9  ;;  %v1355_v25 = vrot.slane %v1346_v22, %v2414_v7 }
 0x60f   : > { %v1365_v29 = vrot.slane %v1360_v23, %v2416_v9  ;;  %v1369_v30 = vrot.slane %v1360_v23, %v2414_v7  ;;  %s2502_s8 = scalar_lea.hbm %s2622_s4, %s1650_s22  ;;  %p2007_p3 = pneg %p2006_p13 }
 0x610   : > { %p2013_p8 = por %p2012_p6, %p2011_p4 }
 0x612   : > { %p2014_p7 = pnand %p2013_p8, %p2007_p3 }
 0x682   : > { %v1340_v4 = vpop.xlane.xlu1 %1339 }
 0x683   : > { %v1341_v3 = vmul.f32 0.00390625, %v1340_v4 }
 0x685   : > { %v1342_v21 = vadd.f32 1e-05, %v1341_v3 }
 0x687   : > { %1814 = vrsqrt.f32 %v1342_v21 }
 0x694   : > { %v1815_v26 = vpop.eup %1814 }
 0x695   : > { %v1344_v27 = vmul.f32 %v1815_v26, %v1334_v16  ;;  %v1345_v28 = vmul.f32 %v1815_v26, %v1335_v17 }
 0x697   : > { %v1358_v31 = vmul.f32 %v1351_v24, %v1344_v27  ;;  %v1359_v32 = vmul.f32 %v1355_v25, %v1345_v28 }
 0x699   : > { %v1372_v33 = vadd.f32 %v1365_v29, %v1358_v31  ;;  %v1373_v34 = vadd.f32 %v1369_v30, %v1359_v32 }
 0x69b   : > { %1374 = vst [vmem:[%s522_s28] sm:$0xff] %v1372_v33  ;;  %1375 = vst [vmem:[%s522_s28 + $0x8] sm:$0xff] %v1373_v34 }
 0x69c   : > { %2017 = shalt.err (!%p2014_p7)
}
 0x69d   : > { %s2018_s19 = scalar_lea.hbm %s2502_s8, 256  ;;  %s2022_s26 = scalar_lea.hbm %s2622_s4, 1024 }
 0x69e   : > { %p2019_p10 = scmp.ne.s32.totalorder %s2502_s8, %s2018_s19  ;;  %p2023_p11 = scmp.lt.s32.totalorder %s2502_s8, %s2622_s4 }
 0x69f   : > { %p2024_p5 = scmp.lt.s32.totalorder %s2022_s26, %s2018_s19 }
 0x6a0   : > { %p2020_p0 = pnand %p2019_p10, %p2619_p12 }
 0x6a1   : > { %p2025_p2 = por %p2024_p5, %p2023_p11 }
 0x6a2   : > { %p2021_p1 = pneg %p2020_p0 }
 0x6a4   : > { %p2026_p9 = pnand %p2025_p2, %p2021_p1 }
 0x6a6   : > { %2029 = shalt.err (!%p2026_p9)
}
 0x6a7   : > { %1696 = dma.vmem_to_hbm [thread:$0]  (%p2619_p12), %s1399_s10, 256, %s2502_s8, %s1377_s25  }
 0x6a8 PF: > { %s2623_s18 = sld [smem:[#allocation26_spill]]  ;;  %p1734_p13 = scmp.ge.s32.totalorder %s2116_s20, 2 }
 0x6a9   : > { %s2624_s29 = sld [smem:[#allocation29_spill]] }
 0x6ae   : > { %s1428_s16 = sand.u32 1, %s2623_s18  }
 0x6af   : > { %p2625_p3 = scmp.ne.s32.totalorder %s2624_s29, 0  ;;  %s1429_s17 = scalar_lea.sflag [#allocation8], %s1428_s16 }
 0x6b1   : > { %p1721_p4 = pnand %p1734_p13, %p2625_p3 }
 0x6b3   : > { %p1722_p6 = pneg %p1721_p4 }
 0x6b5   : > { %2079 = dma.done.wait (%p1722_p6), %s1429_s17, 256  }
 0x6b6   : > { %2081 = vsyncadd (%p1722_p6), %s1429_s17, 4294967040  ;;  %s1438_s7 = scalar_lea.sflag [#allocation19], %s1428_s16 }
 0x6b7   : > { %2083 = dma.done.wait (%p1722_p6), %s1438_s7, 256  }
 0x6b8   : > { %2085 = vsyncadd (%p1722_p6), %s1438_s7, 4294967040  ;;  %s35_s20 = sadd.s32 1, %s2116_s20   ;;  %s2626_s28 = sld [smem:[#allocation33_spill]] }
 0x6b9   : > { %p32_p8 = scmp.ge.s32.totalorder %s35_s20, 6   ;;  %s2627_s16 = sld [smem:[#allocation27_spill]] }
 0x6ba   : > { %s2628_s17 = sld [smem:[#allocation28_spill]]  ;;  %s2631_s13 = smov %s2092_s14 }
 0x6bb   : > { %s2629_s18 = sld [smem:[#allocation30_spill]]  ;;  %s2632_s14 = smov %s2096_s15 }
 0x6bc   : > { %s2630_s19 = sld [smem:[#allocation32_spill]]  ;;  %34 = sbr.rel (!%p32_p8) target bundleno = 21 (0x15), region = 158 }
 0x6be   : > { %s2633_s15 = smov %s2626_s28 }
 0x6c1   :  { %1443 = vsyncpa [#allocation7], 1 }
 0x6c2   :  { %1445 = vsyncpa [#allocation7 + $0x1], 1 }
 0x6c3   :  { %1446 = vsyncpa [#allocation10], 1 }
 0x6c4   :  { %1448 = vsyncpa [#allocation10 + $0x1], 1 }
 0x6c5   :  { %1449 = vsyncpa [#allocation13], 1 }
 0x6c6   :  { %1450 = vsyncpa [#allocation16], 1 }
 0x6c7   :  { %1451 = vsyncpa [#allocation8], 1 }
 0x6c8   :  { %1453 = vsyncpa [#allocation8 + $0x1], 1 }
 0x6c9   :  { %1454 = vsyncpa [#allocation19], 1 }
 0x6ca   :  { %1456 = vsyncpa [#allocation19 + $0x1], 1 }

// kernel: tpu_custom_call.1
= control target key start
LH: loop header
LB: loop body
LE: loop exit
PB: predicated region body
PF: predicated region fallthrough
CT: control target
= control target key end

     0   :  { %s2549_s0 = inlined_call_operand.hbm [shape: f32[2,16,256], index: 0, kind: input, shape index: {}]   ;;  %s2550_s1 = inlined_call_operand.hbm [shape: f32[2,16,256], index: 1, kind: input, shape index: {}]   ;;  %s2551_s2 = inlined_call_operand.hbm [shape: f32[2,16,256], index: 2, kind: input, shape index: {}]   ;;  %s2552_s3 = inlined_call_operand.hbm [shape: f32[3,256,256], index: 3, kind: input, shape index: {}]   ;;  %s2553_s4 = inlined_call_operand.hbm [shape: f32[3,256], index: 4, kind: input, shape index: {}]   ;;  %s2554_s5 = inlined_call_operand.hbm [shape: f32[256,256], index: 5, kind: input, shape index: {}]   ;;  %s2555_s6 = inlined_call_operand.vmem [shape: f32[1,256], index: 6, kind: input, shape index: {}]   ;;  %s2556_s7 = inlined_call_operand.vmem [shape: f32[1,256], index: 7, kind: input, shape index: {}]   ;;  %s2557_s8 = inlined_call_operand.vmem [shape: f32[1,256], index: 8, kind: input, shape index: {}]   ;;  %s2558_s9 = inlined_call_operand.hbm [shape: f32[2,16,256], index: 9, kind: output, shape index: {0}]   ;;  %s2559_s10 = inlined_call_operand.hbm [shape: f32[2,2,16,16], index: 10, kind: output, shape index: {1}]  }
   0x1   :  { %2579 = sst [smem:[#allocation34_spill]] %s2550_s1 }
   0x2   :  { %2580 = sst [smem:[#allocation35_spill]] %s2552_s3 }
   0x3   :  { %2581 = sst [smem:[#allocation36_spill]] %s2553_s4 }
   0x4   :  { %2582 = sst [smem:[#allocation37_spill]] %s2556_s7 }
   0x5   :  { %2583 = sst [smem:[#allocation38_spill]] %s2557_s8 }
   0x6   :  { %2584 = sst [smem:[#allocation39_spill]] %s2558_s9 }
   0x7   :  { %2585 = sst [smem:[#allocation40_spill]] %s2559_s10 }
   0x8   :  { %16 = vsyncpa [#allocation7], 0 }
   0x9   :  { %18 = vsyncpa [#allocation7 + $0x1], 0 }
   0xa   :  { %19 = vsyncpa [#allocation10], 0 }
   0xb   :  { %21 = vsyncpa [#allocation10 + $0x1], 0 }
   0xc   :  { %22 = vsyncpa [#allocation13], 0 }
   0xd   :  { %23 = vsyncpa [#allocation16], 0 }
   0xe   :  { %24 = vsyncpa [#allocation8], 0 }
   0xf   :  { %26 = vsyncpa [#allocation8 + $0x1], 0 }
  0x10   :  { %27 = vsyncpa [#allocation19], 0 }
  0x11   :  { %29 = vsyncpa [#allocation19 + $0x1], 0  ;;  %s2185_s13 = smov 0   ;;  %s2187_s14 = smov 0  }
  0x12   :  { %s2189_s15 = smov 0   ;;  %s2191_s16 = smov 0  }
  0x13   :  { %s2193_s17 = smov 0   ;;  %s2195_s18 = smov 0  }
  0x14   :  { %s2197_s19 = smov 0   ;;  %s2199_s20 = smov 0  }
  0x15 LB: > { %2586 = sst [smem:[#allocation26_spill]] %s2088_s13  ;;  %s2226_s21 = sadd.s32 4294967295, %s2116_s20   ;;  %s2116_s20 = sphi %s2199_s20, %s35_s20   ;;  %s2112_s19 = sphi %s2197_s19, %s2630_s19   ;;  %s2108_s18 = sphi %s2195_s18, %s2629_s18   ;;  %s2104_s17 = sphi %s2193_s17, %s2628_s17   ;;  %s2100_s16 = sphi %s2191_s16, %s2627_s16   ;;  %s2096_s15 = sphi %s2189_s15, %s2633_s15   ;;  %s2092_s14 = sphi %s2187_s14, %s2632_s14   ;;  %s2088_s13 = sphi %s2185_s13, %s2631_s13  }
  0x16   : > { %2587 = sst [smem:[#allocation27_spill]] %s2108_s18  ;;  %s1617_s22 = sadd.s32 4294967294, %s2116_s20  }
  0x17   : > { %2588 = sst [smem:[#allocation28_spill]] %s2112_s19  ;;  %p69_p0 = scmp.ne.s32.totalorder %s2092_s14, %s2088_s13 }
  0x18   : > { %p2572_p1 = scmp.eq.s32.totalorder %s2226_s21, 0  ;;  %p283_p3 = scmp.eq.s32.totalorder %s1617_s22, 3 }
  0x19   : > { %p1618_p5 = scmp.ge.s32.totalorder %s2116_s20, 1  ;;  %p318_p7 = scmp.lt.s32.totalorder %s2116_s20, 5 }
  0x1a   : > { %p2235_p4 = por %p2572_p1, %p69_p0  ;;  %p2240_p6 = por %p283_p3, %p69_p0 }
  0x1b   : > { %p2245_p8 = pnand %p1618_p5, %p318_p7  ;;  %s2118_s26 = smov [#allocation12]  }
  0x1c   : > { %s2589_s23 = scalar_select %p2235_p4, 1, 0 }
  0x1d   : > { %s2590_s24 = scalar_select %p2240_p6, 1, 0 }
  0x1e   : > { %s2592_s25 = scalar_select %p2245_p8, 1, 0 }
  0x1f   : > { %2591 = sst [smem:[#allocation29_spill]] %s2590_s24  ;;  %s330_s27 = sshll.u32 %s2118_s26, 4  ;;  %s331_s27 = int_to_ptr.vmem [resolvable:$true] %s330_s27 }
  0x20   : > { %p1700_p9 = pneg %p2245_p8  ;;  %s1827_s29 = scalar_lea.vmem %s331_s27, 24576 }
  0x21   : > { %p1828_p12 = scmp.ne.s32.totalorder %s331_s27, %s1827_s29  ;;  %p1835_p3 = scmp.lt.s32.totalorder %s331_s27, %s331_s27 }
  0x22   : > { %p2253_p10 = pnand %p1700_p9, %p2572_p1  ;;  %p1836_p5 = scmp.lt.s32.totalorder %s1827_s29, %s1827_s29 }
  0x24   : > { %p2573_p11 = pneg %p2253_p10  ;;  %p1837_p7 = por %p1836_p5, %p1835_p3 }
  0x26   : > { %p1830_p13 = pnand %p1828_p12, %p2573_p11 }
  0x28   : > { %p1831_p0 = pneg %p1830_p13 }
  0x2a   : > { %p1838_p2 = pnand %p1837_p7, %p1831_p0 }
  0x2c   : > { %1841 = shalt.err (!%p1838_p2)
}
  0x2d   : > { %s2562_s30 = smov 256   ;;  %s2563_s11 = smov 16  }
  0x2e   : > { %s2594_s3 = sld [smem:[#allocation35_spill]]  ;;  %s44_s26 = sadd.s32 1, %s2108_s18 }
  0x2f   : > { %p45_p2 = scmp.ge.s32.totalorder %s44_s26, 2  ;;  %s47_s29 = sadd.s32 1, %s2112_s19 }
  0x30   : > { %s56_s24 = sadd.s32 1, %s2096_s15  ;;  %p63_p9 = scmp.ne.s32.totalorder %s2096_s15, %s2092_s14 }
  0x31   : > { %s2635_s26 = smov (%p45_p2, %s44_s26), 0  ;;  %s2637_s29 = smov (!%p45_p2, %s47_s29), %s2112_s19 }
  0x32   : > { %2595 = sst [smem:[#allocation30_spill]] %s2635_s26  ;;  %s52_s13 = ssub.s32 %s2108_s18, %s2635_s26 }
  0x33   : > { %p64_p12 = scmp.eq.s32.totalorder %s2116_s20, 0  ;;  %p49_p13 = scmp.ge.s32.totalorder %s2637_s29, 2 }
  0x34   : > { %1703 = dma.hbm_to_vmem [thread:$0]  (!%p2253_p10), %s2594_s3, 24576, %s331_s27, [#allocation13], %s2562_s30, %s2562_s30, %s2563_s11  }
  0x35   : > { %p2596_p0 = scmp.eq.s32.totalorder %s2226_s21, 3  ;;  %p65_p5 = por %p64_p12, %p63_p9 }
  0x36   : > { %p1730_p7 = scmp.lt.s32.totalorder %s2116_s20, 4  ;;  %s2639_s29 = smov (%p49_p13, %s2637_s29), 0 }
  0x37   : > { %p2283_p3 = por %p2596_p0, %p63_p9  ;;  %2599 = sst [smem:[#allocation32_spill]] %s2639_s29 }
  0x38   : > { %s2569_s12 = sand.u32 1, %s2096_s15   ;;  %s1624_s22 = sshll.u32 %s2108_s18, 1 }
  0x39   : > { %s2597_s27 = scalar_select %p2283_p3, 1, 0 }
  0x3a   : > { %s51_s30 = ssub.s32 %s2112_s19, %s2639_s29  ;;  %s2296_s11 = sshll.u32 %s2569_s12, 4 }
  0x3b   : > { %2598 = sst [smem:[#allocation31_spill]] %s2597_s27  ;;  %s53_s3 = sor.u32 %s52_s13, %s51_s30 }
  0x3c   : > { %s1625_s26 = sshll.u32 %s2112_s19, 2  ;;  %p54_p2 = scmp.eq.s32.totalorder %s53_s3, 0 }
  0x3d   : > { %s387_s9 = sadd.s32 %s1625_s26, %s1624_s22  ;;  %p2301_p0 = pnand %p1730_p7, %p65_p5 }
  0x3e   : > { %s2299_s8 = sshll.u32 %s387_s9, 7  ;;  %s398_s29 = sand.u32 1, %s2116_s20  }
  0x3f   : > { %s2306_s10 = scalar_select %p54_p2, %s2096_s15, %s56_s24  }
  0x40   : > { %s2602_s1 = sld [smem:[#allocation34_spill]]  ;;  %s402_s13 = scalar_lea.vmem [#allocation9], %s2296_s11 }
  0x41   : > { %2601 = sst [smem:[#allocation33_spill]] %s2306_s10  ;;  %s412_s30 = sshll.u32 %s402_s13, 4  ;;  %s413_s30 = int_to_ptr.vmem [resolvable:$true] %s412_s30 }
  0x42   : > { %s2314_s3 = scalar_lea.sflag [#allocation10], %s398_s29  ;;  %p2574_p9 = pneg %p2301_p0 }
  0x43   : > { %s1855_s9 = scalar_lea.vmem %s413_s30, 256  ;;  %s2121_s24 = smov [#allocation9]  }
  0x44   : > { %p1856_p12 = scmp.ne.s32.totalorder %s413_s30, %s1855_s9  ;;  %s1860_s26 = sshll.u32 %s2121_s24, 4  ;;  %s1861_s26 = int_to_ptr.vmem [resolvable:$false] %s1860_s26 }
  0x45   : > { %s1862_s22 = scalar_lea.vmem %s1861_s26, 512  ;;  %p1863_p7 = scmp.lt.s32.totalorder %s413_s30, %s1861_s26 }
  0x46   : > { %s410_s27 = scalar_lea.hbm %s2602_s1, %s2299_s8  ;;  %p1858_p13 = pnand %p1856_p12, %p2574_p9 }
  0x47   : > { %p1864_p2 = scmp.lt.s32.totalorder %s1862_s22, %s1855_s9 }
  0x48   : > { %p1859_p5 = pneg %p1858_p13 }
  0x49   : > { %p1865_p1 = por %p1864_p2, %p1863_p7 }
  0x4b   : > { %p1866_p11 = pnand %p1865_p1, %p1859_p5 }
  0x4d   : > { %1869 = shalt.err (!%p1866_p11)
}
  0x4e   : > { %1716 = dma.hbm_to_vmem [thread:$0]  (!%p2301_p0), %s410_s27, 256, %s413_s30, %s2314_s3  }
  0x4f   : > { %s2122_s18 = smov [#allocation14]   ;;  %s2123_s12 = smov [#allocation15]  }
  0x50   : > { %s344_s29 = sshll.u32 %s2122_s18, 4  ;;  %s354_s13 = sshll.u32 %s2123_s12, 4  ;;  %s345_s29 = int_to_ptr.vmem [resolvable:$true] %s344_s29  ;;  %s355_s13 = int_to_ptr.vmem [resolvable:$true] %s354_s13 }
  0x51   : > { %s1881_s1 = scalar_lea.vmem %s345_s29, 128  ;;  %p2603_p13 = pneg %p2253_p10 }
  0x52   : > { %p1882_p12 = scmp.ne.s32.totalorder %s345_s29, %s1881_s1  ;;  %p1889_p3 = scmp.lt.s32.totalorder %s345_s29, %s345_s29 }
  0x53   : > { %p1890_p7 = scmp.lt.s32.totalorder %s1881_s1, %s1881_s1 }
  0x54   : > { %p1884_p9 = pnand %p1882_p12, %p2603_p13 }
  0x55   : > { %p1891_p1 = por %p1890_p7, %p1889_p3 }
  0x56   : > { %p1885_p6 = pneg %p1884_p9 }
  0x58   : > { %p1892_p11 = pnand %p1891_p1, %p1885_p6 }
  0x5a   : > { %1895 = shalt.err (!%p1892_p11)
}
  0x5b   : > { %s2604_s4 = sld [smem:[#allocation36_spill]]  ;;  %s1907_s30 = scalar_lea.vmem %s355_s13, 8192 }
  0x5c   : > { %p1908_p5 = scmp.ne.s32.totalorder %s355_s13, %s1907_s30  ;;  %p2605_p2 = pmov %p2603_p13 }
  0x5d   : > { %p1915_p9 = scmp.lt.s32.totalorder %s355_s13, %s355_s13  ;;  %p1916_p13 = scmp.lt.s32.totalorder %s1907_s30, %s1907_s30 }
  0x5e   : > { %p1910_p4 = pnand %p1908_p5, %p2605_p2 }
  0x5f   : > { %p1917_p8 = por %p1916_p13, %p1915_p9 }
  0x60   : > { %p1911_p12 = pneg %p1910_p4 }
  0x61   : > { %1706 = dma.hbm_to_vmem [thread:$0]  (!%p2253_p10), %s2604_s4, 128, %s345_s29, [#allocation13]  }
  0x62   : > { %p1918_p3 = pnand %p1917_p8, %p1911_p12 }
  0x64   : > { %1921 = shalt.err (!%p1918_p3)
}
  0x65   : > { %s2606_s1 = smov 16   ;;  %s2607_s24 = smov 256  }
  0x66   : > { %1709 = dma.hbm_to_vmem [thread:$0]  (!%p2253_p10), %s2554_s5, 8192, %s355_s13, [#allocation16], %s2607_s24, %s2607_s24, %s2606_s1  }
  0x67   : > { %s389_s12 = scalar_lea.hbm %s2549_s0, %s2299_s8  ;;  %s381_s9 = scalar_lea.vmem [#allocation6], %s2296_s11 }
  0x68   : > { %s391_s27 = sshll.u32 %s381_s9, 4  ;;  %s431_s4 = scalar_lea.hbm %s2551_s2, %s2299_s8  ;;  %s392_s27 = int_to_ptr.vmem [resolvable:$true] %s391_s27 }
  0x69   : > { %s2608_s19 = sand.u32 1, %s2096_s15   ;;  %s1935_s26 = scalar_lea.vmem %s392_s27, 256 }
  0x6a   : > { %s378_s10 = scalar_lea.sflag [#allocation7], %s2608_s19  ;;  %p1936_p4 = scmp.ne.s32.totalorder %s392_s27, %s1935_s26 }
  0x6b   : > { %p2609_p6 = pneg %p2301_p0  ;;  %s2124_s13 = smov [#allocation6]  }
  0x6c   : > { %s1940_s1 = sshll.u32 %s2124_s13, 4  ;;  %s1941_s1 = int_to_ptr.vmem [resolvable:$false] %s1940_s1 }
  0x6d   : > { %p1938_p8 = pnand %p1936_p4, %p2609_p6  ;;  %s1942_s24 = scalar_lea.vmem %s1941_s1, 512 }
  0x6e   : > { %p1943_p10 = scmp.lt.s32.totalorder %s392_s27, %s1941_s1  ;;  %p1944_p1 = scmp.lt.s32.totalorder %s1942_s24, %s1935_s26 }
  0x6f   : > { %p1939_p7 = pneg %p1938_p8 }
  0x70   : > { %p1945_p11 = por %p1944_p1, %p1943_p10 }
  0x72   : > { %p1946_p5 = pnand %p1945_p11, %p1939_p7 }
  0x74   : > { %1949 = shalt.err (!%p1946_p5)
}
  0x75   : > { %1713 = dma.hbm_to_vmem [thread:$0]  (!%p2301_p0), %s389_s12, 256, %s392_s27, %s378_s10  }
  0x76   : > { %s423_s19 = scalar_lea.vmem [#allocation11], %s2296_s11  ;;  %p2610_p12 = pmov %p2609_p6 }
  0x77   : > { %s433_s22 = sshll.u32 %s423_s19, 4  ;;  %s2125_s29 = smov [#allocation11]   ;;  %s434_s22 = int_to_ptr.vmem [resolvable:$true] %s433_s22 }
  0x78   : > { %s1963_s18 = scalar_lea.vmem %s434_s22, 256  ;;  %s1968_s9 = sshll.u32 %s2125_s29, 4  ;;  %s1969_s9 = int_to_ptr.vmem [resolvable:$false] %s1968_s9 }
  0x79   : > { %p1964_p2 = scmp.ne.s32.totalorder %s434_s22, %s1963_s18  ;;  %s1970_s28 = scalar_lea.vmem %s1969_s9, 512 }
  0x7a   : > { %p1971_p3 = scmp.lt.s32.totalorder %s434_s22, %s1969_s9  ;;  %p1972_p4 = scmp.lt.s32.totalorder %s1970_s28, %s1963_s18 }
  0x7b   : > { %p1966_p9 = pnand %p1964_p2, %p2610_p12 }
  0x7c   : > { %p1973_p6 = por %p1972_p4, %p1971_p3 }
  0x7d   : > { %p1967_p13 = pneg %p1966_p9 }
  0x7f   : > { %p1974_p8 = pnand %p1973_p6, %p1967_p13 }
  0x81   : > { %1977 = shalt.err (!%p1974_p8)
}
  0x82   : > { %1719 = dma.hbm_to_vmem [thread:$0]  (!%p2301_p0), %s431_s4, 256, %s434_s22, %s2314_s3  }
  0x83   : > { %p2611_p7 = scmp.ne.s32.totalorder %s2592_s25, 0 }
  0x84   : > { %s2374_s12 = sand.u32 (!%p2611_p7), 1, %s2092_s14   ;;  %p2612_p10 = scmp.ne.s32.totalorder (!%p2611_p7), %s2589_s23, 0 }
  0x85   : > { %442 = sbr.rel (%p2611_p7) target bundleno = 1704 (0x6a8), region = 56  ;;  %s2377_s27 = sshll.u32 (!%p2611_p7), %s2374_s12, 4 }
  0x86   : > { %s445_s7 = scalar_lea.sflag (!%p2611_p7), [#allocation7], %s2374_s12  ;;  %s448_s30 = scalar_lea.vmem (!%p2611_p7), [#allocation6], %s2377_s27 }
  0x8a   : > { %2063 = dma.done.wait (%p2612_p10), %s445_s7, 256  }
  0x8b   : > { %2065 = vsyncadd (%p2612_p10), %s445_s7, 4294967040  ;;  %s453_s4 = sand.u32 1, %s2226_s21   ;;  %s457_s25 = scalar_lea.vmem [#allocation9], %s2377_s27 }
  0x8c   : > { %s454_s8 = scalar_lea.sflag [#allocation10], %s453_s4 }
  0x8d   : > { %2067 = dma.done.wait (%p2612_p10), %s454_s8, 512  }
  0x8e   : > { %2069 = vsyncadd (%p2612_p10), %s454_s8, 4294966784  ;;  %s466_s3 = scalar_lea.vmem [#allocation11], %s2377_s27  ;;  %p2613_p0 = scmp.eq.s32.totalorder %s2226_s21, 0 }
  0x90   : > { %2071 = dma.done.wait (%p2613_p0), [#allocation13], 24704   ;;  %p2614_p1 = pmov %p2613_p0 }
  0x91   : > { %p2615_p11 = pmov %p2613_p0 }
  0x92   : > { %2073 = vsyncadd (%p2614_p1), [#allocation13], 4294942592 }
  0x93   : > { %2075 = dma.done.wait (%p2615_p11), [#allocation16], 8192   ;;  %p2616_p5 = pmov %p2613_p0 }
  0x94   : > { %v567_v0 = vld [vmem:[#allocation12 + $0xf8] sm:$0xff]  ;;  %v566_v1 = vld [vmem:[#allocation12 + $0xf0] sm:$0xff]  ;;  %v565_v2 = vld [vmem:[#allocation12 + $0xe8] sm:$0xff]  ;;  %vm1070_vm0 = vcmask 130048   ;;  %s2434_s21 = scalar_lea.vmem [#allocation18], %s2377_s27  ;;  %s2617_s13 = sld [smem:[#allocation31_spill]] }
  0x95   : > { %2077 = vsyncadd (%p2616_p5), [#allocation16], 4294959104  ;;  %612 = vmatprep.subr.mxu0 %v567_v0  ;;  %v564_v3 = vld [vmem:[#allocation12 + $0xe0] sm:$0xff]  ;;  %v563_v4 = vld [vmem:[#allocation12 + $0xd8] sm:$0xff]  ;;  %s1648_s1 = sshll.u32 %s2100_s16, 1  ;;  %s1649_s24 = sshll.u32 %s2104_s17, 2 }
  0x96   : > { %613 = vmatpush1.msra.mxu0 %v566_v1  ;;  %v562_v5 = vld [vmem:[#allocation12 + $0xd0] sm:$0xff]  ;;  %v561_v6 = vld [vmem:[#allocation12 + $0xc8] sm:$0xff]  ;;  %v560_v7 = vld [vmem:[#allocation12 + $0xc0] sm:$0xff]  ;;  %s2450_s19 = sadd.s32 %s1649_s24, %s1648_s1  ;;  %s2618_s9 = sld [smem:[#allocation40_spill]] }
  0x97   : > { %614 = vmatprep.subr.mxu0 %v565_v2  ;;  %v559_v8 = vld [vmem:[#allocation12 + $0xb8] sm:$0xff]  ;;  %v558_v9 = vld [vmem:[#allocation12 + $0xb0] sm:$0xff]  ;;  %v557_v10 = vld [vmem:[#allocation12 + $0xa8] sm:$0xff]  ;;  %s1650_s22 = sshll.u32 %s2450_s19, 7  ;;  %s1413_s10 = sshll.u32 %s2434_s21, 4  ;;  %s2461_s10 = int_to_ptr.vmem [resolvable:$true] %s1413_s10 }
  0x98   : > { %615 = vmatpush1.msra.mxu0 %v564_v3  ;;  %v556_v11 = vld [vmem:[#allocation12 + $0xa0] sm:$0xff]  ;;  %v555_v12 = vld [vmem:[#allocation12 + $0x98] sm:$0xff]  ;;  %v554_v13 = vld [vmem:[#allocation12 + $0x90] sm:$0xff]  ;;  %s1382_s11 = scalar_lea.sflag [#allocation19], %s2374_s12  ;;  %s1978_s16 = scalar_lea.vmem %s2461_s10, 256 }
  0x99   : > { %616 = vmatprep.subr.mxu0 %v563_v4  ;;  %v553_v14 = vld [vmem:[#allocation12 + $0x88] sm:$0xff]  ;;  %v552_v15 = vld [vmem:[#allocation12 + $0x80] sm:$0xff]  ;;  %v551_v16 = vld [vmem:[#allocation12 + $0x78] sm:$0xff]  ;;  %p1979_p2 = scmp.ne.s32.totalorder %s2461_s10, %s1978_s16  ;;  %s2126_s17 = smov [#allocation18]  }
  0x9a   : > { %617 = vmatpush1.msra.mxu0 %v562_v5  ;;  %v550_v17 = vld [vmem:[#allocation12 + $0x70] sm:$0xff]  ;;  %v549_v18 = vld [vmem:[#allocation12 + $0x68] sm:$0xff]  ;;  %v548_v19 = vld [vmem:[#allocation12 + $0x60] sm:$0xff]  ;;  %p2619_p12 = scmp.ne.s32.totalorder %s2617_s13, 0  ;;  %s1982_s7 = sshll.u32 %s2126_s17, 4  ;;  %s1983_s7 = int_to_ptr.vmem [resolvable:$false] %s1982_s7 }
  0x9b   : > { %618 = vmatprep.subr.mxu0 %v561_v6  ;;  %v547_v20 = vld [vmem:[#allocation12 + $0x58] sm:$0xff]  ;;  %v546_v21 = vld [vmem:[#allocation12 + $0x50] sm:$0xff]  ;;  %v545_v22 = vld [vmem:[#allocation12 + $0x48] sm:$0xff]  ;;  %p1985_p3 = scmp.lt.s32.totalorder %s2461_s10, %s1983_s7 }
  0x9c   : > { %619 = vmatpush1.msra.mxu0 %v560_v7  ;;  %v544_v23 = vld [vmem:[#allocation12 + $0x40] sm:$0xff]  ;;  %v531_v24 = vld [vmem:[%s448_s30 + $0x8] sm:$0xff]  ;;  %v542_v26 = vld [vmem:[#allocation12 + $0x30] sm:$0xff]  ;;  %s2458_s28 = scalar_lea.hbm %s2618_s9, %s1650_s22  ;;  %p1980_p9 = pnand %p1979_p2, %p2619_p12 }
  0x9d   : > { %620 = vmatprep.subr.mxu0 %v559_v8  ;;  %v543_v25 = vld [vmem:[#allocation12 + $0x38] sm:$0xff]  ;;  %676 = vmatprep.mubr.f32.mxu0 %v531_v24  ;;  %v541_v27 = vld [vmem:[#allocation12 + $0x28] sm:$0xff]  ;;  %v540_v28 = vld [vmem:[#allocation12 + $0x20] sm:$0xff] }
  0x9e   : > { %621 = vmatpush1.msra.mxu0 %v558_v9  ;;  %v539_v29 = vld [vmem:[#allocation12 + $0x18] sm:$0xff]  ;;  %v538_v30 = vld [vmem:[#allocation12 + $0x10] sm:$0xff]  ;;  %v537_v31 = vld [vmem:[#allocation12 + $0x8] sm:$0xff]  ;;  %p1981_p13 = pneg %p1980_p9 }
  0x9f   : > { %622 = vmatprep.subr.mxu0 %v557_v10  ;;  %v536_v32 = vld [vmem:[#allocation12] sm:$0xff]  ;;  %v599_v33 = vld [vmem:[#allocation12 + $0x1f8] sm:$0xff]  ;;  %v598_v34 = vld [vmem:[#allocation12 + $0x1f0] sm:$0xff] }
  0xa0   : > { %623 = vmatpush1.msra.mxu0 %v556_v11  ;;  %v597_v35 = vld [vmem:[#allocation12 + $0x1e8] sm:$0xff]  ;;  %v596_v36 = vld [vmem:[#allocation12 + $0x1e0] sm:$0xff]  ;;  %v595_v37 = vld [vmem:[#allocation12 + $0x1d8] sm:$0xff] }
  0xa1   : > { %624 = vmatprep.subr.mxu0 %v555_v12  ;;  %v594_v38 = vld [vmem:[#allocation12 + $0x1d0] sm:$0xff]  ;;  %v593_v39 = vld [vmem:[#allocation12 + $0x1c8] sm:$0xff]  ;;  %v592_v40 = vld [vmem:[#allocation12 + $0x1c0] sm:$0xff] }
  0xa2   : > { %625 = vmatpush1.msra.mxu0 %v554_v13  ;;  %v591_v41 = vld [vmem:[#allocation12 + $0x1b8] sm:$0xff]  ;;  %v590_v42 = vld [vmem:[#allocation12 + $0x1b0] sm:$0xff]  ;;  %v589_v43 = vld [vmem:[#allocation12 + $0x1a8] sm:$0xff] }
  0xa3   : > { %626 = vmatprep.subr.mxu0 %v553_v14  ;;  %v588_v44 = vld [vmem:[#allocation12 + $0x1a0] sm:$0xff]  ;;  %v587_v45 = vld [vmem:[#allocation12 + $0x198] sm:$0xff]  ;;  %v586_v46 = vld [vmem:[#allocation12 + $0x190] sm:$0xff] }
  0xa4   : > { %627 = vmatpush1.msra.mxu0 %v552_v15  ;;  %v585_v47 = vld [vmem:[#allocation12 + $0x188] sm:$0xff]  ;;  %v584_v48 = vld [vmem:[#allocation12 + $0x180] sm:$0xff]  ;;  %v583_v49 = vld [vmem:[#allocation12 + $0x178] sm:$0xff] }
  0xa5   : > { %628 = vmatprep.subr.mxu0 %v551_v16  ;;  %v582_v50 = vld [vmem:[#allocation12 + $0x170] sm:$0xff]  ;;  %v581_v51 = vld [vmem:[#allocation12 + $0x168] sm:$0xff]  ;;  %v580_v52 = vld [vmem:[#allocation12 + $0x160] sm:$0xff] }
  0xa6   : > { %629 = vmatpush1.msra.mxu0 %v550_v17  ;;  %v579_v53 = vld [vmem:[#allocation12 + $0x158] sm:$0xff]  ;;  %v578_v54 = vld [vmem:[#allocation12 + $0x150] sm:$0xff]  ;;  %v577_v55 = vld [vmem:[#allocation12 + $0x148] sm:$0xff] }
  0xa7   : > { %630 = vmatprep.subr.mxu0 %v549_v18  ;;  %v576_v56 = vld [vmem:[#allocation12 + $0x140] sm:$0xff]  ;;  %v575_v57 = vld [vmem:[#allocation12 + $0x138] sm:$0xff]  ;;  %v574_v58 = vld [vmem:[#allocation12 + $0x130] sm:$0xff] }
  0xa8   : > { %631 = vmatpush1.msra.mxu0 %v548_v19  ;;  %v573_v59 = vld [vmem:[#allocation12 + $0x128] sm:$0xff]  ;;  %v572_v60 = vld [vmem:[#allocation12 + $0x120] sm:$0xff]  ;;  %v571_v61 = vld [vmem:[#allocation12 + $0x118] sm:$0xff] }
  0xa9   : > { %632 = vmatprep.subr.mxu0 %v547_v20  ;;  %v570_v62 = vld [vmem:[#allocation12 + $0x110] sm:$0xff]  ;;  %v569_v63 = vld [vmem:[#allocation12 + $0x108] sm:$0xff]  ;;  %v568_v0 = vld [vmem:[#allocation12 + $0x100] sm:$0xff] }
  0xaa   : > { %633 = vmatpush1.msra.mxu0 %v546_v21  ;;  %v530_v1 = vld [vmem:[%s448_s30] sm:$0xff]  ;;  %v864_v2 = vld [vmem:[#allocation12 + $0x4f8] sm:$0xff]  ;;  %v862_v5 = vld [vmem:[#allocation12 + $0x4e8] sm:$0xff]  ;;  %s1984_s30 = scalar_lea.vmem %s1983_s7, 512 }
  0xab   : > { %634 = vmatprep.subr.mxu0 %v545_v22  ;;  %v863_v3 = vld [vmem:[#allocation12 + $0x4f0] sm:$0xff]  ;;  %v2406_v4 = vld [vmem:[%s466_s3 + $0x8] sm:$0xff]  ;;  %v861_v6 = vld [vmem:[#allocation12 + $0x4e0] sm:$0xff]  ;;  %p1986_p4 = scmp.lt.s32.totalorder %s1984_s30, %s1978_s16 }
  0xac   : > { %635 = vmatpush1.msra.mxu0 %v544_v23  ;;  %v860_v7 = vld [vmem:[#allocation12 + $0x4d8] sm:$0xff]  ;;  %v859_v8 = vld [vmem:[#allocation12 + $0x4d0] sm:$0xff]  ;;  %v858_v9 = vld [vmem:[#allocation12 + $0x4c8] sm:$0xff] }
  0xad   : > { %636 = vmatprep.subr.mxu0 %v543_v25  ;;  %v857_v10 = vld [vmem:[#allocation12 + $0x4c0] sm:$0xff]  ;;  %v856_v11 = vld [vmem:[#allocation12 + $0x4b8] sm:$0xff]  ;;  %v855_v12 = vld [vmem:[#allocation12 + $0x4b0] sm:$0xff]  ;;  %p1987_p6 = por %p1986_p4, %p1985_p3 }
  0xae   : > { %637 = vmatpush1.msra.mxu0 %v542_v26  ;;  %v854_v13 = vld [vmem:[#allocation12 + $0x4a8] sm:$0xff]  ;;  %v853_v14 = vld [vmem:[#allocation12 + $0x4a0] sm:$0xff]  ;;  %v852_v15 = vld [vmem:[#allocation12 + $0x498] sm:$0xff] }
  0xaf   : > { %638 = vmatprep.subr.mxu0 %v541_v27  ;;  %v851_v16 = vld [vmem:[#allocation12 + $0x490] sm:$0xff]  ;;  %v850_v17 = vld [vmem:[#allocation12 + $0x488] sm:$0xff]  ;;  %v849_v18 = vld [vmem:[#allocation12 + $0x480] sm:$0xff]  ;;  %p1988_p8 = pnand %p1987_p6, %p1981_p13 }
  0xb0   : > { %639 = vmatpush1.msra.mxu0 %v540_v28  ;;  %v848_v19 = vld [vmem:[#allocation12 + $0x478] sm:$0xff]  ;;  %v847_v20 = vld [vmem:[#allocation12 + $0x470] sm:$0xff]  ;;  %v846_v21 = vld [vmem:[#allocation12 + $0x468] sm:$0xff] }
  0xb1   : > { %640 = vmatprep.subr.mxu0 %v539_v29  ;;  %v845_v22 = vld [vmem:[#allocation12 + $0x460] sm:$0xff]  ;;  %v844_v23 = vld [vmem:[#allocation12 + $0x458] sm:$0xff]  ;;  %v843_v24 = vld [vmem:[#allocation12 + $0x450] sm:$0xff] }
  0xb2   : > { %641 = vmatpush1.msra.mxu0 %v538_v30  ;;  %v842_v25 = vld [vmem:[#allocation12 + $0x448] sm:$0xff]  ;;  %v841_v26 = vld [vmem:[#allocation12 + $0x440] sm:$0xff]  ;;  %v840_v27 = vld [vmem:[#allocation12 + $0x438] sm:$0xff] }
  0xb3   : > { %642 = vmatprep.subr.mxu0 %v537_v31  ;;  %v839_v28 = vld [vmem:[#allocation12 + $0x430] sm:$0xff]  ;;  %v838_v29 = vld [vmem:[#allocation12 + $0x428] sm:$0xff]  ;;  %v837_v30 = vld [vmem:[#allocation12 + $0x420] sm:$0xff] }
  0xb4   : > { %643 = vmatpush1.msra.mxu0 %v536_v32  ;;  %v836_v31 = vld [vmem:[#allocation12 + $0x418] sm:$0xff]  ;;  %v835_v32 = vld [vmem:[#allocation12 + $0x410] sm:$0xff] }
  0xb5   : > { %644 = vmatprep.subr.mxu0 %v599_v33  ;;  %v834_v33 = vld [vmem:[#allocation12 + $0x408] sm:$0xff] }
  0xb6   : > { %645 = vmatpush2.msra.mxu0 %v598_v34  ;;  %v833_v34 = vld [vmem:[#allocation12 + $0x400] sm:$0xff] }
  0xb7   : > { %646 = vmatprep.subr.mxu0 %v597_v35  ;;  %v896_v35 = vld [vmem:[#allocation12 + $0x5f8] sm:$0xff] }
  0xb8   : > { %647 = vmatpush2.msra.mxu0 %v596_v36  ;;  %v895_v36 = vld [vmem:[#allocation12 + $0x5f0] sm:$0xff] }
  0xb9   : > { %648 = vmatprep.subr.mxu0 %v595_v37  ;;  %v894_v37 = vld [vmem:[#allocation12 + $0x5e8] sm:$0xff] }
  0xba   : > { %649 = vmatpush2.msra.mxu0 %v594_v38  ;;  %v893_v38 = vld [vmem:[#allocation12 + $0x5e0] sm:$0xff] }
  0xbb   : > { %650 = vmatprep.subr.mxu0 %v593_v39  ;;  %v892_v39 = vld [vmem:[#allocation12 + $0x5d8] sm:$0xff] }
  0xbc   : > { %651 = vmatpush2.msra.mxu0 %v592_v40  ;;  %v891_v40 = vld [vmem:[#allocation12 + $0x5d0] sm:$0xff] }
  0xbd   : > { %652 = vmatprep.subr.mxu0 %v591_v41  ;;  %v890_v41 = vld [vmem:[#allocation12 + $0x5c8] sm:$0xff] }
  0xbe   : > { %653 = vmatpush2.msra.mxu0 %v590_v42  ;;  %v889_v42 = vld [vmem:[#allocation12 + $0x5c0] sm:$0xff] }
  0xbf   : > { %654 = vmatprep.subr.mxu0 %v589_v43  ;;  %v888_v43 = vld [vmem:[#allocation12 + $0x5b8] sm:$0xff] }
  0xc0   : > { %655 = vmatpush2.msra.mxu0 %v588_v44  ;;  %v887_v44 = vld [vmem:[#allocation12 + $0x5b0] sm:$0xff] }
  0xc1   : > { %656 = vmatprep.subr.mxu0 %v587_v45  ;;  %v886_v45 = vld [vmem:[#allocation12 + $0x5a8] sm:$0xff] }
  0xc2   : > { %657 = vmatpush2.msra.mxu0 %v586_v46  ;;  %v885_v46 = vld [vmem:[#allocation12 + $0x5a0] sm:$0xff] }
  0xc3   : > { %658 = vmatprep.subr.mxu0 %v585_v47  ;;  %v884_v47 = vld [vmem:[#allocation12 + $0x598] sm:$0xff] }
  0xc4   : > { %659 = vmatpush2.msra.mxu0 %v584_v48  ;;  %v883_v48 = vld [vmem:[#allocation12 + $0x590] sm:$0xff] }
  0xc5   : > { %660 = vmatprep.subr.mxu0 %v583_v49  ;;  %v882_v49 = vld [vmem:[#allocation12 + $0x588] sm:$0xff] }
  0xc6   : > { %661 = vmatpush2.msra.mxu0 %v582_v50  ;;  %v881_v50 = vld [vmem:[#allocation12 + $0x580] sm:$0xff] }
  0xc7   : > { %662 = vmatprep.subr.mxu0 %v581_v51  ;;  %v880_v51 = vld [vmem:[#allocation12 + $0x578] sm:$0xff] }
  0xc8   : > { %663 = vmatpush2.msra.mxu0 %v580_v52  ;;  %v879_v52 = vld [vmem:[#allocation12 + $0x570] sm:$0xff] }
  0xc9   : > { %664 = vmatprep.subr.mxu0 %v579_v53  ;;  %v878_v53 = vld [vmem:[#allocation12 + $0x568] sm:$0xff] }
  0xca   : > { %665 = vmatpush2.msra.mxu0 %v578_v54  ;;  %v877_v54 = vld [vmem:[#allocation12 + $0x560] sm:$0xff] }
  0xcb   : > { %666 = vmatprep.subr.mxu0 %v577_v55  ;;  %v876_v55 = vld [vmem:[#allocation12 + $0x558] sm:$0xff] }
  0xcc   : > { %667 = vmatpush2.msra.mxu0 %v576_v56  ;;  %v875_v56 = vld [vmem:[#allocation12 + $0x550] sm:$0xff] }
  0xcd   : > { %668 = vmatprep.subr.mxu0 %v575_v57  ;;  %v874_v57 = vld [vmem:[#allocation12 + $0x548] sm:$0xff] }
  0xce   : > { %669 = vmatpush2.msra.mxu0 %v574_v58  ;;  %v873_v58 = vld [vmem:[#allocation12 + $0x540] sm:$0xff] }
  0xcf   : > { %670 = vmatprep.subr.mxu0 %v573_v59  ;;  %v872_v59 = vld [vmem:[#allocation12 + $0x538] sm:$0xff] }
  0xd0   : > { %671 = vmatpush2.msra.mxu0 %v572_v60  ;;  %v871_v60 = vld [vmem:[#allocation12 + $0x530] sm:$0xff] }
  0xd1   : > { %672 = vmatprep.subr.mxu0 %v571_v61  ;;  %v870_v61 = vld [vmem:[#allocation12 + $0x528] sm:$0xff] }
  0xd2   : > { %673 = vmatpush2.msra.mxu0 %v570_v62  ;;  %v869_v62 = vld [vmem:[#allocation12 + $0x520] sm:$0xff] }
  0xd3   : > { %674 = vmatprep.subr.mxu0 %v569_v63  ;;  %v868_v63 = vld [vmem:[#allocation12 + $0x518] sm:$0xff] }
  0xd4   : > { %675 = vmatpush2.msra.mxu0 %v568_v0  ;;  %v867_v0 = vld [vmem:[#allocation12 + $0x510] sm:$0xff] }
  0xd5   : > { %677 = vmatmul.mubr.f32.vlgmr.msra.gmra.mxu0 %v530_v1  ;;  %910 = vmatprep.subr.mxu0 %v864_v2  ;;  %v866_v1 = vld [vmem:[#allocation12 + $0x508] sm:$0xff]  ;;  %v865_v2 = vld [vmem:[#allocation12 + $0x500] sm:$0xff] }
  0xd6   : > { %911 = vmatpush1.msra.mxu0 %v863_v3  ;;  %974 = vmatprep.mubr.f32.mxu0 %v2406_v4  ;;  %v2411_v3 = vld [vmem:[%s466_s3] sm:$0xff] }
  0xd7   : > { %912 = vmatprep.subr.mxu0 %v862_v5  ;;  %v602_v5 = vlaneseq }
  0xd8   : > { %913 = vmatpush1.msra.mxu0 %v861_v6 }
  0xd9   : > { %914 = vmatprep.subr.mxu0 %v860_v7  ;;  %v603_v6 = vshrl.u32 %v602_v5, 7  ;;  %v738_v5 = vld [vmem:[#allocation12 + $0x3b0] sm:$0xff] }
  0xda   : > { %915 = vmatpush1.msra.mxu0 %v859_v8  ;;  %v600_v8 = vld [vmem:[#allocation14] ss:$4 sm:$0x3] }
  0xdb   : > { %916 = vmatprep.subr.mxu0 %v858_v9  ;;  %v2414_v7 = vsub.s32 1, %v603_v6  ;;  %v2416_v9 = vsub.s32 0, %v603_v6  ;;  %v737_v6 = vld [vmem:[#allocation12 + $0x3a8] sm:$0xff] }
  0xdc   : > { %917 = vmatpush1.msra.mxu0 %v857_v10 }
  0xdd   : > { %918 = vmatprep.subr.mxu0 %v856_v11  ;;  %v609_v10 = vrot.slane %v600_v8, %v2414_v7 }
  0xde   : > { %919 = vmatpush1.msra.mxu0 %v855_v12  ;;  %v605_v12 = vrot.slane %v600_v8, %v2416_v9  ;;  %v736_v8 = vld [vmem:[#allocation12 + $0x3a0] sm:$0xff] }
  0xdf   : > { %920 = vmatprep.subr.mxu0 %v854_v13 }
  0xe0   : > { %921 = vmatpush1.msra.mxu0 %v853_v14 }
  0xe1   : > { %922 = vmatprep.subr.mxu0 %v852_v15 }
  0xe2   : > { %923 = vmatpush1.msra.mxu0 %v851_v16  ;;  %v898_v16 = vld [vmem:[#allocation14 + $0x2] ss:$4 sm:$0x3] }
  0xe3   : > { %924 = vmatprep.subr.mxu0 %v850_v17  ;;  %v903_v17 = vrot.slane %v898_v16, %v2416_v9 }
  0xe4   : > { %925 = vmatpush1.msra.mxu0 %v849_v18  ;;  %v907_v18 = vrot.slane %v898_v16, %v2414_v7  ;;  %v729_v16 = vld [vmem:[#allocation12 + $0x368] sm:$0xff] }
  0xe5   : > { %926 = vmatprep.subr.mxu0 %v848_v19 }
  0xe6   : > { %927 = vmatpush1.msra.mxu0 %v847_v20 }
  0xe7   : > { %928 = vmatprep.subr.mxu0 %v846_v21 }
  0xe8   : > { %929 = vmatpush1.msra.mxu0 %v845_v22 }
  0xe9   : > { %930 = vmatprep.subr.mxu0 %v844_v23 }
  0xea   : > { %931 = vmatpush1.msra.mxu0 %v843_v24 }
  0xeb   : > { %932 = vmatprep.subr.mxu0 %v842_v25  ;;  %v715_v25 = vld [vmem:[#allocation12 + $0x2f8] sm:$0xff] }
  0xec   : > { %933 = vmatpush1.msra.mxu0 %v841_v26  ;;  %v714_v26 = vld [vmem:[#allocation12 + $0x2f0] sm:$0xff]  ;;  %761 = vmatprep.subr.mxu1 %v715_v25  ;;  %v720_v25 = vld [vmem:[#allocation12 + $0x320] sm:$0xff] }
  0xed   : > { %934 = vmatprep.subr.mxu0 %v840_v27  ;;  %v713_v27 = vld [vmem:[#allocation12 + $0x2e8] sm:$0xff]  ;;  %762 = vmatpush1.msra.mxu1 %v714_v26  ;;  %v719_v26 = vld [vmem:[#allocation12 + $0x318] sm:$0xff] }
  0xee   : > { %935 = vmatpush1.msra.mxu0 %v839_v28  ;;  %v712_v28 = vld [vmem:[#allocation12 + $0x2e0] sm:$0xff]  ;;  %763 = vmatprep.subr.mxu1 %v713_v27  ;;  %v718_v27 = vld [vmem:[#allocation12 + $0x310] sm:$0xff] }
  0xef   : > { %936 = vmatprep.subr.mxu0 %v838_v29  ;;  %v711_v29 = vld [vmem:[#allocation12 + $0x2d8] sm:$0xff]  ;;  %764 = vmatpush1.msra.mxu1 %v712_v28  ;;  %v717_v28 = vld [vmem:[#allocation12 + $0x308] sm:$0xff] }
  0xf0   : > { %937 = vmatpush1.msra.mxu0 %v837_v30  ;;  %v710_v30 = vld [vmem:[#allocation12 + $0x2d0] sm:$0xff]  ;;  %765 = vmatprep.subr.mxu1 %v711_v29  ;;  %v716_v29 = vld [vmem:[#allocation12 + $0x300] sm:$0xff] }
  0xf1   : > { %938 = vmatprep.subr.mxu0 %v836_v31  ;;  %v709_v31 = vld [vmem:[#allocation12 + $0x2c8] sm:$0xff]  ;;  %766 = vmatpush1.msra.mxu1 %v710_v30  ;;  %v532_v30 = vld [vmem:[%s457_s25] sm:$0xff] }
  0xf2   : > { %939 = vmatpush1.msra.mxu0 %v835_v32  ;;  %v708_v32 = vld [vmem:[#allocation12 + $0x2c0] sm:$0xff]  ;;  %767 = vmatprep.subr.mxu1 %v709_v31 }
  0xf3   : > { %940 = vmatprep.subr.mxu0 %v834_v33  ;;  %v707_v33 = vld [vmem:[#allocation12 + $0x2b8] sm:$0xff]  ;;  %768 = vmatpush1.msra.mxu1 %v708_v32 }
  0xf4   : > { %941 = vmatpush1.msra.mxu0 %v833_v34  ;;  %v706_v34 = vld [vmem:[#allocation12 + $0x2b0] sm:$0xff]  ;;  %769 = vmatprep.subr.mxu1 %v707_v33 }
  0xf5   : > { %942 = vmatprep.subr.mxu0 %v896_v35  ;;  %v705_v35 = vld [vmem:[#allocation12 + $0x2a8] sm:$0xff]  ;;  %770 = vmatpush1.msra.mxu1 %v706_v34 }
  0xf6   : > { %943 = vmatpush2.msra.mxu0 %v895_v36  ;;  %v704_v36 = vld [vmem:[#allocation12 + $0x2a0] sm:$0xff]  ;;  %771 = vmatprep.subr.mxu1 %v705_v35 }
  0xf7   : > { %944 = vmatprep.subr.mxu0 %v894_v37  ;;  %v703_v37 = vld [vmem:[#allocation12 + $0x298] sm:$0xff]  ;;  %772 = vmatpush1.msra.mxu1 %v704_v36 }
  0xf8   : > { %945 = vmatpush2.msra.mxu0 %v893_v38  ;;  %v702_v38 = vld [vmem:[#allocation12 + $0x290] sm:$0xff]  ;;  %773 = vmatprep.subr.mxu1 %v703_v37 }
  0xf9   : > { %946 = vmatprep.subr.mxu0 %v892_v39  ;;  %v701_v39 = vld [vmem:[#allocation12 + $0x288] sm:$0xff]  ;;  %774 = vmatpush1.msra.mxu1 %v702_v38 }
  0xfa   : > { %947 = vmatpush2.msra.mxu0 %v891_v40  ;;  %v700_v40 = vld [vmem:[#allocation12 + $0x280] sm:$0xff]  ;;  %775 = vmatprep.subr.mxu1 %v701_v39 }
  0xfb   : > { %948 = vmatprep.subr.mxu0 %v890_v41  ;;  %v699_v41 = vld [vmem:[#allocation12 + $0x278] sm:$0xff]  ;;  %776 = vmatpush1.msra.mxu1 %v700_v40 }
  0xfc   : > { %949 = vmatpush2.msra.mxu0 %v889_v42  ;;  %v698_v42 = vld [vmem:[#allocation12 + $0x270] sm:$0xff]  ;;  %777 = vmatprep.subr.mxu1 %v699_v41 }
  0xfd   : > { %950 = vmatprep.subr.mxu0 %v888_v43  ;;  %v697_v43 = vld [vmem:[#allocation12 + $0x268] sm:$0xff]  ;;  %778 = vmatpush1.msra.mxu1 %v698_v42 }
  0xfe   : > { %951 = vmatpush2.msra.mxu0 %v887_v44  ;;  %v696_v44 = vld [vmem:[#allocation12 + $0x260] sm:$0xff]  ;;  %779 = vmatprep.subr.mxu1 %v697_v43 }
  0xff   : > { %952 = vmatprep.subr.mxu0 %v886_v45  ;;  %v695_v45 = vld [vmem:[#allocation12 + $0x258] sm:$0xff]  ;;  %780 = vmatpush1.msra.mxu1 %v696_v44 }
 0x100   : > { %953 = vmatpush2.msra.mxu0 %v885_v46  ;;  %v694_v46 = vld [vmem:[#allocation12 + $0x250] sm:$0xff]  ;;  %781 = vmatprep.subr.mxu1 %v695_v45  ;;  %v749_v45 = vld [vmem:[#allocation14 + $0x1] ss:$4 sm:$0x3] }
 0x101   : > { %954 = vmatprep.subr.mxu0 %v884_v47  ;;  %v693_v47 = vld [vmem:[#allocation12 + $0x248] sm:$0xff]  ;;  %782 = vmatpush1.msra.mxu1 %v694_v46 }
 0x102   : > { %955 = vmatpush2.msra.mxu0 %v883_v48  ;;  %v692_v48 = vld [vmem:[#allocation12 + $0x240] sm:$0xff]  ;;  %783 = vmatprep.subr.mxu1 %v693_v47  ;;  %v754_v47 = vrot.slane %v749_v45, %v2416_v9 }
 0x103   : > { %956 = vmatprep.subr.mxu0 %v882_v49  ;;  %v533_v49 = vld [vmem:[%s457_s25 + $0x8] sm:$0xff]  ;;  %784 = vmatpush1.msra.mxu1 %v692_v48  ;;  %v758_v48 = vrot.slane %v749_v45, %v2414_v7 }
 0x104   : > { %957 = vmatpush2.msra.mxu0 %v881_v50  ;;  %v691_v50 = vld [vmem:[#allocation12 + $0x238] sm:$0xff]  ;;  %825 = vmatprep.mubr.f32.mxu1 %v533_v49  ;;  %v1228_v45 = vld [vmem:[#allocation15 + $0x180] sm:$0xff] }
 0x105   : > { %958 = vmatprep.subr.mxu0 %v880_v51  ;;  %v690_v51 = vld [vmem:[#allocation12 + $0x230] sm:$0xff]  ;;  %785 = vmatprep.subr.mxu1 %v691_v50 }
 0x106   : > { %959 = vmatpush2.msra.mxu0 %v879_v52  ;;  %v689_v52 = vld [vmem:[#allocation12 + $0x228] sm:$0xff]  ;;  %786 = vmatpush1.msra.mxu1 %v690_v51 }
 0x107   : > { %960 = vmatprep.subr.mxu0 %v878_v53  ;;  %v688_v53 = vld [vmem:[#allocation12 + $0x220] sm:$0xff]  ;;  %787 = vmatprep.subr.mxu1 %v689_v52 }
 0x108   : > { %961 = vmatpush2.msra.mxu0 %v877_v54  ;;  %v687_v54 = vld [vmem:[#allocation12 + $0x218] sm:$0xff]  ;;  %788 = vmatpush1.msra.mxu1 %v688_v53  ;;  %v1211_v52 = vld [vmem:[#allocation15 + $0xf8] sm:$0xff] }
 0x109   : > { %962 = vmatprep.subr.mxu0 %v876_v55  ;;  %v686_v55 = vld [vmem:[#allocation12 + $0x210] sm:$0xff]  ;;  %789 = vmatprep.subr.mxu1 %v687_v54 }
 0x10a   : > { %963 = vmatpush2.msra.mxu0 %v875_v56  ;;  %v685_v56 = vld [vmem:[#allocation12 + $0x208] sm:$0xff]  ;;  %790 = vmatpush1.msra.mxu1 %v686_v55 }
 0x10b   : > { %964 = vmatprep.subr.mxu0 %v874_v57  ;;  %v684_v57 = vld [vmem:[#allocation12 + $0x200] sm:$0xff]  ;;  %791 = vmatprep.subr.mxu1 %v685_v56 }
 0x10c   : > { %965 = vmatpush2.msra.mxu0 %v873_v58  ;;  %v747_v58 = vld [vmem:[#allocation12 + $0x3f8] sm:$0xff]  ;;  %792 = vmatpush1.msra.mxu1 %v684_v57 }
 0x10d   : > { %966 = vmatprep.subr.mxu0 %v872_v59  ;;  %v746_v59 = vld [vmem:[#allocation12 + $0x3f0] sm:$0xff]  ;;  %793 = vmatprep.subr.mxu1 %v747_v58 }
 0x10e   : > { %967 = vmatpush2.msra.mxu0 %v871_v60  ;;  %v745_v60 = vld [vmem:[#allocation12 + $0x3e8] sm:$0xff]  ;;  %794 = vmatpush2.msra.mxu1 %v746_v59  ;;  %v1210_v59 = vld [vmem:[#allocation15 + $0xf0] sm:$0xff] }
 0x10f   : > { %968 = vmatprep.subr.mxu0 %v870_v61  ;;  %v744_v61 = vld [vmem:[#allocation12 + $0x3e0] sm:$0xff]  ;;  %795 = vmatprep.subr.mxu1 %v745_v60  ;;  %v1209_v60 = vld [vmem:[#allocation15 + $0xe8] sm:$0xff] }
 0x110   : > { %969 = vmatpush2.msra.mxu0 %v869_v62  ;;  %v743_v62 = vld [vmem:[#allocation12 + $0x3d8] sm:$0xff]  ;;  %796 = vmatpush2.msra.mxu1 %v744_v61  ;;  %v1208_v61 = vld [vmem:[#allocation15 + $0xe0] sm:$0xff] }
 0x111   : > { %970 = vmatprep.subr.mxu0 %v868_v63  ;;  %v742_v63 = vld [vmem:[#allocation12 + $0x3d0] sm:$0xff]  ;;  %797 = vmatprep.subr.mxu1 %v743_v62  ;;  %v1207_v62 = vld [vmem:[#allocation15 + $0xd8] sm:$0xff] }
 0x112   : > { %971 = vmatpush2.msra.mxu0 %v867_v0  ;;  %v741_v0 = vld [vmem:[#allocation12 + $0x3c8] sm:$0xff]  ;;  %798 = vmatpush2.msra.mxu1 %v742_v63  ;;  %v1206_v63 = vld [vmem:[#allocation15 + $0xd0] sm:$0xff] }
 0x113   : > { %972 = vmatprep.subr.mxu0 %v866_v1  ;;  %v740_v1 = vld [vmem:[#allocation12 + $0x3c0] sm:$0xff]  ;;  %799 = vmatprep.subr.mxu1 %v741_v0  ;;  %v1205_v0 = vld [vmem:[#allocation15 + $0xc8] sm:$0xff] }
 0x114   : > { %973 = vmatpush2.msra.mxu0 %v865_v2  ;;  %v739_v2 = vld [vmem:[#allocation12 + $0x3b8] sm:$0xff]  ;;  %800 = vmatpush2.msra.mxu1 %v740_v1  ;;  %v1204_v1 = vld [vmem:[#allocation15 + $0xc0] sm:$0xff] }
 0x115   : > { %975 = vmatmul.mubr.f32.vlgmr.msra.gmra.mxu0 %v2411_v3  ;;  %801 = vmatprep.subr.mxu1 %v739_v2  ;;  %v1203_v2 = vld [vmem:[#allocation15 + $0xb8] sm:$0xff] }
 0x116   : > { %802 = vmatpush2.msra.mxu1 %v738_v5  ;;  %v1202_v5 = vld [vmem:[#allocation15 + $0xb0] sm:$0xff] }
 0x117   : > { %803 = vmatprep.subr.mxu1 %v737_v6  ;;  %v1201_v6 = vld [vmem:[#allocation15 + $0xa8] sm:$0xff] }
 0x118   : > { %804 = vmatpush2.msra.mxu1 %v736_v8  ;;  %v1200_v8 = vld [vmem:[#allocation15 + $0xa0] sm:$0xff] }
 0x195   : > { %v678_v11 = vpop.f32.mrf.mxu0 }
 0x196   : > { %v679_v15 = vadd.f32 %v678_v11, %v605_v12  ;;  %v734_v11 = vld [vmem:[#allocation12 + $0x390] sm:$0xff]  ;;  %v733_v12 = vld [vmem:[#allocation12 + $0x388] sm:$0xff] }
 0x197   : > { %v680_v13 = vpop.f32.mrf.mxu0 }
 0x198   : > { %v681_v14 = vadd.f32 %v680_v13, %v609_v10  ;;  %v735_v10 = vld [vmem:[#allocation12 + $0x398] sm:$0xff]  ;;  %v732_v13 = vld [vmem:[#allocation12 + $0x380] sm:$0xff] }
 0x199   : > { %805 = vmatprep.subr.mxu1 %v735_v10  ;;  %v1199_v10 = vld [vmem:[#allocation15 + $0x98] sm:$0xff] }
 0x19a   : > { %1664 = vmatprep.subr.mxu0 %v681_v14  ;;  %806 = vmatpush2.msra.mxu1 %v734_v11  ;;  %v1198_v11 = vld [vmem:[#allocation15 + $0x90] sm:$0xff] }
 0x19b   : > { %1665 = vmatpush3.xpose.msra.mxu0 %v681_v14  ;;  %v731_v14 = vld [vmem:[#allocation12 + $0x378] sm:$0xff]  ;;  %807 = vmatprep.subr.mxu1 %v733_v12  ;;  %v1197_v12 = vld [vmem:[#allocation15 + $0x88] sm:$0xff] }
 0x19c   : > { %1666 = vmatprep.subr.mxu0 %v679_v15  ;;  %808 = vmatpush2.msra.mxu1 %v732_v13  ;;  %v1196_v13 = vld [vmem:[#allocation15 + $0x80] sm:$0xff] }
 0x19d   : > { %809 = vmatprep.subr.mxu1 %v731_v14  ;;  %v1195_v14 = vld [vmem:[#allocation15 + $0x78] sm:$0xff] }
 0x19f   : > { %1667 = vmatpush3.xpose.msra.mxu0 %v679_v15  ;;  %v730_v15 = vld [vmem:[#allocation12 + $0x370] sm:$0xff] }
 0x1a0   : > { %810 = vmatpush2.msra.mxu1 %v730_v15  ;;  %v1194_v15 = vld [vmem:[#allocation15 + $0x70] sm:$0xff] }
 0x1a1   : > { %811 = vmatprep.subr.mxu1 %v729_v16  ;;  %v1193_v16 = vld [vmem:[#allocation15 + $0x68] sm:$0xff] }
 0x1d5   : > { %v976_v19 = vpop.f32.mrf.mxu0 }
 0x1d6   : > { %v977_v20 = vadd.f32 %v976_v19, %v903_v17  ;;  %v728_v17 = vld [vmem:[#allocation12 + $0x360] sm:$0xff]  ;;  %v726_v19 = vld [vmem:[#allocation12 + $0x350] sm:$0xff] }
 0x1d7   : > { %v978_v21 = vpop.f32.mrf.mxu0  ;;  %812 = vmatpush2.msra.mxu1 %v728_v17  ;;  %v1192_v17 = vld [vmem:[#allocation15 + $0x60] sm:$0xff] }
 0x1d8   : > { %v981_v22 = vmul.f32 0.125, %v977_v20  ;;  %v979_v23 = vadd.f32 %v978_v21, %v907_v18  ;;  %v727_v18 = vld [vmem:[#allocation12 + $0x358] sm:$0xff]  ;;  %v725_v20 = vld [vmem:[#allocation12 + $0x348] sm:$0xff]  ;;  %v724_v21 = vld [vmem:[#allocation12 + $0x340] sm:$0xff] }
 0x1d9   : > { %813 = vmatprep.subr.mxu1 %v727_v18  ;;  %v1191_v18 = vld [vmem:[#allocation15 + $0x58] sm:$0xff] }
 0x1da   : > { %v982_v24 = vmul.f32 0.125, %v979_v23  ;;  %1668 = vmatprep.mubr.f32.mxu0 %v981_v22  ;;  %814 = vmatpush2.msra.mxu1 %v726_v19  ;;  %v723_v22 = vld [vmem:[#allocation12 + $0x338] sm:$0xff]  ;;  %v722_v23 = vld [vmem:[#allocation12 + $0x330] sm:$0xff] }
 0x1db   : > { %815 = vmatprep.subr.mxu1 %v725_v20  ;;  %v1190_v19 = vld [vmem:[#allocation15 + $0x50] sm:$0xff]  ;;  %v1189_v20 = vld [vmem:[#allocation15 + $0x48] sm:$0xff] }
 0x1dc   : > { %1669 = vmatmul.mubr.f32.vlgmr.msra.gmra.mxu0 %v982_v24  ;;  %816 = vmatpush2.msra.mxu1 %v724_v21  ;;  %v721_v24 = vld [vmem:[#allocation12 + $0x328] sm:$0xff] }
 0x1dd   : > { %817 = vmatprep.subr.mxu1 %v723_v22  ;;  %v1188_v21 = vld [vmem:[#allocation15 + $0x40] sm:$0xff]  ;;  %v1187_v22 = vld [vmem:[#allocation15 + $0x38] sm:$0xff] }
 0x1de   : > { %818 = vmatpush2.msra.mxu1 %v722_v23  ;;  %v1186_v23 = vld [vmem:[#allocation15 + $0x30] sm:$0xff] }
 0x1df   : > { %819 = vmatprep.subr.mxu1 %v721_v24  ;;  %v1185_v24 = vld [vmem:[#allocation15 + $0x28] sm:$0xff] }
 0x1e0   : > { %820 = vmatpush2.msra.mxu1 %v720_v25  ;;  %v1184_v25 = vld [vmem:[#allocation15 + $0x20] sm:$0xff] }
 0x1e1   : > { %821 = vmatprep.subr.mxu1 %v719_v26  ;;  %v1183_v26 = vld [vmem:[#allocation15 + $0x18] sm:$0xff] }
 0x1e2   : > { %822 = vmatpush2.msra.mxu1 %v718_v27  ;;  %v1182_v27 = vld [vmem:[#allocation15 + $0x10] sm:$0xff] }
 0x1e3   : > { %823 = vmatprep.subr.mxu1 %v717_v28  ;;  %v1181_v28 = vld [vmem:[#allocation15 + $0x8] sm:$0xff] }
 0x1e4   : > { %824 = vmatpush2.msra.mxu1 %v716_v29  ;;  %v1180_v29 = vld [vmem:[#allocation15] sm:$0xff] }
 0x1e5   : > { %826 = vmatmul.mubr.f32.vlgmr.msra.gmra.mxu1 %v532_v30  ;;  %v1243_v30 = vld [vmem:[#allocation15 + $0x1f8] sm:$0xff] }
 0x29c   : > { %v1670_v31 = vpop.f32.mrf.mxu0 }
 0x29d   : > { %v1074_v34 = vsel %vm1070_vm0, %v1670_v31, -inf }
 0x29e   : > { %v1061_v32 = vpop.f32.mrf.mxu0 }
 0x29f   : > { %v1071_v33 = vsel %vm1070_vm0, %v1061_v32, -inf }
 0x2a0   : > { %1072 = vmax.xlane.f32.xlu0 %v1071_v33  ;;  %v1240_v33 = vld [vmem:[#allocation15 + $0x1e0] sm:$0xff] }
 0x2a4   : > { %1075 = vmax.xlane.f32.xlu0 %v1074_v34  ;;  %v1239_v34 = vld [vmem:[#allocation15 + $0x1d8] sm:$0xff] }
 0x2a5   : > { %v827_v46 = vpop.f32.mrf.mxu1 }
 0x2a6   : > { %v828_v50 = vadd.f32 %v827_v46, %v754_v47  ;;  %v1227_v46 = vld [vmem:[#allocation15 + $0x178] sm:$0xff]  ;;  %v1226_v47 = vld [vmem:[#allocation15 + $0x170] sm:$0xff] }
 0x2a7   : > { %v829_v49 = vpop.f32.mrf.mxu1 }
 0x2a8   : > { %v830_v51 = vadd.f32 %v829_v49, %v758_v48  ;;  %v1225_v48 = vld [vmem:[#allocation15 + $0x168] sm:$0xff]  ;;  %v1224_v49 = vld [vmem:[#allocation15 + $0x160] sm:$0xff] }
 0x2aa   : > { %1671 = vmatprep.subr.mxu1 %v830_v51 }
 0x2ab   : > { %1672 = vmatpush3.msra.mxu1 %v830_v51  ;;  %v1222_v51 = vld [vmem:[#allocation15 + $0x150] sm:$0xff] }
 0x2ac   : > { %1673 = vmatprep.subr.mxu1 %v828_v50 }
 0x2ad   : > { %1674 = vmatpush3.msra.mxu1 %v828_v50  ;;  %v1223_v50 = vld [vmem:[#allocation15 + $0x158] sm:$0xff] }
 0x2ae   : > { %1256 = vmatprep.subr.mxu1 %v1211_v52  ;;  %v1221_v52 = vld [vmem:[#allocation15 + $0x148] sm:$0xff] }
 0x329   : > { %v1073_v35 = vpop.xlane.xlu0 %1072 }
 0x32a   : > { %v1077_v36 = vsub.f32 %v1061_v32, %v1073_v35  ;;  %v1241_v32 = vld [vmem:[#allocation15 + $0x1e8] sm:$0xff]  ;;  %v1238_v35 = vld [vmem:[#allocation15 + $0x1d0] sm:$0xff] }
 0x32c   : > { %v1079_v37 = vmul.f32 1.442695, %v1077_v36  ;;  %v1237_v36 = vld [vmem:[#allocation15 + $0x1c8] sm:$0xff] }
 0x32d   : > { %v1076_v38 = vpop.xlane.xlu0 %1075 }
 0x32e   : > { %1806 = vpow2.f32 %v1079_v37  ;;  %v1078_v39 = vsub.f32 %v1670_v31, %v1076_v38  ;;  %v1242_v31 = vld [vmem:[#allocation15 + $0x1f0] sm:$0xff]  ;;  %v1236_v37 = vld [vmem:[#allocation15 + $0x1c0] sm:$0xff]  ;;  %v1235_v38 = vld [vmem:[#allocation15 + $0x1b8] sm:$0xff] }
 0x330   : > { %v1081_v40 = vmul.f32 1.442695, %v1078_v39  ;;  %v1234_v39 = vld [vmem:[#allocation15 + $0x1b0] sm:$0xff] }
 0x332   : > { %1808 = vpow2.f32 %v1081_v40  ;;  %v1233_v40 = vld [vmem:[#allocation15 + $0x1a8] sm:$0xff] }
 0x33b   : > { %v1807_v41 = vpop.eup %1806 }
 0x33c   : > { %v1083_v42 = vsel %vm1070_vm0, %v1807_v41, 0.0 }
 0x33d   : > { %1084 = vadd.xlane.f32.xlu1 %v1083_v42  ;;  %v1231_v42 = vld [vmem:[#allocation15 + $0x198] sm:$0xff] }
 0x33f   : > { %v1809_v43 = vpop.eup %1808 }
 0x340   : > { %v1086_v44 = vsel %vm1070_vm0, %v1809_v43, 0.0 }
 0x341   : > { %1087 = vadd.xlane.f32.xlu1 %v1086_v44  ;;  %v1229_v44 = vld [vmem:[#allocation15 + $0x188] sm:$0xff] }
 0x3c6   : > { %v1085_v53 = vpop.xlane.xlu1 %1084 }
 0x3c7   : > { %1810 = vrcp.f32 %v1085_v53  ;;  %v1220_v53 = vld [vmem:[#allocation15 + $0x140] sm:$0xff] }
 0x3ca   : > { %v1088_v54 = vpop.xlane.xlu1 %1087 }
 0x3cb   : > { %1812 = vrcp.f32 %v1088_v54  ;;  %v1219_v54 = vld [vmem:[#allocation15 + $0x138] sm:$0xff] }
 0x3d4   : > { %v1811_v55 = vpop.eup %1810 }
 0x3d5   : > { %v1091_v56 = vmul.f32 %v1811_v55, %v1807_v41  ;;  %v1232_v41 = vld [vmem:[#allocation15 + $0x1a0] sm:$0xff]  ;;  %v1218_v55 = vld [vmem:[#allocation15 + $0x130] sm:$0xff] }
 0x3d7   : > { %1675 = vmatprep.mubr.msk.f32.mxu1 %vm1070_vm0, %v1091_v56  ;;  %1093 = vst.msk [vmem:[%s2434_s21] sm:$0xff] %vm1070_vm0, %v1091_v56  ;;  %v1217_v56 = vld [vmem:[#allocation15 + $0x128] sm:$0xff] }
 0x3d8   : > { %v1813_v57 = vpop.eup %1812 }
 0x3d9   : > { %v1092_v58 = vmul.f32 %v1813_v57, %v1809_v43  ;;  %v1230_v43 = vld [vmem:[#allocation15 + $0x190] sm:$0xff]  ;;  %v1216_v57 = vld [vmem:[#allocation15 + $0x120] sm:$0xff] }
 0x3db   : > { %1676 = vmatmul.mubr.msk.f32.vlgmr.msra.gmra.mxu1 %vm1070_vm0, %v1092_v58  ;;  %1094 = vst.msk [vmem:[%s2434_s21 + $0x8] sm:$0xff] %vm1070_vm0, %v1092_v58  ;;  %v1215_v58 = vld [vmem:[#allocation15 + $0x118] sm:$0xff] }
 0x3dc   : > { %1257 = vmatpush1.msra.mxu1 %v1210_v59  ;;  %v1214_v59 = vld [vmem:[#allocation15 + $0x110] sm:$0xff] }
 0x3dd   : > { %1258 = vmatprep.subr.mxu1 %v1209_v60  ;;  %v1213_v60 = vld [vmem:[#allocation15 + $0x108] sm:$0xff] }
 0x3de   : > { %1259 = vmatpush1.msra.mxu1 %v1208_v61  ;;  %v1212_v61 = vld [vmem:[#allocation15 + $0x100] sm:$0xff] }
 0x3df   : > { %1260 = vmatprep.subr.mxu1 %v1207_v62 }
 0x3e0   : > { %1261 = vmatpush1.msra.mxu1 %v1206_v63 }
 0x3e1   : > { %1262 = vmatprep.subr.mxu1 %v1205_v0  ;;  %v1244_v0 = vld [vmem:[%s2555_s6] sm:$0x3] }
 0x3e2   : > { %1263 = vmatpush1.msra.mxu1 %v1204_v1  ;;  %v1249_v1 = vrot.slane %v1244_v0, %v2416_v9 }
 0x3e3   : > { %1264 = vmatprep.subr.mxu1 %v1203_v2  ;;  %v1253_v2 = vrot.slane %v1244_v0, %v2414_v7 }
 0x3e4   : > { %1265 = vmatpush1.msra.mxu1 %v1202_v5 }
 0x3e5   : > { %1266 = vmatprep.subr.mxu1 %v1201_v6 }
 0x3e6   : > { %1267 = vmatpush1.msra.mxu1 %v1200_v8 }
 0x3e7   : > { %1268 = vmatprep.subr.mxu1 %v1199_v10 }
 0x3e8   : > { %1269 = vmatpush1.msra.mxu1 %v1198_v11 }
 0x3e9   : > { %1270 = vmatprep.subr.mxu1 %v1197_v12 }
 0x3ea   : > { %1271 = vmatpush1.msra.mxu1 %v1196_v13 }
 0x3eb   : > { %1272 = vmatprep.subr.mxu1 %v1195_v14 }
 0x3ec   : > { %1273 = vmatpush1.msra.mxu1 %v1194_v15 }
 0x3ed   : > { %1274 = vmatprep.subr.mxu1 %v1193_v16 }
 0x3ee   : > { %1275 = vmatpush1.msra.mxu1 %v1192_v17 }
 0x3ef   : > { %1276 = vmatprep.subr.mxu1 %v1191_v18 }
 0x3f0   : > { %1277 = vmatpush1.msra.mxu1 %v1190_v19 }
 0x3f1   : > { %1278 = vmatprep.subr.mxu1 %v1189_v20 }
 0x3f2   : > { %1279 = vmatpush1.msra.mxu1 %v1188_v21 }
 0x3f3   : > { %1280 = vmatprep.subr.mxu1 %v1187_v22 }
 0x3f4   : > { %1281 = vmatpush1.msra.mxu1 %v1186_v23 }
 0x3f5   : > { %1282 = vmatprep.subr.mxu1 %v1185_v24 }
 0x3f6   : > { %1283 = vmatpush1.msra.mxu1 %v1184_v25 }
 0x3f7   : > { %1284 = vmatprep.subr.mxu1 %v1183_v26 }
 0x3f8   : > { %1285 = vmatpush1.msra.mxu1 %v1182_v27 }
 0x3f9   : > { %1286 = vmatprep.subr.mxu1 %v1181_v28 }
 0x3fa   : > { %1287 = vmatpush1.msra.mxu1 %v1180_v29 }
 0x3fb   : > { %1288 = vmatprep.subr.mxu1 %v1243_v30 }
 0x3fc   : > { %1289 = vmatpush2.msra.mxu1 %v1242_v31 }
 0x3fd   : > { %1290 = vmatprep.subr.mxu1 %v1241_v32 }
 0x3fe   : > { %1291 = vmatpush2.msra.mxu1 %v1240_v33 }
 0x3ff   : > { %1292 = vmatprep.subr.mxu1 %v1239_v34 }
 0x400   : > { %1293 = vmatpush2.msra.mxu1 %v1238_v35 }
 0x401   : > { %1294 = vmatprep.subr.mxu1 %v1237_v36 }
 0x402   : > { %1295 = vmatpush2.msra.mxu1 %v1236_v37 }
 0x403   : > { %1296 = vmatprep.subr.mxu1 %v1235_v38 }
 0x404   : > { %1297 = vmatpush2.msra.mxu1 %v1234_v39 }
 0x405   : > { %1298 = vmatprep.subr.mxu1 %v1233_v40 }
 0x406   : > { %1299 = vmatpush2.msra.mxu1 %v1232_v41 }
 0x407   : > { %1300 = vmatprep.subr.mxu1 %v1231_v42 }
 0x408   : > { %1301 = vmatpush2.msra.mxu1 %v1230_v43 }
 0x409   : > { %1302 = vmatprep.subr.mxu1 %v1229_v44 }
 0x40a   : > { %1303 = vmatpush2.msra.mxu1 %v1228_v45 }
 0x40b   : > { %1304 = vmatprep.subr.mxu1 %v1227_v46 }
 0x40c   : > { %1305 = vmatpush2.msra.mxu1 %v1226_v47 }
 0x40d   : > { %1306 = vmatprep.subr.mxu1 %v1225_v48 }
 0x40e   : > { %1307 = vmatpush2.msra.mxu1 %v1224_v49 }
 0x40f   : > { %1308 = vmatprep.subr.mxu1 %v1223_v50 }
 0x410   : > { %1309 = vmatpush2.msra.mxu1 %v1222_v51 }
 0x411   : > { %1310 = vmatprep.subr.mxu1 %v1221_v52 }
 0x412   : > { %1311 = vmatpush2.msra.mxu1 %v1220_v53 }
 0x413   : > { %1312 = vmatprep.subr.mxu1 %v1219_v54 }
 0x414   : > { %1313 = vmatpush2.msra.mxu1 %v1218_v55 }
 0x415   : > { %1314 = vmatprep.subr.mxu1 %v1217_v56 }
 0x416   : > { %1315 = vmatpush2.msra.mxu1 %v1216_v57 }
 0x417   : > { %1316 = vmatprep.subr.mxu1 %v1215_v58 }
 0x418   : > { %1317 = vmatpush2.msra.mxu1 %v1214_v59 }
 0x419   : > { %1318 = vmatprep.subr.mxu1 %v1213_v60 }
 0x41a   : > { %1319 = vmatpush2.msra.mxu1 %v1212_v61 }
 0x49b   : > { %v1677_v62 = vpop.f32.mrf.mxu1 }
 0x49c   : > { %1320 = vmatprep.mubr.f32.mxu1 %v1677_v62 }
 0x49d   : > { %v1167_v63 = vpop.f32.mrf.mxu1 }
 0x49e   : > { %1321 = vmatmul.mubr.f32.vlgmr.msra.gmra.mxu1 %v1167_v63 }
 0x55e   : > { %v1322_v5 = vpop.f32.mrf.mxu1 }
 0x55f   : > { %v1323_v6 = vadd.f32 %v1322_v5, %v1249_v1 }
 0x560   : > { %v1324_v8 = vpop.f32.mrf.mxu1 }
 0x561   : > { %v1325_v10 = vadd.f32 %v1324_v8, %v1253_v2  ;;  %v1327_v11 = vadd.f32 %v1323_v6, %v2411_v3 }
 0x563   : > { %v1328_v12 = vadd.f32 %v1325_v10, %v2406_v4 }
 0x565   : > { %v1329_v13 = vadd.f32 %v1328_v12, %v1327_v11 }
 0x567   : > { %1330 = vadd.xlane.f32.xlu0 %v1329_v13 }
 0x5f0   : > { %v1331_v14 = vpop.xlane.xlu0 %1330 }
 0x5f1   : > { %v1333_v15 = vmul.f32 0.00390625, %v1331_v14 }
 0x5f3   : > { %v1334_v16 = vsub.f32 %v1327_v11, %v1333_v15  ;;  %v1335_v17 = vsub.f32 %v1328_v12, %v1333_v15 }
 0x5f5   : > { %v1336_v18 = vmul.f32 %v1334_v16, %v1334_v16  ;;  %v1337_v19 = vmul.f32 %v1335_v17, %v1335_v17 }
 0x5f7   : > { %v1338_v20 = vadd.f32 %v1337_v19, %v1336_v18 }
 0x5f9   : > { %1339 = vadd.xlane.f32.xlu1 %v1338_v20 }
 0x5fa   : > { %1991 = shalt.err (!%p1988_p8)
}
 0x5fb   : > { %s1992_s4 = scalar_lea.hbm %s2458_s28, 256  ;;  %s1996_s3 = scalar_lea.hbm %s2618_s9, 1024 }
 0x5fc   : > { %p1993_p7 = scmp.ne.s32.totalorder %s2458_s28, %s1992_s4  ;;  %p1997_p1 = scmp.lt.s32.totalorder %s2458_s28, %s2618_s9 }
 0x5fd   : > { %p1998_p11 = scmp.lt.s32.totalorder %s1996_s3, %s1992_s4 }
 0x5fe   : > { %p1994_p10 = pnand %p1993_p7, %p2619_p12 }
 0x5ff   : > { %p1999_p5 = por %p1998_p11, %p1997_p1 }
 0x600   : > { %p1995_p0 = pneg %p1994_p10 }
 0x602   : > { %p2000_p2 = pnand %p1999_p5, %p1995_p0 }
 0x604   : > { %2003 = shalt.err (!%p2000_p2)
}
 0x605   : > { %s2127_s26 = smov 128   ;;  %s2128_s1 = smov 8  }
 0x606   : > { %1697 = dma.vmem_to_hbm [thread:$0]  (%p2619_p12), %s2461_s10, 256, %s2458_s28, %s1382_s11, %s2127_s26, %s2127_s26, %s2128_s1  }
 0x607   : > { %s2620_s29 = sld [smem:[#allocation37_spill]]  ;;  %s522_s28 = scalar_lea.vmem [#allocation17], %s2377_s27 }
 0x608   : > { %s2621_s7 = sld [smem:[#allocation38_spill]]  ;;  %s1398_s10 = sshll.u32 %s522_s28, 4  ;;  %s1399_s10 = int_to_ptr.vmem [resolvable:$true] %s1398_s10 }
 0x609   : > { %s2622_s4 = sld [smem:[#allocation39_spill]]  ;;  %s1377_s25 = scalar_lea.sflag [#allocation8], %s2374_s12 }
 0x60a   : > { %s2004_s3 = scalar_lea.vmem %s1399_s10, 256  ;;  %s2129_s27 = smov [#allocation17]  }
 0x60b   : > { %p2005_p9 = scmp.ne.s32.totalorder %s1399_s10, %s2004_s3  ;;  %s2008_s21 = sshll.u32 %s2129_s27, 4  ;;  %s2009_s21 = int_to_ptr.vmem [resolvable:$false] %s2008_s21 }
 0x60c   : > { %s2010_s23 = scalar_lea.vmem %s2009_s21, 512  ;;  %p2011_p4 = scmp.lt.s32.totalorder %s1399_s10, %s2009_s21 }
 0x60d   : > { %v1346_v22 = vld [vmem:[%s2620_s29] sm:$0x3]  ;;  %p2006_p13 = pnand %p2005_p9, %p2619_p12  ;;  %p2012_p6 = scmp.lt.s32.totalorder %s2010_s23, %s2004_s3 }
 0x60e   : > { %v1360_v23 = vld [vmem:[%s2621_s7] sm:$0x3]  ;;  %v1351_v24 = vrot.slane %v1346_v22, %v2416_v9  ;;  %v1355_v25 = vrot.slane %v1346_v22, %v2414_v7 }
 0x60f   : > { %v1365_v29 = vrot.slane %v1360_v23, %v2416_v9  ;;  %v1369_v30 = vrot.slane %v1360_v23, %v2414_v7  ;;  %s2502_s8 = scalar_lea.hbm %s2622_s4, %s1650_s22  ;;  %p2007_p3 = pneg %p2006_p13 }
 0x610   : > { %p2013_p8 = por %p2012_p6, %p2011_p4 }
 0x612   : > { %p2014_p7 = pnand %p2013_p8, %p2007_p3 }
 0x682   : > { %v1340_v4 = vpop.xlane.xlu1 %1339 }
 0x683   : > { %v1341_v3 = vmul.f32 0.00390625, %v1340_v4 }
 0x685   : > { %v1342_v21 = vadd.f32 1e-05, %v1341_v3 }
 0x687   : > { %1814 = vrsqrt.f32 %v1342_v21 }
 0x694   : > { %v1815_v26 = vpop.eup %1814 }
 0x695   : > { %v1344_v27 = vmul.f32 %v1815_v26, %v1334_v16  ;;  %v1345_v28 = vmul.f32 %v1815_v26, %v1335_v17 }
 0x697   : > { %v1358_v31 = vmul.f32 %v1351_v24, %v1344_v27  ;;  %v1359_v32 = vmul.f32 %v1355_v25, %v1345_v28 }
 0x699   : > { %v1372_v33 = vadd.f32 %v1365_v29, %v1358_v31  ;;  %v1373_v34 = vadd.f32 %v1369_v30, %v1359_v32 }
 0x69b   : > { %1374 = vst [vmem:[%s522_s28] sm:$0xff] %v1372_v33  ;;  %1375 = vst [vmem:[%s522_s28 + $0x8] sm:$0xff] %v1373_v34 }
 0x69c   : > { %2017 = shalt.err (!%p2014_p7)
}
 0x69d   : > { %s2018_s19 = scalar_lea.hbm %s2502_s8, 256  ;;  %s2022_s26 = scalar_lea.hbm %s2622_s4, 1024 }
 0x69e   : > { %p2019_p10 = scmp.ne.s32.totalorder %s2502_s8, %s2018_s19  ;;  %p2023_p11 = scmp.lt.s32.totalorder %s2502_s8, %s2622_s4 }
 0x69f   : > { %p2024_p5 = scmp.lt.s32.totalorder %s2022_s26, %s2018_s19 }
 0x6a0   : > { %p2020_p0 = pnand %p2019_p10, %p2619_p12 }
 0x6a1   : > { %p2025_p2 = por %p2024_p5, %p2023_p11 }
 0x6a2   : > { %p2021_p1 = pneg %p2020_p0 }
 0x6a4   : > { %p2026_p9 = pnand %p2025_p2, %p2021_p1 }
 0x6a6   : > { %2029 = shalt.err (!%p2026_p9)
}
 0x6a7   : > { %1696 = dma.vmem_to_hbm [thread:$0]  (%p2619_p12), %s1399_s10, 256, %s2502_s8, %s1377_s25  }
 0x6a8 PF: > { %s2623_s18 = sld [smem:[#allocation26_spill]]  ;;  %p1734_p13 = scmp.ge.s32.totalorder %s2116_s20, 2 }
 0x6a9   : > { %s2624_s29 = sld [smem:[#allocation29_spill]] }
 0x6ae   : > { %s1428_s16 = sand.u32 1, %s2623_s18  }
 0x6af   : > { %p2625_p3 = scmp.ne.s32.totalorder %s2624_s29, 0  ;;  %s1429_s17 = scalar_lea.sflag [#allocation8], %s1428_s16 }
 0x6b1   : > { %p1721_p4 = pnand %p1734_p13, %p2625_p3 }
 0x6b3   : > { %p1722_p6 = pneg %p1721_p4 }
 0x6b5   : > { %2079 = dma.done.wait (%p1722_p6), %s1429_s17, 256  }
 0x6b6   : > { %2081 = vsyncadd (%p1722_p6), %s1429_s17, 4294967040  ;;  %s1438_s7 = scalar_lea.sflag [#allocation19], %s1428_s16 }
 0x6b7   : > { %2083 = dma.done.wait (%p1722_p6), %s1438_s7, 256  }
 0x6b8   : > { %2085 = vsyncadd (%p1722_p6), %s1438_s7, 4294967040  ;;  %s35_s20 = sadd.s32 1, %s2116_s20   ;;  %s2626_s28 = sld [smem:[#allocation33_spill]] }
 0x6b9   : > { %p32_p8 = scmp.ge.s32.totalorder %s35_s20, 6   ;;  %s2627_s16 = sld [smem:[#allocation27_spill]] }
 0x6ba   : > { %s2628_s17 = sld [smem:[#allocation28_spill]]  ;;  %s2631_s13 = smov %s2092_s14 }
 0x6bb   : > { %s2629_s18 = sld [smem:[#allocation30_spill]]  ;;  %s2632_s14 = smov %s2096_s15 }
 0x6bc   : > { %s2630_s19 = sld [smem:[#allocation32_spill]]  ;;  %34 = sbr.rel (!%p32_p8) target bundleno = 21 (0x15), region = 158 }
 0x6be   : > { %s2633_s15 = smov %s2626_s28 }
 0x6c1   :  { %1443 = vsyncpa [#allocation7], 1 }
 0x6c2   :  { %1445 = vsyncpa [#allocation7 + $0x1], 1 }
 0x6c3   :  { %1446 = vsyncpa [#allocation10], 1 }
 0x6c4   :  { %1448 = vsyncpa [#allocation10 + $0x1], 1 }
 0x6c5   :  { %1449 = vsyncpa [#allocation13], 1 }
 0x6c6   :  { %1450 = vsyncpa [#allocation16], 1 }
 0x6c7   :  { %1451 = vsyncpa [#allocation8], 1 }
 0x6c8   :  { %1453 = vsyncpa [#allocation8 + $0x1], 1 }
 0x6c9   :  { %1454 = vsyncpa [#allocation19], 1 }
 0x6ca   :  { %1456 = vsyncpa [#allocation19 + $0x1], 1 }

</bundles_post_ra>
